<compile_context>
chip_gen: v5e
topology: v5e:2x2
jax: 0.10.0
libtpu: 0.0.40
codegen_flags: <defaults>
</compile_context>

<pallas_src>
import jax
import jax.numpy as jnp
from jax.experimental import pallas as pl
from jax.experimental.pallas import tpu as pltpu

IN_FEAT = 768          # fc input features
IN_CH = 512            # fc output / bottleneck input  (VIB_T in_ch)
Z_DIM = 256
OUT_CH = 2 * Z_DIM     # 512: bottleneck output width (z_given_v)
H1 = 1000              # ChannelCompress hidden 1 (logical)
H2 = 500               # ChannelCompress hidden 2 (logical)
H1_PAD = 1024          # padded to a multiple of 256 for clean MXU tiling
H2_PAD = 512
BN_EPS = 1e-5


def _vib_t_kernel(x_ref, wfc_ref, bfc_ref, w1_ref, b1_ref, w2_ref, b2_ref,
                  w3_ref, b3_ref, v_ref, z_ref):
    # x_ref: (TM, 768) bf16; weights pre-transposed to (K, N) bf16; biases (1, N) f32.
    x = x_ref[...]

    # v = fc(x): bf16 operands, f32 accumulation, f32 epilogue.
    v_f32 = jnp.dot(x, wfc_ref[...], preferred_element_type=jnp.float32) + bfc_ref[...]
    v_ref[...] = v_f32.astype(v_ref.dtype)

    # z = ChannelCompress(v)  (eval-mode BN folded into w1/b1 and w2/b2 in the wrapper).
    h = jnp.dot(v_f32.astype(jnp.bfloat16), w1_ref[...],
                preferred_element_type=jnp.float32) + b1_ref[...]
    h = jnp.maximum(h, 0.0).astype(jnp.bfloat16)
    h = jnp.dot(h, w2_ref[...], preferred_element_type=jnp.float32) + b2_ref[...]
    h = jnp.maximum(h, 0.0).astype(jnp.bfloat16)
    z = jnp.dot(h, w3_ref[...], preferred_element_type=jnp.float32) + b3_ref[...]
    z_ref[...] = z.astype(z_ref.dtype)


def _fold_bn(w, b, gamma, beta, mean, var, eps=BN_EPS):
    """Fold eval-mode BatchNorm1d into the preceding Linear (torch layout W:(out,in))."""
    scale = gamma / jnp.sqrt(var + eps)
    w_eff = w * scale[:, None]
    b_eff = (b - mean) * scale + beta
    return w_eff, b_eff


def prepare_vib_t_params(params):
    """One-time weight prep (hoisted out of the hot path):
    BN folding, transpose to (K, N), zero-pad hidden dims to 1024/512, cast to bf16.
    Biases stay f32 (added in the f32 accumulator)."""
    w1, b1 = _fold_bn(params["bneck_w1"], params["bneck_b1"],
                      params["bn1_gamma"], params["bn1_beta"],
                      params["bn1_mean"], params["bn1_var"])
    w2, b2 = _fold_bn(params["bneck_w2"], params["bneck_b2"],
                      params["bn2_gamma"], params["bn2_beta"],
                      params["bn2_mean"], params["bn2_var"])

    wfc = params["fc_w"].T.astype(jnp.bfloat16)                 # (768, 512)
    bfc = params["fc_b"].reshape(1, -1).astype(jnp.float32)     # (1, 512)

    # Layer 1: (512, 1000) -> pad output cols to 1024; bias -> 1024 (pad lanes zero).
    w1t = jnp.pad(w1.T, ((0, 0), (0, H1_PAD - H1))).astype(jnp.bfloat16)
    b1r = jnp.pad(b1.reshape(1, -1), ((0, 0), (0, H1_PAD - H1))).astype(jnp.float32)

    # Layer 2: (1000, 500) -> pad rows to 1024 and cols to 512; bias -> 512.
    w2t = jnp.pad(w2.T, ((0, H1_PAD - H1), (0, H2_PAD - H2))).astype(jnp.bfloat16)
    b2r = jnp.pad(b2.reshape(1, -1), ((0, 0), (0, H2_PAD - H2))).astype(jnp.float32)

    # Layer 3: (500, 512) -> pad rows to 512 (padded h lanes are exactly 0, inert).
    w3t = jnp.pad(params["bneck_w3"].T, ((0, H2_PAD - H2), (0, 0))).astype(jnp.bfloat16)
    b3r = params["bneck_b3"].reshape(1, -1).astype(jnp.float32)

    prepped = (wfc, bfc, w1t, b1r, w2t, b2r, w3t, b3r)
    return jax.tree_util.tree_map(jax.block_until_ready, prepped)


def _row_tile(m):
    """Pick the batch row tile.
    Large batches use 512-row tiles (amortizes the ~0.35us per-grid-step overhead);
    whenever m > 128 we guarantee >=2 grid steps so v7x's second TensorCore gets work."""
    if m <= 128:
        return (m + 7) // 8 * 8
    half = (m + 1) // 2
    return min(512, (half + 127) // 128 * 128)


def vib_t_forward(x, prepped):
    """x: (batch, 768) f32; prepped: output of prepare_vib_t_params. Returns (v, z) f32."""
    m, d = x.shape
    assert d == IN_FEAT
    wfc, bfc, w1t, b1r, w2t, b2r, w3t, b3r = prepped

    tm = _row_tile(m)
    m_pad = (m + tm - 1) // tm * tm
    x_p = x.astype(jnp.bfloat16)
    if m_pad != m:
        x_p = jnp.pad(x_p, ((0, m_pad - m), (0, 0)))
    grid = (m_pad // tm,)

    row = lambda i: (i, 0)     # per-tile blocks
    const = lambda i: (0, 0)   # VMEM-resident weights/biases (DMA'd once, ~3.3 MiB bf16)

    v_p, z_p = pl.pallas_call(
        _vib_t_kernel,
        out_shape=(jax.ShapeDtypeStruct((m_pad, IN_CH), jnp.float32),
                   jax.ShapeDtypeStruct((m_pad, OUT_CH), jnp.float32)),
        grid_spec=pltpu.PrefetchScalarGridSpec(
            num_scalar_prefetch=0,
            grid=grid,
            in_specs=[
                pl.BlockSpec((tm, IN_FEAT), row),
                pl.BlockSpec((IN_FEAT, IN_CH), const),
                pl.BlockSpec((1, IN_CH), const),
                pl.BlockSpec((IN_CH, H1_PAD), const),
                pl.BlockSpec((1, H1_PAD), const),
                pl.BlockSpec((H1_PAD, H2_PAD), const),
                pl.BlockSpec((1, H2_PAD), const),
                pl.BlockSpec((H2_PAD, OUT_CH), const),
                pl.BlockSpec((1, OUT_CH), const),
            ],
            out_specs=(
                pl.BlockSpec((tm, IN_CH), row),
                pl.BlockSpec((tm, OUT_CH), row),
            ),
        ),
        compiler_params=pltpu.CompilerParams(
            dimension_semantics=("parallel",),
            # ~12-14 MiB live footprint; 32 MiB is safe on v5e/v6e and on v7x's 64 MiB VMEM.
            vmem_limit_bytes=32 * 1024 * 1024,
        ),
    )(x_p, wfc, bfc, w1t, b1r, w2t, b2r, w3t, b3r)

    if m_pad != m:
        return v_p[:m], z_p[:m]
    return v_p, z_p


if __name__ == "__main__":
    key = jax.random.PRNGKey(0)
    keys = jax.random.split(key, 17)

    batch = 8
    x = jax.random.normal(keys[0], (batch, IN_FEAT), dtype=jnp.float32)

    def uinit(k, shape, fan_in):
        bound = 1.0 / (fan_in ** 0.5)
        return jax.random.uniform(k, shape, jnp.float32, -bound, bound)

    params = {
        # fc: Linear(768 -> 512), torch layout W:(out, in)
        "fc_w": uinit(keys[1], (IN_CH, IN_FEAT), IN_FEAT),
        "fc_b": uinit(keys[2], (IN_CH,), IN_FEAT),
        # ChannelCompress: Linear(512,1000)+BN, Linear(1000,500)+BN, Linear(500,512)
        "bneck_w1": uinit(keys[3], (H1, IN_CH), IN_CH),
        "bneck_b1": uinit(keys[4], (H1,), IN_CH),
        "bn1_gamma": 1.0 + 0.1 * jax.random.normal(keys[5], (H1,), jnp.float32),
        "bn1_beta": 0.1 * jax.random.normal(keys[6], (H1,), jnp.float32),
        "bn1_mean": 0.1 * jax.random.normal(keys[7], (H1,), jnp.float32),
        "bn1_var": jax.random.uniform(keys[8], (H1,), jnp.float32, 0.5, 1.5),
        "bneck_w2": uinit(keys[9], (H2, H1), H1),
        "bneck_b2": uinit(keys[10], (H2,), H1),
        "bn2_gamma": 1.0 + 0.1 * jax.random.normal(keys[11], (H2,), jnp.float32),
        "bn2_beta": 0.1 * jax.random.normal(keys[12], (H2,), jnp.float32),
        "bn2_mean": 0.1 * jax.random.normal(keys[13], (H2,), jnp.float32),
        "bn2_var": jax.random.uniform(keys[14], (H2,), jnp.float32, 0.5, 1.5),
        "bneck_w3": uinit(keys[15], (OUT_CH, H2), H2),
        "bneck_b3": uinit(keys[16], (OUT_CH,), H2),
    }

    # One-time weight prep (BN fold, transpose, pad, bf16) — outside the hot path.
    prepped = prepare_vib_t_params(params)

    v_out, z_out = vib_t_forward(x, prepped)
    v_out = jax.block_until_ready(v_out)
    z_out = jax.block_until_ready(z_out)

    # Plain-JAX f32 reference (same math as the torch module in eval mode).
    def ref_forward(xx, p):
        v = xx @ p["fc_w"].T + p["fc_b"]
        h = v @ p["bneck_w1"].T + p["bneck_b1"]
        h = (h - p["bn1_mean"]) / jnp.sqrt(p["bn1_var"] + BN_EPS) * p["bn1_gamma"] + p["bn1_beta"]
        h = jnp.maximum(h, 0.0)
        h = h @ p["bneck_w2"].T + p["bneck_b2"]
        h = (h - p["bn2_mean"]) / jnp.sqrt(p["bn2_var"] + BN_EPS) * p["bn2_gamma"] + p["bn2_beta"]
        h = jnp.maximum(h, 0.0)
        z = h @ p["bneck_w3"].T + p["bneck_b3"]
        return v, z

    v_ref, z_ref = ref_forward(x, params)
    assert v_out.shape == (batch, IN_CH)
    assert z_out.shape == (batch, OUT_CH)
    # Tolerances account for bf16 matmul operands (f32 accumulation preserved).
    assert jnp.allclose(v_out, v_ref, atol=3e-2, rtol=3e-2)
    assert jnp.allclose(z_out, z_ref, atol=3e-2, rtol=3e-2)

    print("KERNEL_OK")
</pallas_src>

<mosaic_0001>
module attributes {stable_mosaic.version = 11 : i64} {
  func.func @_vib_t_kernel(%arg0: i32, %arg1: memref<8x768xbf16, #tpu.memory_space<vmem>>, %arg2: memref<768x512xbf16, #tpu.memory_space<vmem>>, %arg3: memref<1x512xf32, #tpu.memory_space<vmem>>, %arg4: memref<512x1024xbf16, #tpu.memory_space<vmem>>, %arg5: memref<1x1024xf32, #tpu.memory_space<vmem>>, %arg6: memref<1024x512xbf16, #tpu.memory_space<vmem>>, %arg7: memref<1x512xf32, #tpu.memory_space<vmem>>, %arg8: memref<512x512xbf16, #tpu.memory_space<vmem>>, %arg9: memref<1x512xf32, #tpu.memory_space<vmem>>, %arg10: memref<8x512xf32, #tpu.memory_space<vmem>>, %arg11: memref<8x512xf32, #tpu.memory_space<vmem>>) attributes {dimension_semantics = [#tpu.dimension_semantics<parallel>], iteration_bounds = array<i64: 1>, scalar_prefetch = 0 : i64, scratch_operands = 0 : i64, tpu.core_type = #tpu.core_type<tc>, window_params = [{transform_indices = @transform_0, window_bounds = array<i64: 8, 768>}, {pipeline_mode = #tpu.pipeline_mode<synchronous>, transform_indices = @transform_1, window_bounds = array<i64: 768, 512>}, {pipeline_mode = #tpu.pipeline_mode<synchronous>, transform_indices = @transform_2, window_bounds = array<i64: 1, 512>}, {pipeline_mode = #tpu.pipeline_mode<synchronous>, transform_indices = @transform_3, window_bounds = array<i64: 512, 1024>}, {pipeline_mode = #tpu.pipeline_mode<synchronous>, transform_indices = @transform_4, window_bounds = array<i64: 1, 1024>}, {pipeline_mode = #tpu.pipeline_mode<synchronous>, transform_indices = @transform_5, window_bounds = array<i64: 1024, 512>}, {pipeline_mode = #tpu.pipeline_mode<synchronous>, transform_indices = @transform_6, window_bounds = array<i64: 1, 512>}, {pipeline_mode = #tpu.pipeline_mode<synchronous>, transform_indices = @transform_7, window_bounds = array<i64: 512, 512>}, {pipeline_mode = #tpu.pipeline_mode<synchronous>, transform_indices = @transform_8, window_bounds = array<i64: 1, 512>}, {transform_indices = @transform_9, window_bounds = array<i64: 8, 512>}, {transform_indices = @transform_10, window_bounds = array<i64: 8, 512>}]} {
    %c0 = arith.constant 0 : index
    %c0_0 = arith.constant 0 : index
    %0 = vector.load %arg1[%c0, %c0_0] : memref<8x768xbf16, #tpu.memory_space<vmem>>, vector<8x768xbf16>
    %c0_1 = arith.constant 0 : index
    %c0_2 = arith.constant 0 : index
    %1 = vector.load %arg2[%c0_1, %c0_2] : memref<768x512xbf16, #tpu.memory_space<vmem>>, vector<768x512xbf16>
    %cst = arith.constant dense<0.000000e+00> : vector<8x512xf32>
    %2 = tpu.matmul %0, %1, %cst {dimension_numbers = #tpu.dot_dimension_numbers<[1], [0], [0], [1], [0, 0, 1, 1], [], []>} : vector<8x768xbf16>, vector<768x512xbf16>, vector<8x512xf32> -> vector<8x512xf32>
    %c0_3 = arith.constant 0 : index
    %c0_4 = arith.constant 0 : index
    %3 = vector.load %arg3[%c0_3, %c0_4] : memref<1x512xf32, #tpu.memory_space<vmem>>, vector<1x512xf32>
    %4 = vector.broadcast %3 : vector<1x512xf32> to vector<8x512xf32>
    %5 = arith.addf %2, %4 : vector<8x512xf32>
    %c0_5 = arith.constant 0 : index
    %c0_6 = arith.constant 0 : index
    %6 = vector.load %arg10[%c0_5, %c0_6] : memref<8x512xf32, #tpu.memory_space<vmem>>, vector<8x512xf32>
    tpu.vector_store %arg10[%c0_5, %c0_6], %5 {strides = array<i32>} : memref<8x512xf32, #tpu.memory_space<vmem>>, vector<8x512xf32>,
    %7 = arith.truncf %5 : vector<8x512xf32> to vector<8x512xbf16>
    %c0_7 = arith.constant 0 : index
    %c0_8 = arith.constant 0 : index
    %8 = vector.load %arg4[%c0_7, %c0_8] : memref<512x1024xbf16, #tpu.memory_space<vmem>>, vector<512x1024xbf16>
    %cst_9 = arith.constant dense<0.000000e+00> : vector<8x1024xf32>
    %9 = tpu.matmul %7, %8, %cst_9 {dimension_numbers = #tpu.dot_dimension_numbers<[1], [0], [0], [1], [0, 0, 1, 1], [], []>} : vector<8x512xbf16>, vector<512x1024xbf16>, vector<8x1024xf32> -> vector<8x1024xf32>
    %c0_10 = arith.constant 0 : index
    %c0_11 = arith.constant 0 : index
    %10 = vector.load %arg5[%c0_10, %c0_11] : memref<1x1024xf32, #tpu.memory_space<vmem>>, vector<1x1024xf32>
    %11 = vector.broadcast %10 : vector<1x1024xf32> to vector<8x1024xf32>
    %12 = arith.addf %9, %11 : vector<8x1024xf32>
    %cst_12 = arith.constant 0.000000e+00 : f32
    %13 = vector.broadcast %cst_12 : f32 to vector<8x1024xf32>
    %14 = arith.maximumf %12, %13 : vector<8x1024xf32>
    %15 = arith.truncf %14 : vector<8x1024xf32> to vector<8x1024xbf16>
    %c0_13 = arith.constant 0 : index
    %c0_14 = arith.constant 0 : index
    %16 = vector.load %arg6[%c0_13, %c0_14] : memref<1024x512xbf16, #tpu.memory_space<vmem>>, vector<1024x512xbf16>
    %cst_15 = arith.constant dense<0.000000e+00> : vector<8x512xf32>
    %17 = tpu.matmul %15, %16, %cst_15 {dimension_numbers = #tpu.dot_dimension_numbers<[1], [0], [0], [1], [0, 0, 1, 1], [], []>} : vector<8x1024xbf16>, vector<1024x512xbf16>, vector<8x512xf32> -> vector<8x512xf32>
    %c0_16 = arith.constant 0 : index
    %c0_17 = arith.constant 0 : index
    %18 = vector.load %arg7[%c0_16, %c0_17] : memref<1x512xf32, #tpu.memory_space<vmem>>, vector<1x512xf32>
    %19 = vector.broadcast %18 : vector<1x512xf32> to vector<8x512xf32>
    %20 = arith.addf %17, %19 : vector<8x512xf32>
    %cst_18 = arith.constant 0.000000e+00 : f32
    %21 = vector.broadcast %cst_18 : f32 to vector<8x512xf32>
    %22 = arith.maximumf %20, %21 : vector<8x512xf32>
    %23 = arith.truncf %22 : vector<8x512xf32> to vector<8x512xbf16>
    %c0_19 = arith.constant 0 : index
    %c0_20 = arith.constant 0 : index
    %24 = vector.load %arg8[%c0_19, %c0_20] : memref<512x512xbf16, #tpu.memory_space<vmem>>, vector<512x512xbf16>
    %cst_21 = arith.constant dense<0.000000e+00> : vector<8x512xf32>
    %25 = tpu.matmul %23, %24, %cst_21 {dimension_numbers = #tpu.dot_dimension_numbers<[1], [0], [0], [1], [0, 0, 1, 1], [], []>} : vector<8x512xbf16>, vector<512x512xbf16>, vector<8x512xf32> -> vector<8x512xf32>
    %c0_22 = arith.constant 0 : index
    %c0_23 = arith.constant 0 : index
    %26 = vector.load %arg9[%c0_22, %c0_23] : memref<1x512xf32, #tpu.memory_space<vmem>>, vector<1x512xf32>
    %27 = vector.broadcast %26 : vector<1x512xf32> to vector<8x512xf32>
    %28 = arith.addf %25, %27 : vector<8x512xf32>
    %c0_24 = arith.constant 0 : index
    %c0_25 = arith.constant 0 : index
    %29 = vector.load %arg11[%c0_24, %c0_25] : memref<8x512xf32, #tpu.memory_space<vmem>>, vector<8x512xf32>
    tpu.vector_store %arg11[%c0_24, %c0_25], %28 {strides = array<i32>} : memref<8x512xf32, #tpu.memory_space<vmem>>, vector<8x512xf32>,
    return
  }
  func.func @transform_0(%arg0: i32) -> (i32, i32) {
    %c0_i32 = arith.constant 0 : i32
    %c0_i32_0 = arith.constant 0 : i32
    return %arg0, %c0_i32 : i32, i32
  }
  func.func @transform_1(%arg0: i32) -> (i32, i32) {
    %c0_i32 = arith.constant 0 : i32
    %c0_i32_0 = arith.constant 0 : i32
    %c0_i32_1 = arith.constant 0 : i32
    return %c0_i32, %c0_i32_0 : i32, i32
  }
  func.func @transform_2(%arg0: i32) -> (i32, i32) {
    %c0_i32 = arith.constant 0 : i32
    %c0_i32_0 = arith.constant 0 : i32
    %c0_i32_1 = arith.constant 0 : i32
    return %c0_i32, %c0_i32_0 : i32, i32
  }
  func.func @transform_3(%arg0: i32) -> (i32, i32) {
    %c0_i32 = arith.constant 0 : i32
    %c0_i32_0 = arith.constant 0 : i32
    %c0_i32_1 = arith.constant 0 : i32
    return %c0_i32, %c0_i32_0 : i32, i32
  }
  func.func @transform_4(%arg0: i32) -> (i32, i32) {
    %c0_i32 = arith.constant 0 : i32
    %c0_i32_0 = arith.constant 0 : i32
    %c0_i32_1 = arith.constant 0 : i32
    return %c0_i32, %c0_i32_0 : i32, i32
  }
  func.func @transform_5(%arg0: i32) -> (i32, i32) {
    %c0_i32 = arith.constant 0 : i32
    %c0_i32_0 = arith.constant 0 : i32
    %c0_i32_1 = arith.constant 0 : i32
    return %c0_i32, %c0_i32_0 : i32, i32
  }
  func.func @transform_6(%arg0: i32) -> (i32, i32) {
    %c0_i32 = arith.constant 0 : i32
    %c0_i32_0 = arith.constant 0 : i32
    %c0_i32_1 = arith.constant 0 : i32
    return %c0_i32, %c0_i32_0 : i32, i32
  }
  func.func @transform_7(%arg0: i32) -> (i32, i32) {
    %c0_i32 = arith.constant 0 : i32
    %c0_i32_0 = arith.constant 0 : i32
    %c0_i32_1 = arith.constant 0 : i32
    return %c0_i32, %c0_i32_0 : i32, i32
  }
  func.func @transform_8(%arg0: i32) -> (i32, i32) {
    %c0_i32 = arith.constant 0 : i32
    %c0_i32_0 = arith.constant 0 : i32
    %c0_i32_1 = arith.constant 0 : i32
    return %c0_i32, %c0_i32_0 : i32, i32
  }
  func.func @transform_9(%arg0: i32) -> (i32, i32) {
    %c0_i32 = arith.constant 0 : i32
    %c0_i32_0 = arith.constant 0 : i32
    return %arg0, %c0_i32 : i32, i32
  }
  func.func @transform_10(%arg0: i32) -> (i32, i32) {
    %c0_i32 = arith.constant 0 : i32
    %c0_i32_0 = arith.constant 0 : i32
    return %arg0, %c0_i32 : i32, i32
  }
}

</mosaic_0001>

<bundles_post_ra>
// kernel: tpu_custom_call.1
= control target key start
LH: loop header
LB: loop body
LE: loop exit
PB: predicated region body
PF: predicated region fallthrough
CT: control target
= control target key end

     0   :  { %16 = vsyncpa [#allocation3], 0  ;;  %s11515_s0 = inlined_call_operand.hbm [shape: bf16[8,768], index: 0, kind: input, shape index: {}]   ;;  %s11516_s1 = inlined_call_operand.hbm [shape: bf16[768,512], index: 1, kind: input, shape index: {}]   ;;  %s11517_s2 = inlined_call_operand.hbm [shape: f32[1,512], index: 2, kind: input, shape index: {}]   ;;  %s11518_s3 = inlined_call_operand.hbm [shape: bf16[512,1024], index: 3, kind: input, shape index: {}]   ;;  %s11519_s4 = inlined_call_operand.hbm [shape: f32[1,1024], index: 4, kind: input, shape index: {}]   ;;  %s11520_s5 = inlined_call_operand.hbm [shape: bf16[1024,512], index: 5, kind: input, shape index: {}]   ;;  %s11521_s6 = inlined_call_operand.vmem [shape: f32[1,512], index: 6, kind: input, shape index: {}]   ;;  %s11522_s7 = inlined_call_operand.hbm [shape: bf16[512,512], index: 7, kind: input, shape index: {}]   ;;  %s11523_s8 = inlined_call_operand.hbm [shape: f32[1,512], index: 8, kind: input, shape index: {}]   ;;  %s11524_s9 = inlined_call_operand.hbm [shape: f32[8,512], index: 9, kind: output, shape index: {0}]   ;;  %s11525_s10 = inlined_call_operand.hbm [shape: f32[8,512], index: 10, kind: output, shape index: {1}]  }
   0x1   :  { %17 = vsyncpa [#allocation6], 0 }
   0x2   :  { %18 = vsyncpa [#allocation9], 0 }
   0x3   :  { %19 = vsyncpa [#allocation12], 0 }
   0x4   :  { %20 = vsyncpa [#allocation15], 0 }
   0x5   :  { %21 = vsyncpa [#allocation4], 0  ;;  %s38_s15 = sshll.u32 %s11516_s1, 4  ;;  %s39_s15 = int_to_ptr.hbm [resolvable:$true] %s38_s15 }
   0x6   :  { %22 = vsyncpa [#allocation18], 0  ;;  %s11073_s16 = smov [#allocation5]   ;;  %s62_s20 = sshll.u32 %s11518_s3, 4  ;;  %s63_s20 = int_to_ptr.hbm [resolvable:$true] %s62_s20 }
   0x7   :  { %s40_s17 = sshll.u32 %s11073_s16, 4  ;;  %s11074_s21 = smov 256   ;;  %s41_s17 = int_to_ptr.vmem [resolvable:$true] %s40_s17 }
   0x8   :  { %s11075_s22 = smov 16   ;;  %s11076_s23 = smov [#allocation8]  }
   0x9   :  { %46 = dma.hbm_to_vmem [thread:$0]  %s39_s15, 24576, %s41_s17, [#allocation6], %s11074_s21, %s11074_s21, %s11075_s22  }
   0xa   :  { %s64_s24 = sshll.u32 %s11076_s23, 4  ;;  %s11077_s1 = smov 512   ;;  %s65_s24 = int_to_ptr.vmem [resolvable:$true] %s64_s24 }
   0xb   :  { %s11078_s25 = smov 32   ;;  %s86_s28 = sshll.u32 %s11520_s5, 4  ;;  %s87_s28 = int_to_ptr.hbm [resolvable:$true] %s86_s28 }
   0xc   :  { %70 = dma.hbm_to_vmem [thread:$0]  %s63_s20, 32768, %s65_s24, [#allocation9], %s11077_s1, %s11077_s1, %s11078_s25  }
   0xd   :  { %s11079_s29 = smov [#allocation11]   ;;  %s28_s12 = sshll.u32 %s11515_s0, 4  ;;  %s29_s12 = int_to_ptr.hbm [resolvable:$true] %s28_s12 }
   0xe   :  { %s88_s3 = sshll.u32 %s11079_s29, 4  ;;  %s11080_s13 = smov [#allocation2]   ;;  %s89_s3 = int_to_ptr.vmem [resolvable:$true] %s88_s3 }
   0xf   :  { %94 = dma.hbm_to_vmem [thread:$0]  %s87_s28, 32768, %s89_s3, [#allocation12], %s11074_s21, %s11074_s21, %s11075_s22  }
  0x10   :  { %s30_s14 = sshll.u32 %s11080_s13, 4  ;;  %s52_s17 = sshll.u32 %s11517_s2, 4  ;;  %s31_s14 = int_to_ptr.vmem [resolvable:$true] %s30_s14  ;;  %s53_s17 = int_to_ptr.hbm [resolvable:$true] %s52_s17 }
  0x11   :  { %33 = dma.hbm_to_vmem [thread:$0]  %s29_s12, 384, %s31_s14, [#allocation3]  }
  0x12   :  { %s76_s19 = sshll.u32 %s11519_s4, 4  ;;  %s11081_s20 = smov [#allocation7]   ;;  %s77_s19 = int_to_ptr.hbm [resolvable:$true] %s76_s19 }
  0x13   :  { %s54_s0 = sshll.u32 %s11081_s20, 4  ;;  %s11082_s23 = smov [#allocation10]   ;;  %s55_s0 = int_to_ptr.vmem [resolvable:$true] %s54_s0 }
  0x14   :  { %57 = dma.hbm_to_vmem [thread:$0]  %s53_s17, 64, %s55_s0, [#allocation6]  }
  0x15   :  { %s78_s24 = sshll.u32 %s11082_s23, 4  ;;  %s101_s26 = sshll.u32 %s11522_s7, 4  ;;  %s79_s24 = int_to_ptr.vmem [resolvable:$true] %s78_s24  ;;  %s102_s26 = int_to_ptr.hbm [resolvable:$true] %s101_s26 }
  0x16   :  { %81 = dma.hbm_to_vmem [thread:$0]  %s77_s19, 128, %s79_s24, [#allocation9]  }
  0x17   :  { %s115_s28 = sshll.u32 %s11523_s8, 4  ;;  %s11083_s29 = smov [#allocation13]   ;;  %s116_s28 = int_to_ptr.hbm [resolvable:$true] %s115_s28 }
  0x18   :  { %s103_s4 = sshll.u32 %s11083_s29, 4  ;;  %s11084_s3 = smov [#allocation14]   ;;  %s104_s4 = int_to_ptr.vmem [resolvable:$true] %s103_s4 }
  0x19   :  { %109 = dma.hbm_to_vmem [thread:$0]  %s102_s26, 16384, %s104_s4, [#allocation12], %s11074_s21, %s11074_s21, %s11075_s22  }
  0x1a   :  { %s117_s30 = sshll.u32 %s11084_s3, 4  ;;  %s118_s30 = int_to_ptr.vmem [resolvable:$true] %s117_s30 }
  0x1b   :  { %120 = dma.hbm_to_vmem [thread:$0]  %s116_s28, 64, %s118_s30, [#allocation15]  }
  0x1c   :  { %11059 = dma.done.wait [#allocation3], 384  }
  0x1d   :  { %11060 = vsyncadd [#allocation3], 4294966912 }
  0x1e   :  { %11061 = dma.done.wait [#allocation6], 24640  }
  0x1f   :  { %11062 = vsyncadd [#allocation6], 4294942656 }
  0x20   :  { %11063 = dma.done.wait [#allocation9], 32896  }
  0x21   :  { %11064 = vsyncadd [#allocation9], 4294934400 }
  0x22   :  { %11065 = dma.done.wait [#allocation12], 49152  }
  0x23   :  { %11066 = vsyncadd [#allocation12], 4294918144 }
  0x24   :  { %11067 = dma.done.wait [#allocation15], 64  }
  0x25   :  { %11068 = vsyncadd [#allocation15], 4294967232  ;;  %v6756_v0 = vld [vmem:[#allocation5 + $0xe0] sm:$0xf]  ;;  %v10000_v1 = vld [vmem:[#allocation5 + $0xec] sm:$0xf0] }
  0x26   :  { %v6884_v2 = vld [vmem:[#allocation5 + $0x1e0] sm:$0xf]  ;;  %v6757_v3 = vor.u32 %v10000_v1, %v6756_v0  ;;  %v10032_v4 = vld [vmem:[#allocation5 + $0x1ec] sm:$0xf0]  ;;  %s6612_s14 = sshll.u32 %s11524_s9, 4  ;;  %s11086_s9 = smov [#allocation17]   ;;  %s6613_s14 = int_to_ptr.hbm [resolvable:$true] %s6612_s14 }
  0x27   :  { %v7012_v5 = vld [vmem:[#allocation5 + $0x2e0] sm:$0xf]  ;;  %v10064_v6 = vld [vmem:[#allocation5 + $0x2ec] sm:$0xf0]  ;;  %v6885_v7 = vor.u32 %v10032_v4, %v6884_v2  ;;  %s6621_s15 = sshll.u32 %s11086_s9, 4  ;;  %s6623_s5 = sshll.u32 %s11525_s10, 4  ;;  %s6622_s15 = int_to_ptr.vmem [resolvable:$true] %s6621_s15  ;;  %s6624_s5 = int_to_ptr.hbm [resolvable:$true] %s6623_s5 }
  0x28   :  { %v7013_v8 = vor.u32 %v10064_v6, %v7012_v5  ;;  %v7140_v9 = vld [vmem:[#allocation5 + $0x3e0] sm:$0xf]  ;;  %v10096_v10 = vld [vmem:[#allocation5 + $0x3ec] sm:$0xf0]  ;;  %1339 = vmatpush.bf16.msra.mxu0 %v6757_v3 }
  0x29   :  { %v6740_v11 = vld [vmem:[#allocation5 + $0xc0] sm:$0xf]  ;;  %v7141_v12 = vor.u32 %v10096_v10, %v7140_v9  ;;  %v9996_v13 = vld [vmem:[#allocation5 + $0xcc] sm:$0xf0]  ;;  %1352 = vmatpush.bf16.msra.mxu1 %v6885_v7 }
  0x2a   :  { %v6868_v14 = vld [vmem:[#allocation5 + $0x1c0] sm:$0xf]  ;;  %v10028_v15 = vld [vmem:[#allocation5 + $0x1cc] sm:$0xf0]  ;;  %1365 = vmatpush.bf16.msra.mxu2 %v7013_v8  ;;  %v6741_v16 = vor.u32 %v9996_v13, %v6740_v11 }
  0x2b   :  { %v6869_v17 = vor.u32 %v10028_v15, %v6868_v14  ;;  %v6996_v18 = vld [vmem:[#allocation5 + $0x2c0] sm:$0xf]  ;;  %v10060_v19 = vld [vmem:[#allocation5 + $0x2cc] sm:$0xf0]  ;;  %1378 = vmatpush.bf16.msra.mxu3 %v7141_v12 }
  0x2c   :  { %v7124_v20 = vld [vmem:[#allocation5 + $0x3c0] sm:$0xf]  ;;  %v6997_v21 = vor.u32 %v10060_v19, %v6996_v18  ;;  %v10092_v22 = vld [vmem:[#allocation5 + $0x3cc] sm:$0xf0]  ;;  %1340 = vmatpush.bf16.msra.mxu0 %v6741_v16 }
  0x2d   :  { %v6724_v23 = vld [vmem:[#allocation5 + $0xa0] sm:$0xf]  ;;  %v9992_v24 = vld [vmem:[#allocation5 + $0xac] sm:$0xf0]  ;;  %v7125_v25 = vor.u32 %v10092_v22, %v7124_v20  ;;  %1353 = vmatpush.bf16.msra.mxu1 %v6869_v17 }
  0x2e   :  { %v6852_v26 = vld [vmem:[#allocation5 + $0x1a0] sm:$0xf]  ;;  %v10024_v27 = vld [vmem:[#allocation5 + $0x1ac] sm:$0xf0]  ;;  %v6725_v29 = vor.u32 %v9992_v24, %v6724_v23  ;;  %1366 = vmatpush.bf16.msra.mxu2 %v6997_v21 }
  0x2f   :  { %v6980_v28 = vld [vmem:[#allocation5 + $0x2a0] sm:$0xf]  ;;  %v10056_v30 = vld [vmem:[#allocation5 + $0x2ac] sm:$0xf0]  ;;  %v6853_v33 = vor.u32 %v10024_v27, %v6852_v26  ;;  %1379 = vmatpush.bf16.msra.mxu3 %v7125_v25 }
  0x30   :  { %v7108_v31 = vld [vmem:[#allocation5 + $0x3a0] sm:$0xf]  ;;  %v10088_v32 = vld [vmem:[#allocation5 + $0x3ac] sm:$0xf0]  ;;  %v6981_v34 = vor.u32 %v10056_v30, %v6980_v28  ;;  %1341 = vmatpush.bf16.msra.mxu0 %v6725_v29 }
  0x31   :  { %v6708_v35 = vld [vmem:[#allocation5 + $0x80] sm:$0xf]  ;;  %v9988_v36 = vld [vmem:[#allocation5 + $0x8c] sm:$0xf0]  ;;  %v7109_v38 = vor.u32 %v10088_v32, %v7108_v31  ;;  %1354 = vmatpush.bf16.msra.mxu1 %v6853_v33  ;;  %v9998_v33 = vld [vmem:[#allocation5 + $0xe4] sm:$0xf] }
  0x32   :  { %v6836_v37 = vld [vmem:[#allocation5 + $0x180] sm:$0xf]  ;;  %v10020_v39 = vld [vmem:[#allocation5 + $0x18c] sm:$0xf0]  ;;  %v6709_v44 = vor.u32 %v9988_v36, %v6708_v35  ;;  %1367 = vmatpush.bf16.msra.mxu2 %v6981_v34  ;;  %v6758_v34 = vld [vmem:[#allocation5 + $0xf0] sm:$0xf0] }
  0x33   :  { %v6964_v40 = vld [vmem:[#allocation5 + $0x280] sm:$0xf]  ;;  %v10052_v41 = vld [vmem:[#allocation5 + $0x28c] sm:$0xf0]  ;;  %v6837_v45 = vor.u32 %v10020_v39, %v6836_v37  ;;  %1380 = vmatpush.bf16.msra.mxu3 %v7109_v38  ;;  %v10030_v37 = vld [vmem:[#allocation5 + $0x1e4] sm:$0xf] }
  0x34   :  { %v7092_v42 = vld [vmem:[#allocation5 + $0x380] sm:$0xf]  ;;  %v10084_v43 = vld [vmem:[#allocation5 + $0x38c] sm:$0xf0]  ;;  %v6965_v46 = vor.u32 %v10052_v41, %v6964_v40  ;;  %1342 = vmatpush.bf16.msra.mxu0 %v6709_v44  ;;  %v6886_v38 = vld [vmem:[#allocation5 + $0x1f0] sm:$0xf0] }
  0x35   :  { %v6692_v47 = vld [vmem:[#allocation5 + $0x60] sm:$0xf]  ;;  %v9984_v48 = vld [vmem:[#allocation5 + $0x6c] sm:$0xf0]  ;;  %v7093_v50 = vor.u32 %v10084_v43, %v7092_v42  ;;  %1355 = vmatpush.bf16.msra.mxu1 %v6837_v45  ;;  %v6761_v42 = vor.u32 %v9998_v33, %v6758_v34  ;;  %v6822_v33 = vld [vmem:[#allocation5 + $0x170] sm:$0xf0] }
  0x36   :  { %v6820_v49 = vld [vmem:[#allocation5 + $0x160] sm:$0xf]  ;;  %v10016_v51 = vld [vmem:[#allocation5 + $0x16c] sm:$0xf0]  ;;  %v6693_v56 = vor.u32 %v9984_v48, %v6692_v47  ;;  %1368 = vmatpush.bf16.msra.mxu2 %v6965_v46  ;;  %v6889_v46 = vor.u32 %v10030_v37, %v6886_v38  ;;  %v9994_v48 = vld [vmem:[#allocation5 + $0xc4] sm:$0xf] }
  0x37   :  { %v6948_v52 = vld [vmem:[#allocation5 + $0x260] sm:$0xf]  ;;  %v10048_v53 = vld [vmem:[#allocation5 + $0x26c] sm:$0xf0]  ;;  %v6821_v57 = vor.u32 %v10016_v51, %v6820_v49  ;;  %1381 = vmatpush.bf16.msra.mxu3 %v7093_v50  ;;  %v6742_v49 = vld [vmem:[#allocation5 + $0xd0] sm:$0xf0] }
  0x38   :  { %v7076_v54 = vld [vmem:[#allocation5 + $0x360] sm:$0xf]  ;;  %v10080_v55 = vld [vmem:[#allocation5 + $0x36c] sm:$0xf0]  ;;  %v6949_v58 = vor.u32 %v10048_v53, %v6948_v52  ;;  %1343 = vmatpush.bf16.msra.mxu0 %v6693_v56  ;;  %v10026_v50 = vld [vmem:[#allocation5 + $0x1c4] sm:$0xf] }
  0x39   :  { %v6676_v59 = vld [vmem:[#allocation5 + $0x40] sm:$0xf]  ;;  %v9980_v60 = vld [vmem:[#allocation5 + $0x4c] sm:$0xf0]  ;;  %v7077_v62 = vor.u32 %v10080_v55, %v7076_v54  ;;  %1356 = vmatpush.bf16.msra.mxu1 %v6821_v57  ;;  %v6870_v51 = vld [vmem:[#allocation5 + $0x1d0] sm:$0xf0]  ;;  %v6745_v55 = vor.u32 %v9994_v48, %v6742_v49 }
  0x3a   :  { %v6804_v61 = vld [vmem:[#allocation5 + $0x140] sm:$0xf]  ;;  %v10012_v63 = vld [vmem:[#allocation5 + $0x14c] sm:$0xf0]  ;;  %v6677_v4 = vor.u32 %v9980_v60, %v6676_v59  ;;  %1369 = vmatpush.bf16.msra.mxu2 %v6949_v58  ;;  %v6873_v59 = vor.u32 %v10026_v50, %v6870_v51  ;;  %v9990_v60 = vld [vmem:[#allocation5 + $0xa4] sm:$0xf] }
  0x3b   :  { %v6932_v0 = vld [vmem:[#allocation5 + $0x240] sm:$0xf]  ;;  %v10044_v1 = vld [vmem:[#allocation5 + $0x24c] sm:$0xf0]  ;;  %v6805_v5 = vor.u32 %v10012_v63, %v6804_v61  ;;  %1382 = vmatpush.bf16.msra.mxu3 %v7077_v62  ;;  %v6726_v61 = vld [vmem:[#allocation5 + $0xb0] sm:$0xf0] }
  0x3c   :  { %v7060_v2 = vld [vmem:[#allocation5 + $0x340] sm:$0xf]  ;;  %v10076_v3 = vld [vmem:[#allocation5 + $0x34c] sm:$0xf0]  ;;  %v6933_v6 = vor.u32 %v10044_v1, %v6932_v0  ;;  %1344 = vmatpush.bf16.msra.mxu0 %v6677_v4  ;;  %v10022_v62 = vld [vmem:[#allocation5 + $0x1a4] sm:$0xf]  ;;  %v6729_v4 = vor.u32 %v9990_v60, %v6726_v61 }
  0x3d   :  { %v6660_v7 = vld [vmem:[#allocation5 + $0x20] sm:$0xf]  ;;  %v9976_v8 = vld [vmem:[#allocation5 + $0x2c] sm:$0xf0]  ;;  %v7061_v10 = vor.u32 %v10076_v3, %v7060_v2  ;;  %1357 = vmatpush.bf16.msra.mxu1 %v6805_v5  ;;  %v6854_v63 = vld [vmem:[#allocation5 + $0x1b0] sm:$0xf0] }
  0x3e   :  { %v6788_v9 = vld [vmem:[#allocation5 + $0x120] sm:$0xf]  ;;  %v10008_v11 = vld [vmem:[#allocation5 + $0x12c] sm:$0xf0]  ;;  %v6661_v16 = vor.u32 %v9976_v8, %v6660_v7  ;;  %1370 = vmatpush.bf16.msra.mxu2 %v6933_v6  ;;  %v153_v3 = vld [vmem:[#allocation2] sm:$0xff] }
  0x3f   :  { %v6916_v12 = vld [vmem:[#allocation5 + $0x220] sm:$0xf]  ;;  %v10040_v13 = vld [vmem:[#allocation5 + $0x22c] sm:$0xf0]  ;;  %v6789_v19 = vor.u32 %v10008_v11, %v6788_v9  ;;  %1383 = vmatpush.bf16.msra.mxu3 %v7061_v10  ;;  %v361_v9 = vunpack.c.l.b16 %v153_v3  ;;  %v6857_v11 = vor.u32 %v10022_v62, %v6854_v63 }
  0x40   :  { %v7044_v14 = vld [vmem:[#allocation5 + $0x320] sm:$0xf]  ;;  %v10072_v15 = vld [vmem:[#allocation5 + $0x32c] sm:$0xf0]  ;;  %v6917_v20 = vor.u32 %v10040_v13, %v6916_v12  ;;  %1345 = vmatpush.bf16.msra.mxu0 %v6661_v16  ;;  %v9986_v13 = vld [vmem:[#allocation5 + $0x84] sm:$0xf] }
  0x41   :  { %v6644_v17 = vld [vmem:[#allocation5] sm:$0xf]  ;;  %v9972_v18 = vld [vmem:[#allocation5 + $0xc] sm:$0xf0]  ;;  %v7045_v24 = vor.u32 %v10072_v15, %v7044_v14  ;;  %1358 = vmatpush.bf16.msra.mxu1 %v6789_v19  ;;  %v6710_v14 = vld [vmem:[#allocation5 + $0x90] sm:$0xf0]  ;;  %v362_v15 = vunpack.c.h.b16 %v153_v3  ;;  %v11177_v19 = vpack.c.b16 %v361_v9, %v361_v9 }
  0x42   :  { %v6772_v21 = vld [vmem:[#allocation5 + $0x100] sm:$0xf]  ;;  %v10004_v22 = vld [vmem:[#allocation5 + $0x10c] sm:$0xf0]  ;;  %v6645_v31 = vor.u32 %v9972_v18, %v6644_v17  ;;  %1371 = vmatpush.bf16.msra.mxu2 %v6917_v20  ;;  %v10018_v16 = vld [vmem:[#allocation5 + $0x184] sm:$0xf] }
  0x43   :  { %v6900_v23 = vld [vmem:[#allocation5 + $0x200] sm:$0xf]  ;;  %v10036_v25 = vld [vmem:[#allocation5 + $0x20c] sm:$0xf0]  ;;  %v6773_v35 = vor.u32 %v10004_v22, %v6772_v21  ;;  %1384 = vmatpush.bf16.msra.mxu3 %v7045_v24  ;;  %v6838_v17 = vld [vmem:[#allocation5 + $0x190] sm:$0xf0]  ;;  %v11181_v22 = vpack.c.b16 %v362_v15, %v362_v15  ;;  %v6713_v24 = vor.u32 %v9986_v13, %v6710_v14 }
  0x44   :  { %v7028_v26 = vld [vmem:[#allocation5 + $0x300] sm:$0xf]  ;;  %v10068_v27 = vld [vmem:[#allocation5 + $0x30c] sm:$0xf0]  ;;  %v6901_v36 = vor.u32 %v10036_v25, %v6900_v23  ;;  %1346 = vmatpush.bf16.msra.mxu0 %v6645_v31  ;;  %v6694_v31 = vld [vmem:[#allocation5 + $0x70] sm:$0xf0] }
  0x45   :  { %v7268_v28 = vld [vmem:[#allocation5 + $0x4e0] sm:$0xf]  ;;  %v10128_v29 = vld [vmem:[#allocation5 + $0x4ec] sm:$0xf0]  ;;  %v7029_v39 = vor.u32 %v10068_v27, %v7028_v26  ;;  %1359 = vmatpush.bf16.msra.mxu1 %v6773_v35  ;;  %v10094_v9 = vld [vmem:[#allocation5 + $0x3e4] sm:$0xf] }
  0x46   :  { %v7396_v30 = vld [vmem:[#allocation5 + $0x5e0] sm:$0xf]  ;;  %v10160_v32 = vld [vmem:[#allocation5 + $0x5ec] sm:$0xf0]  ;;  %v7269_v40 = vor.u32 %v10128_v29, %v7268_v28  ;;  %1372 = vmatpush.bf16.msra.mxu2 %v6901_v36  ;;  %v6841_v28 = vor.u32 %v10018_v16, %v6838_v17  ;;  %v7270_v13 = vld [vmem:[#allocation5 + $0x4f0] sm:$0xf0] }
  0x47   :  { %v7397_v41 = vor.u32 %v10160_v32, %v7396_v30  ;;  %v7252_v43 = vld [vmem:[#allocation5 + $0x4c0] sm:$0xf]  ;;  %v10124_v44 = vld [vmem:[#allocation5 + $0x4cc] sm:$0xf0]  ;;  %1385 = vmatpush.bf16.msra.mxu3 %v7029_v39  ;;  %v9982_v30 = vld [vmem:[#allocation5 + $0x64] sm:$0xf]  ;;  %1347 = vmatmul.bf16.vlgmr.msra.gmra.mxu0 %v11177_v19 }
  0x48   :  { %v7380_v45 = vld [vmem:[#allocation5 + $0x5c0] sm:$0xf]  ;;  %v10156_v47 = vld [vmem:[#allocation5 + $0x5cc] sm:$0xf0]  ;;  %1391 = vmatpush.bf16.msrb.mxu0 %v7269_v40  ;;  %v7253_v52 = vor.u32 %v10124_v44, %v7252_v43  ;;  %v10014_v32 = vld [vmem:[#allocation5 + $0x164] sm:$0xf]  ;;  %1360 = vmatmul.bf16.vlgmr.msra.gmra.mxu1 %v11181_v22  ;;  %v6697_v36 = vor.u32 %v9982_v30, %v6694_v31 }
  0x49   :  { %v7236_v53 = vld [vmem:[#allocation5 + $0x4a0] sm:$0xf]  ;;  %1404 = vmatpush.bf16.msrb.mxu1 %v7397_v41  ;;  %v7381_v54 = vor.u32 %v10156_v47, %v7380_v45  ;;  %v10120_v56 = vld [vmem:[#allocation5 + $0x4ac] sm:$0xf0]  ;;  %v6825_v40 = vor.u32 %v10014_v32, %v6822_v33  ;;  %v6678_v43 = vld [vmem:[#allocation5 + $0x50] sm:$0xf0] }
  0x4a   :  { %1417 = vmatpush.bf16.msrb.mxu2 %v6761_v42  ;;  %v7364_v57 = vld [vmem:[#allocation5 + $0x5a0] sm:$0xf]  ;;  %v10152_v58 = vld [vmem:[#allocation5 + $0x5ac] sm:$0xf0]  ;;  %v7237_v0 = vor.u32 %v10120_v56, %v7236_v53  ;;  %v9978_v42 = vld [vmem:[#allocation5 + $0x44] sm:$0xf] }
  0x4b   :  { %1430 = vmatpush.bf16.msrb.mxu3 %v6889_v46  ;;  %v7365_v1 = vor.u32 %v10152_v58, %v7364_v57  ;;  %v154_v2 = vld [vmem:[#allocation2 + $0x8] sm:$0xff]  ;;  %v7220_v5 = vld [vmem:[#allocation5 + $0x480] sm:$0xf]  ;;  %v10010_v44 = vld [vmem:[#allocation5 + $0x144] sm:$0xf]  ;;  %v6681_v48 = vor.u32 %v9978_v42, %v6678_v43 }
  0x4c   :  { %1392 = vmatpush.bf16.msrb.mxu0 %v7253_v52  ;;  %v10116_v6 = vld [vmem:[#allocation5 + $0x48c] sm:$0xf0]  ;;  %v7348_v7 = vld [vmem:[#allocation5 + $0x580] sm:$0xf]  ;;  %v363_v8 = vunpack.c.l.b16 %v154_v2  ;;  %v364_v10 = vunpack.c.h.b16 %v154_v2  ;;  %v6806_v45 = vld [vmem:[#allocation5 + $0x150] sm:$0xf0] }
  0x4d   :  { %1405 = vmatpush.bf16.msrb.mxu1 %v7381_v54  ;;  %v10148_v12 = vld [vmem:[#allocation5 + $0x58c] sm:$0xf0]  ;;  %v7221_v21 = vor.u32 %v10116_v6, %v7220_v5  ;;  %v7204_v25 = vld [vmem:[#allocation5 + $0x460] sm:$0xf]  ;;  %v6809_v52 = vor.u32 %v10010_v44, %v6806_v45  ;;  %v9974_v54 = vld [vmem:[#allocation5 + $0x24] sm:$0xf] }
  0x4e   :  { %1418 = vmatpush.bf16.msrb.mxu2 %v6745_v55  ;;  %v11175_v18 = vpack.c.b16 %v363_v8, %v363_v8  ;;  %v11179_v20 = vpack.c.b16 %v364_v10, %v364_v10  ;;  %v7349_v23 = vor.u32 %v10148_v12, %v7348_v7  ;;  %v10112_v26 = vld [vmem:[#allocation5 + $0x46c] sm:$0xf0]  ;;  %v7332_v27 = vld [vmem:[#allocation5 + $0x560] sm:$0xf]  ;;  %v6662_v55 = vld [vmem:[#allocation5 + $0x30] sm:$0xf0] }
  0x4f   :  { %1431 = vmatpush.bf16.msrb.mxu3 %v6873_v59  ;;  %v10144_v29 = vld [vmem:[#allocation5 + $0x56c] sm:$0xf0]  ;;  %v7205_v34 = vor.u32 %v10112_v26, %v7204_v25  ;;  %v7188_v37 = vld [vmem:[#allocation5 + $0x440] sm:$0xf]  ;;  %v10006_v56 = vld [vmem:[#allocation5 + $0x124] sm:$0xf]  ;;  %v6665_v63 = vor.u32 %v9974_v54, %v6662_v55 }
  0x50   :  { %1393 = vmatpush.bf16.msrb.mxu0 %v7237_v0  ;;  %1373 = vmatmul.bf16.vlgmr.msra.gmra.mxu2 %v11175_v18  ;;  %v7333_v35 = vor.u32 %v10144_v29, %v7332_v27  ;;  %v10108_v38 = vld [vmem:[#allocation5 + $0x44c] sm:$0xf0]  ;;  %v7316_v39 = vld [vmem:[#allocation5 + $0x540] sm:$0xf]  ;;  %v6790_v57 = vld [vmem:[#allocation5 + $0x130] sm:$0xf0] }
  0x51   :  { %1406 = vmatpush.bf16.msrb.mxu1 %v7365_v1  ;;  %1386 = vmatmul.bf16.vlgmr.msra.gmra.mxu3 %v11179_v20  ;;  %v10140_v41 = vld [vmem:[#allocation5 + $0x54c] sm:$0xf0]  ;;  %v7189_v46 = vor.u32 %v10108_v38, %v7188_v37  ;;  %v7172_v49 = vld [vmem:[#allocation5 + $0x420] sm:$0xf]  ;;  %v9970_v1 = vld [vmem:[#allocation5 + $0x4] sm:$0xf]  ;;  %v6793_v3 = vor.u32 %v10006_v56, %v6790_v57 }
  0x52   :  { %1419 = vmatpush.bf16.msrb.mxu2 %v6729_v4  ;;  %v7317_v47 = vor.u32 %v10140_v41, %v7316_v39  ;;  %v10104_v50 = vld [vmem:[#allocation5 + $0x42c] sm:$0xf0]  ;;  %v7300_v51 = vld [vmem:[#allocation5 + $0x520] sm:$0xf]  ;;  %v155_v2 = vld [vmem:[#allocation2 + $0x10] sm:$0xff] }
  0x53   :  { %1432 = vmatpush.bf16.msrb.mxu3 %v6857_v11  ;;  %v10136_v53 = vld [vmem:[#allocation5 + $0x52c] sm:$0xf0]  ;;  %v7173_v58 = vor.u32 %v10104_v50, %v7172_v49  ;;  %v7156_v59 = vld [vmem:[#allocation5 + $0x400] sm:$0xf]  ;;  %v6646_v4 = vld [vmem:[#allocation5 + $0x10] sm:$0xf0]  ;;  %v365_v14 = vunpack.c.l.b16 %v155_v2 }
  0x54   :  { %1394 = vmatpush.bf16.msrb.mxu0 %v7221_v21  ;;  %v10100_v60 = vld [vmem:[#allocation5 + $0x40c] sm:$0xf0]  ;;  %v7284_v61 = vld [vmem:[#allocation5 + $0x500] sm:$0xf]  ;;  %v7301_v62 = vor.u32 %v10136_v53, %v7300_v51  ;;  %v10002_v5 = vld [vmem:[#allocation5 + $0x104] sm:$0xf]  ;;  %v6649_v16 = vor.u32 %v9970_v1, %v6646_v4 }
  0x55   :  { %1407 = vmatpush.bf16.msrb.mxu1 %v7349_v23  ;;  %v10132_v0 = vld [vmem:[#allocation5 + $0x50c] sm:$0xf0]  ;;  %v6774_v6 = vld [vmem:[#allocation5 + $0x110] sm:$0xf0]  ;;  %v10062_v7 = vld [vmem:[#allocation5 + $0x2e4] sm:$0xf]  ;;  %v7157_v10 = vor.u32 %v10100_v60, %v7156_v59  ;;  %v366_v23 = vunpack.c.h.b16 %v155_v2 }
  0x56   :  { %1420 = vmatpush.bf16.msrb.mxu2 %v6713_v24  ;;  %v7014_v8 = vld [vmem:[#allocation5 + $0x2f0] sm:$0xf0]  ;;  %v10126_v12 = vld [vmem:[#allocation5 + $0x4e4] sm:$0xf]  ;;  %v7285_v15 = vor.u32 %v10132_v0, %v7284_v61  ;;  %v6777_v24 = vor.u32 %v10002_v5, %v6774_v6 }
  0x57   :  { %1433 = vmatpush.bf16.msrb.mxu3 %v6841_v28  ;;  %v7142_v11 = vld [vmem:[#allocation5 + $0x3f0] sm:$0xf0]  ;;  %v10158_v17 = vld [vmem:[#allocation5 + $0x5e4] sm:$0xf]  ;;  %v7017_v25 = vor.u32 %v10062_v7, %v7014_v8  ;;  %v7273_v27 = vor.u32 %v10126_v12, %v7270_v13  ;;  %v11189_v38 = vpack.c.b16 %v366_v23, %v366_v23 }
  0x58   :  { %1395 = vmatpush.bf16.msrb.mxu0 %v7205_v34  ;;  %v7398_v21 = vld [vmem:[#allocation5 + $0x5f0] sm:$0xf0]  ;;  %v7145_v26 = vor.u32 %v10094_v9, %v7142_v11  ;;  %v10058_v28 = vld [vmem:[#allocation5 + $0x2c4] sm:$0xf] }
  0x59   :  { %1408 = vmatpush.bf16.msrb.mxu1 %v7333_v35  ;;  %v6998_v29 = vld [vmem:[#allocation5 + $0x2d0] sm:$0xf0]  ;;  %v10090_v30 = vld [vmem:[#allocation5 + $0x3c4] sm:$0xf]  ;;  %v7401_v31 = vor.u32 %v10158_v17, %v7398_v21  ;;  %v11187_v35 = vpack.c.b16 %v365_v14, %v365_v14 }
  0x5a   :  { %1421 = vmatpush.bf16.msrb.mxu2 %v6697_v36  ;;  %v7126_v32 = vld [vmem:[#allocation5 + $0x3d0] sm:$0xf0]  ;;  %v10122_v33 = vld [vmem:[#allocation5 + $0x4c4] sm:$0xf]  ;;  %v7001_v39 = vor.u32 %v10058_v28, %v6998_v29 }
  0x5b   :  { %1434 = vmatpush.bf16.msrb.mxu3 %v6825_v40  ;;  %v7254_v34 = vld [vmem:[#allocation5 + $0x4d0] sm:$0xf0]  ;;  %v10154_v36 = vld [vmem:[#allocation5 + $0x5c4] sm:$0xf]  ;;  %v7129_v40 = vor.u32 %v10090_v30, %v7126_v32 }
  0x5c   :  { %1396 = vmatpush.bf16.msrb.mxu0 %v7189_v46  ;;  %v7382_v37 = vld [vmem:[#allocation5 + $0x5d0] sm:$0xf0]  ;;  %v7257_v41 = vor.u32 %v10122_v33, %v7254_v34  ;;  %v10054_v42 = vld [vmem:[#allocation5 + $0x2a4] sm:$0xf] }
  0x5d   :  { %1409 = vmatpush.bf16.msrb.mxu1 %v7317_v47  ;;  %v6982_v43 = vld [vmem:[#allocation5 + $0x2b0] sm:$0xf0]  ;;  %v10086_v44 = vld [vmem:[#allocation5 + $0x3a4] sm:$0xf]  ;;  %v7385_v45 = vor.u32 %v10154_v36, %v7382_v37 }
  0x5e   :  { %1422 = vmatpush.bf16.msrb.mxu2 %v6681_v48  ;;  %v7110_v46 = vld [vmem:[#allocation5 + $0x3b0] sm:$0xf0]  ;;  %v10118_v47 = vld [vmem:[#allocation5 + $0x4a4] sm:$0xf]  ;;  %v6985_v51 = vor.u32 %v10054_v42, %v6982_v43 }
  0x5f   :  { %1435 = vmatpush.bf16.msrb.mxu3 %v6809_v52  ;;  %v7238_v48 = vld [vmem:[#allocation5 + $0x4b0] sm:$0xf0]  ;;  %v10150_v49 = vld [vmem:[#allocation5 + $0x5a4] sm:$0xf]  ;;  %v7113_v52 = vor.u32 %v10086_v44, %v7110_v46 }
  0x60   :  { %1397 = vmatpush.bf16.msrb.mxu0 %v7173_v58  ;;  %v7366_v50 = vld [vmem:[#allocation5 + $0x5b0] sm:$0xf0]  ;;  %v7241_v53 = vor.u32 %v10118_v47, %v7238_v48  ;;  %v10050_v54 = vld [vmem:[#allocation5 + $0x284] sm:$0xf] }
  0x61   :  { %1410 = vmatpush.bf16.msrb.mxu1 %v7301_v62  ;;  %v6966_v55 = vld [vmem:[#allocation5 + $0x290] sm:$0xf0]  ;;  %v10082_v56 = vld [vmem:[#allocation5 + $0x384] sm:$0xf]  ;;  %v7369_v57 = vor.u32 %v10150_v49, %v7366_v50 }
  0x62   :  { %1423 = vmatpush.bf16.msrb.mxu2 %v6665_v63  ;;  %v7094_v58 = vld [vmem:[#allocation5 + $0x390] sm:$0xf0]  ;;  %v10114_v59 = vld [vmem:[#allocation5 + $0x484] sm:$0xf]  ;;  %v6969_v63 = vor.u32 %v10050_v54, %v6966_v55  ;;  %v10001_v54 = vld [vmem:[#allocation5 + $0xf4] sm:$0xf0] }
  0x63   :  { %1436 = vmatpush.bf16.msrb.mxu3 %v6793_v3  ;;  %v7222_v60 = vld [vmem:[#allocation5 + $0x490] sm:$0xf0]  ;;  %v10146_v61 = vld [vmem:[#allocation5 + $0x584] sm:$0xf]  ;;  %v7097_v0 = vor.u32 %v10082_v56, %v7094_v58  ;;  %v6892_v55 = vld [vmem:[#allocation5 + $0x1e8] sm:$0xf] }
  0x64   :  { %1398 = vmatpush.bf16.msrb.mxu0 %v7157_v10  ;;  %v7350_v62 = vld [vmem:[#allocation5 + $0x590] sm:$0xf0]  ;;  %v7225_v1 = vor.u32 %v10114_v59, %v7222_v60  ;;  %v10046_v2 = vld [vmem:[#allocation5 + $0x264] sm:$0xf]  ;;  %v7020_v58 = vld [vmem:[#allocation5 + $0x2e8] sm:$0xf] }
  0x65   :  { %1411 = vmatpush.bf16.msrb.mxu1 %v7285_v15  ;;  %v6950_v3 = vld [vmem:[#allocation5 + $0x270] sm:$0xf0]  ;;  %v10078_v4 = vld [vmem:[#allocation5 + $0x364] sm:$0xf]  ;;  %v7353_v5 = vor.u32 %v10146_v61, %v7350_v62  ;;  %v10065_v59 = vld [vmem:[#allocation5 + $0x2f4] sm:$0xf0] }
  0x66   :  { %1424 = vmatpush.bf16.msrb.mxu2 %v6649_v16  ;;  %v7078_v6 = vld [vmem:[#allocation5 + $0x370] sm:$0xf0]  ;;  %v10110_v7 = vld [vmem:[#allocation5 + $0x464] sm:$0xf]  ;;  %v6953_v11 = vor.u32 %v10046_v2, %v6950_v3  ;;  %v7148_v62 = vld [vmem:[#allocation5 + $0x3e8] sm:$0xf]  ;;  %v7021_v3 = vor.u32 %v10065_v59, %v7020_v58 }
  0x67   :  { %1437 = vmatpush.bf16.msrb.mxu3 %v6777_v24  ;;  %1399 = vmatmul.bf16.vlgmr.msrb.gmra.mxu0 %v11187_v35  ;;  %v7206_v8 = vld [vmem:[#allocation5 + $0x470] sm:$0xf0]  ;;  %v10142_v9 = vld [vmem:[#allocation5 + $0x564] sm:$0xf]  ;;  %v7081_v12 = vor.u32 %v10078_v4, %v7078_v6  ;;  %v6748_v4 = vld [vmem:[#allocation5 + $0xc8] sm:$0xf] }
  0x68   :  { %1443 = vmatpush.bf16.msra.mxu0 %v7017_v25  ;;  %1412 = vmatmul.bf16.vlgmr.msrb.gmra.mxu1 %v11189_v38  ;;  %v7334_v10 = vld [vmem:[#allocation5 + $0x570] sm:$0xf0]  ;;  %v7209_v13 = vor.u32 %v10110_v7, %v7206_v8  ;;  %v10042_v14 = vld [vmem:[#allocation5 + $0x244] sm:$0xf]  ;;  %v6876_v6 = vld [vmem:[#allocation5 + $0x1c8] sm:$0xf] }
  0x69   :  { %1456 = vmatpush.bf16.msra.mxu1 %v7145_v26  ;;  %1425 = vmatmul.bf16.vlgmr.msrb.gmra.mxu2 %v11177_v19  ;;  %v6934_v15 = vld [vmem:[#allocation5 + $0x250] sm:$0xf0]  ;;  %v10074_v16 = vld [vmem:[#allocation5 + $0x344] sm:$0xf]  ;;  %v7337_v17 = vor.u32 %v10142_v9, %v7334_v10  ;;  %v10029_v8 = vld [vmem:[#allocation5 + $0x1d4] sm:$0xf0] }
  0x6a   :  { %1469 = vmatpush.bf16.msra.mxu2 %v7273_v27  ;;  %1438 = vmatmul.bf16.vlgmr.msrb.gmra.mxu3 %v11181_v22  ;;  %v7062_v21 = vld [vmem:[#allocation5 + $0x350] sm:$0xf0]  ;;  %v10106_v23 = vld [vmem:[#allocation5 + $0x444] sm:$0xf]  ;;  %v6937_v27 = vor.u32 %v10042_v14, %v6934_v15  ;;  %v7004_v9 = vld [vmem:[#allocation5 + $0x2c8] sm:$0xf]  ;;  %v6877_v14 = vor.u32 %v10029_v8, %v6876_v6 }
  0x6b   :  { %1482 = vmatpush.bf16.msra.mxu3 %v7401_v31  ;;  %v7190_v24 = vld [vmem:[#allocation5 + $0x450] sm:$0xf0]  ;;  %v10138_v25 = vld [vmem:[#allocation5 + $0x544] sm:$0xf]  ;;  %v7065_v28 = vor.u32 %v10074_v16, %v7062_v21  ;;  %v10061_v10 = vld [vmem:[#allocation5 + $0x2d4] sm:$0xf0] }
  0x6c   :  { %1444 = vmatpush.bf16.msra.mxu0 %v7001_v39  ;;  %v7318_v26 = vld [vmem:[#allocation5 + $0x550] sm:$0xf0]  ;;  %v7193_v29 = vor.u32 %v10106_v23, %v7190_v24  ;;  %v10038_v30 = vld [vmem:[#allocation5 + $0x224] sm:$0xf]  ;;  %v7005_v15 = vor.u32 %v10061_v10, %v7004_v9  ;;  %v6732_v16 = vld [vmem:[#allocation5 + $0xa8] sm:$0xf] }
  0x6d   :  { %1457 = vmatpush.bf16.msra.mxu1 %v7129_v40  ;;  %v6918_v31 = vld [vmem:[#allocation5 + $0x230] sm:$0xf0]  ;;  %v10070_v32 = vld [vmem:[#allocation5 + $0x324] sm:$0xf]  ;;  %v7321_v33 = vor.u32 %v10138_v25, %v7318_v26  ;;  %v6860_v21 = vld [vmem:[#allocation5 + $0x1a8] sm:$0xf] }
  0x6e   :  { %1470 = vmatpush.bf16.msra.mxu2 %v7257_v41  ;;  %v7046_v34 = vld [vmem:[#allocation5 + $0x330] sm:$0xf0]  ;;  %v10102_v36 = vld [vmem:[#allocation5 + $0x424] sm:$0xf]  ;;  %v6921_v41 = vor.u32 %v10038_v30, %v6918_v31  ;;  %v10025_v24 = vld [vmem:[#allocation5 + $0x1b4] sm:$0xf0] }
  0x6f   :  { %1483 = vmatpush.bf16.msra.mxu3 %v7385_v45  ;;  %v7174_v37 = vld [vmem:[#allocation5 + $0x430] sm:$0xf0]  ;;  %v10134_v39 = vld [vmem:[#allocation5 + $0x524] sm:$0xf]  ;;  %v7049_v44 = vor.u32 %v10070_v32, %v7046_v34  ;;  %v6988_v25 = vld [vmem:[#allocation5 + $0x2a8] sm:$0xf]  ;;  %v6861_v30 = vor.u32 %v10025_v24, %v6860_v21 }
  0x70   :  { %1445 = vmatpush.bf16.msra.mxu0 %v6985_v51  ;;  %v7302_v40 = vld [vmem:[#allocation5 + $0x530] sm:$0xf0]  ;;  %v10034_v42 = vld [vmem:[#allocation5 + $0x204] sm:$0xf]  ;;  %v7177_v45 = vor.u32 %v10102_v36, %v7174_v37  ;;  %v10057_v26 = vld [vmem:[#allocation5 + $0x2b4] sm:$0xf0] }
  0x71   :  { %1458 = vmatpush.bf16.msra.mxu1 %v7113_v52  ;;  %v6902_v43 = vld [vmem:[#allocation5 + $0x210] sm:$0xf0]  ;;  %v10066_v46 = vld [vmem:[#allocation5 + $0x304] sm:$0xf]  ;;  %v7305_v49 = vor.u32 %v10134_v39, %v7302_v40  ;;  %v6989_v31 = vor.u32 %v10057_v26, %v6988_v25  ;;  %v6716_v32 = vld [vmem:[#allocation5 + $0x88] sm:$0xf] }
  0x72   :  { %1471 = vmatpush.bf16.msra.mxu2 %v7241_v53  ;;  %v7030_v47 = vld [vmem:[#allocation5 + $0x310] sm:$0xf0]  ;;  %v10098_v48 = vld [vmem:[#allocation5 + $0x404] sm:$0xf]  ;;  %v6764_v53 = vld [vmem:[#allocation5 + $0xe8] sm:$0xf]  ;;  %v6905_v56 = vor.u32 %v10034_v42, %v6902_v43 }
  0x73   :  { %1484 = vmatpush.bf16.msra.mxu3 %v7369_v57  ;;  %v7158_v50 = vld [vmem:[#allocation5 + $0x410] sm:$0xf0]  ;;  %v10130_v51 = vld [vmem:[#allocation5 + $0x504] sm:$0xf]  ;;  %v10033_v57 = vld [vmem:[#allocation5 + $0x1f4] sm:$0xf0]  ;;  %v7033_v60 = vor.u32 %v10066_v46, %v7030_v47 }
  0x74   :  { %1446 = vmatpush.bf16.msra.mxu0 %v6969_v63  ;;  %v7286_v52 = vld [vmem:[#allocation5 + $0x510] sm:$0xf0]  ;;  %v7161_v61 = vor.u32 %v10098_v48, %v7158_v50  ;;  %v10097_v63 = vld [vmem:[#allocation5 + $0x3f4] sm:$0xf0]  ;;  %v6893_v2 = vor.u32 %v10033_v57, %v6892_v55  ;;  %v6844_v34 = vld [vmem:[#allocation5 + $0x188] sm:$0xf] }
  0x75   :  { %1459 = vmatpush.bf16.msra.mxu1 %v7097_v0  ;;  %v7289_v0 = vor.u32 %v10130_v51, %v7286_v52  ;;  %v7149_v7 = vor.u32 %v10097_v63, %v7148_v62  ;;  %v10021_v37 = vld [vmem:[#allocation5 + $0x194] sm:$0xf0]  ;;  %v6972_v39 = vld [vmem:[#allocation5 + $0x288] sm:$0xf] }
  0x76   :  { %1472 = vmatpush.bf16.msra.mxu2 %v7225_v1  ;;  %v6765_v1 = vor.u32 %v10001_v54, %v6764_v53  ;;  %v10053_v40 = vld [vmem:[#allocation5 + $0x294] sm:$0xf0]  ;;  %v6700_v46 = vld [vmem:[#allocation5 + $0x68] sm:$0xf] }
  0x77   :  { %1485 = vmatpush.bf16.msra.mxu3 %v7353_v5  ;;  %v9997_v5 = vld [vmem:[#allocation5 + $0xd4] sm:$0xf0]  ;;  %v6828_v48 = vld [vmem:[#allocation5 + $0x168] sm:$0xf] }
  0x78   :  { %1447 = vmatpush.bf16.msra.mxu0 %v6953_v11  ;;  %v7132_v11 = vld [vmem:[#allocation5 + $0x3c8] sm:$0xf]  ;;  %v10085_v42 = vld [vmem:[#allocation5 + $0x394] sm:$0xf0] }
  0x79   :  { %1460 = vmatpush.bf16.msra.mxu1 %v7081_v12  ;;  %v10093_v12 = vld [vmem:[#allocation5 + $0x3d4] sm:$0xf0]  ;;  %v6956_v51 = vld [vmem:[#allocation5 + $0x268] sm:$0xf] }
  0x7a   :  { %1473 = vmatpush.bf16.msra.mxu2 %v7209_v13  ;;  %v6749_v13 = vor.u32 %v9997_v5, %v6748_v4  ;;  %v7133_v23 = vor.u32 %v10093_v12, %v7132_v11  ;;  %v9985_v47 = vld [vmem:[#allocation5 + $0x74] sm:$0xf0]  ;;  %v7084_v53 = vld [vmem:[#allocation5 + $0x368] sm:$0xf] }
  0x7b   :  { %1486 = vmatpush.bf16.msra.mxu3 %v7337_v17  ;;  %v9993_v17 = vld [vmem:[#allocation5 + $0xb4] sm:$0xf0]  ;;  %v6701_v55 = vor.u32 %v9985_v47, %v6700_v46  ;;  %v6684_v58 = vld [vmem:[#allocation5 + $0x48] sm:$0xf] }
  0x7c   :  { %1448 = vmatpush.bf16.msra.mxu0 %v6937_v27  ;;  %v7116_v27 = vld [vmem:[#allocation5 + $0x3a8] sm:$0xf]  ;;  %v10017_v50 = vld [vmem:[#allocation5 + $0x174] sm:$0xf0] }
  0x7d   :  { %1461 = vmatpush.bf16.msra.mxu1 %v7065_v28  ;;  %v10089_v28 = vld [vmem:[#allocation5 + $0x3b4] sm:$0xf0]  ;;  %v6940_v63 = vld [vmem:[#allocation5 + $0x248] sm:$0xf] }
  0x7e   :  { %1474 = vmatpush.bf16.msra.mxu2 %v7193_v29  ;;  %v6733_v29 = vor.u32 %v9993_v17, %v6732_v16  ;;  %v7117_v36 = vor.u32 %v10089_v28, %v7116_v27  ;;  %v10049_v52 = vld [vmem:[#allocation5 + $0x274] sm:$0xf0]  ;;  %v6668_v6 = vld [vmem:[#allocation5 + $0x28] sm:$0xf] }
  0x7f   :  { %1487 = vmatpush.bf16.msra.mxu3 %v7321_v33  ;;  %v9989_v33 = vld [vmem:[#allocation5 + $0x94] sm:$0xf0]  ;;  %v6957_v57 = vor.u32 %v10049_v52, %v6956_v51  ;;  %v6796_v8 = vld [vmem:[#allocation5 + $0x128] sm:$0xf] }
  0x80   :  { %1449 = vmatpush.bf16.msra.mxu0 %v6921_v41  ;;  %v7100_v41 = vld [vmem:[#allocation5 + $0x388] sm:$0xf]  ;;  %v6717_v43 = vor.u32 %v9989_v33, %v6716_v32  ;;  %v10081_v54 = vld [vmem:[#allocation5 + $0x374] sm:$0xf0] }
  0x81   :  { %1462 = vmatpush.bf16.msra.mxu1 %v7049_v44  ;;  %v6845_v44 = vor.u32 %v10021_v37, %v6844_v34  ;;  %v9981_v59 = vld [vmem:[#allocation5 + $0x54] sm:$0xf0]  ;;  %v6924_v11 = vld [vmem:[#allocation5 + $0x228] sm:$0xf]  ;;  %v9999_v37 = vld [vmem:[#allocation5 + $0xec] sm:$0xf] }
  0x82   :  { %1475 = vmatpush.bf16.msra.mxu2 %v7177_v45  ;;  %v6973_v45 = vor.u32 %v10053_v40, %v6972_v39  ;;  %v10013_v62 = vld [vmem:[#allocation5 + $0x154] sm:$0xf0]  ;;  %v6652_v16 = vld [vmem:[#allocation5 + $0x8] sm:$0xf]  ;;  %v6766_v39 = vld [vmem:[#allocation5 + $0xf8] sm:$0xf0] }
  0x83   :  { %1488 = vmatpush.bf16.msra.mxu3 %v7305_v49  ;;  %v7101_v49 = vor.u32 %v10085_v42, %v7100_v41  ;;  %v10009_v10 = vld [vmem:[#allocation5 + $0x134] sm:$0xf0]  ;;  %v6780_v24 = vld [vmem:[#allocation5 + $0x108] sm:$0xf]  ;;  %v10031_v42 = vld [vmem:[#allocation5 + $0x1ec] sm:$0xf]  ;;  %v6769_v47 = vor.u32 %v9999_v37, %v6766_v39 }
  0x84   :  { %1450 = vmatpush.bf16.msra.mxu0 %v6905_v56  ;;  %v6829_v56 = vor.u32 %v10017_v50, %v6828_v48  ;;  %v10041_v12 = vld [vmem:[#allocation5 + $0x234] sm:$0xf0]  ;;  %v6797_v21 = vor.u32 %v10009_v10, %v6796_v8  ;;  %v6908_v26 = vld [vmem:[#allocation5 + $0x208] sm:$0xf] }
  0x85   :  { %1463 = vmatpush.bf16.msra.mxu1 %v7033_v60  ;;  %v6812_v60 = vld [vmem:[#allocation5 + $0x148] sm:$0xf]  ;;  %v9973_v17 = vld [vmem:[#allocation5 + $0x14] sm:$0xf0] }
  0x86   :  { %1476 = vmatpush.bf16.msra.mxu2 %v7161_v61  ;;  %v7085_v61 = vor.u32 %v10081_v54, %v7084_v53  ;;  %v6813_v4 = vor.u32 %v10013_v62, %v6812_v60  ;;  %v10005_v25 = vld [vmem:[#allocation5 + $0x114] sm:$0xf0]  ;;  %v7404_v33 = vld [vmem:[#allocation5 + $0x5e8] sm:$0xf]  ;;  %v6653_v34 = vor.u32 %v9973_v17, %v6652_v16  ;;  %v9995_v53 = vld [vmem:[#allocation5 + $0xcc] sm:$0xf] }
  0x87   :  { %1489 = vmatpush.bf16.msra.mxu3 %v7289_v0  ;;  %1451 = vmatmul.bf16.vlgmr.msra.gmra.mxu0 %v11175_v18  ;;  %v10045_v0 = vld [vmem:[#allocation5 + $0x254] sm:$0xf0]  ;;  %v6781_v40 = vor.u32 %v10005_v25, %v6780_v24  ;;  %v7260_v48 = vld [vmem:[#allocation5 + $0x4c8] sm:$0xf]  ;;  %v6750_v54 = vld [vmem:[#allocation5 + $0xd8] sm:$0xf0] }
  0x88   :  { %1495 = vmatpush.bf16.msrb.mxu0 %v6765_v1  ;;  %1464 = vmatmul.bf16.vlgmr.msra.gmra.mxu1 %v11179_v20  ;;  %v7068_v1 = vld [vmem:[#allocation5 + $0x348] sm:$0xf]  ;;  %v6941_v5 = vor.u32 %v10045_v0, %v6940_v63  ;;  %v10037_v28 = vld [vmem:[#allocation5 + $0x214] sm:$0xf0]  ;;  %v6846_v16 = vld [vmem:[#allocation5 + $0x198] sm:$0xf0] }
  0x89   :  { %1508 = vmatpush.bf16.msrb.mxu1 %v6893_v2  ;;  %1477 = vmatmul.bf16.vlgmr.msra.gmra.mxu2 %v11187_v35  ;;  %v10077_v2 = vld [vmem:[#allocation5 + $0x354] sm:$0xf0]  ;;  %v6909_v41 = vor.u32 %v10037_v28, %v6908_v26  ;;  %v7388_v50 = vld [vmem:[#allocation5 + $0x5c8] sm:$0xf] }
  0x8a   :  { %1521 = vmatpush.bf16.msrb.mxu2 %v7021_v3  ;;  %1490 = vmatmul.bf16.vlgmr.msra.gmra.mxu3 %v11189_v38  ;;  %v6685_v3 = vor.u32 %v9981_v59, %v6684_v58  ;;  %v7069_v9 = vor.u32 %v10077_v2, %v7068_v1  ;;  %v10129_v32 = vld [vmem:[#allocation5 + $0x4f4] sm:$0xf0]  ;;  %v6753_v59 = vor.u32 %v9995_v53, %v6750_v54  ;;  %v7244_v60 = vld [vmem:[#allocation5 + $0x4a8] sm:$0xf]  ;;  %v9991_v1 = vld [vmem:[#allocation5 + $0xac] sm:$0xf] }
  0x8b   :  { %1534 = vmatpush.bf16.msrb.mxu3 %v7149_v7  ;;  %v9977_v7 = vld [vmem:[#allocation5 + $0x34] sm:$0xf0]  ;;  %v7372_v62 = vld [vmem:[#allocation5 + $0x5a8] sm:$0xf]  ;;  %v6734_v2 = vld [vmem:[#allocation5 + $0xb8] sm:$0xf0] }
  0x8c   :  { %1496 = vmatpush.bf16.msrb.mxu0 %v6749_v13  ;;  %v7052_v13 = vld [vmem:[#allocation5 + $0x328] sm:$0xf]  ;;  %v10157_v52 = vld [vmem:[#allocation5 + $0x5d4] sm:$0xf0] }
  0x8d   :  { %1509 = vmatpush.bf16.msrb.mxu1 %v6877_v14  ;;  %v10073_v14 = vld [vmem:[#allocation5 + $0x334] sm:$0xf0]  ;;  %v7389_v58 = vor.u32 %v10157_v52, %v7388_v50  ;;  %v7228_v8 = vld [vmem:[#allocation5 + $0x488] sm:$0xf] }
  0x8e   :  { %1522 = vmatpush.bf16.msrb.mxu2 %v7005_v15  ;;  %v6669_v15 = vor.u32 %v9977_v7, %v6668_v6  ;;  %v7053_v27 = vor.u32 %v10073_v14, %v7052_v13  ;;  %v10153_v0 = vld [vmem:[#allocation5 + $0x5b4] sm:$0xf0]  ;;  %v6737_v7 = vor.u32 %v9991_v1, %v6734_v2  ;;  %v7356_v10 = vld [vmem:[#allocation5 + $0x588] sm:$0xf]  ;;  %v9987_v13 = vld [vmem:[#allocation5 + $0x8c] sm:$0xf] }
  0x8f   :  { %1535 = vmatpush.bf16.msrb.mxu3 %v7133_v23  ;;  %v6925_v23 = vor.u32 %v10041_v12, %v6924_v11  ;;  %v7373_v6 = vor.u32 %v10153_v0, %v7372_v62  ;;  %v10149_v12 = vld [vmem:[#allocation5 + $0x594] sm:$0xf0]  ;;  %v6718_v14 = vld [vmem:[#allocation5 + $0x98] sm:$0xf0]  ;;  %v7212_v24 = vld [vmem:[#allocation5 + $0x468] sm:$0xf] }
  0x90   :  { %1497 = vmatpush.bf16.msrb.mxu0 %v6733_v29  ;;  %v7036_v29 = vld [vmem:[#allocation5 + $0x308] sm:$0xf]  ;;  %v10113_v25 = vld [vmem:[#allocation5 + $0x474] sm:$0xf0]  ;;  %v9971_v2 = vld [vmem:[#allocation5 + $0xc] sm:$0xf] }
  0x91   :  { %1510 = vmatpush.bf16.msrb.mxu1 %v6861_v30  ;;  %v10069_v30 = vld [vmem:[#allocation5 + $0x314] sm:$0xf0]  ;;  %v7340_v26 = vld [vmem:[#allocation5 + $0x568] sm:$0xf] }
  0x92   :  { %1523 = vmatpush.bf16.msrb.mxu2 %v6989_v31  ;;  %v7276_v31 = vld [vmem:[#allocation5 + $0x4e8] sm:$0xf]  ;;  %v10145_v28 = vld [vmem:[#allocation5 + $0x574] sm:$0xf0] }
  0x93   :  { %1536 = vmatpush.bf16.msrb.mxu3 %v7117_v36  ;;  %v10161_v36 = vld [vmem:[#allocation5 + $0x5f4] sm:$0xf0]  ;;  %v7196_v37 = vld [vmem:[#allocation5 + $0x448] sm:$0xf] }
  0x94   :  { %1498 = vmatpush.bf16.msrb.mxu0 %v6717_v43  ;;  %v6894_v43 = vld [vmem:[#allocation5 + $0x1f8] sm:$0xf0]  ;;  %v7405_v46 = vor.u32 %v10161_v36, %v7404_v33  ;;  %v7213_v33 = vor.u32 %v10113_v25, %v7212_v24  ;;  %v10109_v39 = vld [vmem:[#allocation5 + $0x454] sm:$0xf0]  ;;  %v7180_v50 = vld [vmem:[#allocation5 + $0x428] sm:$0xf] }
  0x95   :  { %1511 = vmatpush.bf16.msrb.mxu1 %v6845_v44  ;;  %v7037_v44 = vor.u32 %v10069_v30, %v7036_v29  ;;  %v6897_v51 = vor.u32 %v10031_v42, %v6894_v43  ;;  %v9983_v29 = vld [vmem:[#allocation5 + $0x6c] sm:$0xf]  ;;  %v6702_v30 = vld [vmem:[#allocation5 + $0x78] sm:$0xf0]  ;;  %v10141_v42 = vld [vmem:[#allocation5 + $0x554] sm:$0xf0] }
  0x96   :  { %1524 = vmatpush.bf16.msrb.mxu2 %v6973_v45  ;;  %v7277_v45 = vor.u32 %v10129_v32, %v7276_v31  ;;  %v10015_v31 = vld [vmem:[#allocation5 + $0x16c] sm:$0xf]  ;;  %v6830_v32 = vld [vmem:[#allocation5 + $0x178] sm:$0xf0]  ;;  %v6705_v36 = vor.u32 %v9983_v29, %v6702_v30  ;;  %v7308_v52 = vld [vmem:[#allocation5 + $0x528] sm:$0xf] }
  0x97   :  { %1537 = vmatpush.bf16.msrb.mxu3 %v7101_v49  ;;  %v10125_v49 = vld [vmem:[#allocation5 + $0x4d4] sm:$0xf0]  ;;  %v9979_v43 = vld [vmem:[#allocation5 + $0x4c] sm:$0xf]  ;;  %v7292_v0 = vld [vmem:[#allocation5 + $0x508] sm:$0xf] }
  0x98   :  { %1499 = vmatpush.bf16.msrb.mxu0 %v6701_v55  ;;  %v10027_v55 = vld [vmem:[#allocation5 + $0x1cc] sm:$0xf]  ;;  %v10137_v54 = vld [vmem:[#allocation5 + $0x534] sm:$0xf0]  ;;  %v7134_v30 = vld [vmem:[#allocation5 + $0x3d8] sm:$0xf0] }
  0x99   :  { %1512 = vmatpush.bf16.msrb.mxu1 %v6829_v56  ;;  %v6878_v56 = vld [vmem:[#allocation5 + $0x1d8] sm:$0xf0]  ;;  %v7309_v62 = vor.u32 %v10137_v54, %v7308_v52  ;;  %v10133_v1 = vld [vmem:[#allocation5 + $0x514] sm:$0xf0]  ;;  %v10051_v52 = vld [vmem:[#allocation5 + $0x28c] sm:$0xf] }
  0x9a   :  { %1525 = vmatpush.bf16.msrb.mxu2 %v6957_v57  ;;  %v7261_v57 = vor.u32 %v10125_v49, %v7260_v48  ;;  %v6881_v63 = vor.u32 %v10027_v55, %v6878_v56  ;;  %v9975_v55 = vld [vmem:[#allocation5 + $0x2c] sm:$0xf]  ;;  %v6670_v56 = vld [vmem:[#allocation5 + $0x38] sm:$0xf0] }
  0x9b   :  { %1538 = vmatpush.bf16.msrb.mxu3 %v7085_v61  ;;  %v10121_v61 = vld [vmem:[#allocation5 + $0x4b4] sm:$0xf0]  ;;  %v10083_v54 = vld [vmem:[#allocation5 + $0x38c] sm:$0xf] }
  0x9c   :  { %1500 = vmatpush.bf16.msrb.mxu0 %v6685_v3  ;;  %v10023_v3 = vld [vmem:[#allocation5 + $0x1ac] sm:$0xf] }
  0x9d   :  { %1513 = vmatpush.bf16.msrb.mxu1 %v6813_v4  ;;  %v6862_v4 = vld [vmem:[#allocation5 + $0x1b8] sm:$0xf0] }
  0x9e   :  { %1526 = vmatpush.bf16.msrb.mxu2 %v6941_v5  ;;  %v7245_v5 = vor.u32 %v10121_v61, %v7244_v60  ;;  %v6865_v11 = vor.u32 %v10023_v3, %v6862_v4  ;;  %v7164_v60 = vld [vmem:[#allocation5 + $0x408] sm:$0xf]  ;;  %v10101_v61 = vld [vmem:[#allocation5 + $0x414] sm:$0xf0]  ;;  %v6654_v4 = vld [vmem:[#allocation5 + $0x18] sm:$0xf0] }
  0x9f   :  { %1539 = vmatpush.bf16.msrb.mxu3 %v7069_v9  ;;  %v10117_v9 = vld [vmem:[#allocation5 + $0x494] sm:$0xf0] }
  0xa0   :  { %1501 = vmatpush.bf16.msrb.mxu0 %v6669_v15  ;;  %v10019_v15 = vld [vmem:[#allocation5 + $0x18c] sm:$0xf]  ;;  %v7229_v17 = vor.u32 %v10117_v9, %v7228_v8  ;;  %v7022_v8 = vld [vmem:[#allocation5 + $0x2f8] sm:$0xf0] }
  0xa1   :  { %1514 = vmatpush.bf16.msrb.mxu1 %v6797_v21  ;;  %v7357_v21 = vor.u32 %v10149_v12, %v7356_v10  ;;  %v10095_v9 = vld [vmem:[#allocation5 + $0x3ec] sm:$0xf]  ;;  %v7165_v10 = vor.u32 %v10101_v61, %v7164_v60 }
  0xa2   :  { %1527 = vmatpush.bf16.msrb.mxu2 %v6925_v23  ;;  %v6721_v23 = vor.u32 %v9987_v13, %v6718_v14  ;;  %v10127_v12 = vld [vmem:[#allocation5 + $0x4ec] sm:$0xf]  ;;  %v7278_v13 = vld [vmem:[#allocation5 + $0x4f8] sm:$0xf0]  ;;  %v7293_v14 = vor.u32 %v10133_v1, %v7292_v0 }
  0xa3   :  { %1540 = vmatpush.bf16.msrb.mxu3 %v7053_v27  ;;  %v6849_v27 = vor.u32 %v10019_v15, %v6846_v16  ;;  %v6657_v15 = vor.u32 %v9971_v2, %v6654_v4  ;;  %v10159_v16 = vld [vmem:[#allocation5 + $0x5ec] sm:$0xf]  ;;  %v7281_v25 = vor.u32 %v10127_v12, %v7278_v13  ;;  %v7086_v2 = vld [vmem:[#allocation5 + $0x378] sm:$0xf0] }
  0xa4   :  { %1502 = vmatpush.bf16.msrb.mxu0 %v6653_v34  ;;  %v7341_v34 = vor.u32 %v10145_v28, %v7340_v26  ;;  %v10059_v26 = vld [vmem:[#allocation5 + $0x2cc] sm:$0xf]  ;;  %v7214_v4 = vld [vmem:[#allocation5 + $0x478] sm:$0xf0] }
  0xa5   :  { %1515 = vmatpush.bf16.msrb.mxu1 %v6781_v40  ;;  %v7324_v40 = vld [vmem:[#allocation5 + $0x548] sm:$0xf]  ;;  %v10091_v28 = vld [vmem:[#allocation5 + $0x3cc] sm:$0xf] }
  0xa6   :  { %1528 = vmatpush.bf16.msrb.mxu2 %v6909_v41  ;;  %v6833_v41 = vor.u32 %v10015_v31, %v6830_v32  ;;  %v7325_v48 = vor.u32 %v10141_v42, %v7324_v40  ;;  %v10123_v31 = vld [vmem:[#allocation5 + $0x4cc] sm:$0xf]  ;;  %v7262_v32 = vld [vmem:[#allocation5 + $0x4d8] sm:$0xf0] }
  0xa7   :  { %1541 = vmatpush.bf16.msrb.mxu3 %v7037_v44  ;;  %1503 = vmatmul.bf16.vlgmr.msrb.gmra.mxu0 %v11177_v19  ;;  %v6686_v44 = vld [vmem:[#allocation5 + $0x58] sm:$0xf0]  ;;  %v10055_v40 = vld [vmem:[#allocation5 + $0x2ac] sm:$0xf] }
  0xa8   :  { %1547 = vmatpush.bf16.msra.mxu0 %v7277_v45  ;;  %1516 = vmatmul.bf16.vlgmr.msrb.gmra.mxu1 %v11181_v22  ;;  %v10011_v45 = vld [vmem:[#allocation5 + $0x14c] sm:$0xf]  ;;  %v6689_v49 = vor.u32 %v9979_v43, %v6686_v44  ;;  %v7118_v44 = vld [vmem:[#allocation5 + $0x3b8] sm:$0xf0] }
  0xa9   :  { %1560 = vmatpush.bf16.msra.mxu1 %v7405_v46  ;;  %1529 = vmatmul.bf16.vlgmr.msrb.gmra.mxu2 %v11175_v18  ;;  %v6814_v46 = vld [vmem:[#allocation5 + $0x158] sm:$0xf0]  ;;  %v10087_v42 = vld [vmem:[#allocation5 + $0x3ac] sm:$0xf] }
  0xaa   :  { %1573 = vmatpush.bf16.msra.mxu2 %v6769_v47  ;;  %1542 = vmatmul.bf16.vlgmr.msrb.gmra.mxu3 %v11179_v20  ;;  %v7197_v47 = vor.u32 %v10109_v39, %v7196_v37  ;;  %v6817_v53 = vor.u32 %v10011_v45, %v6814_v46  ;;  %v7137_v37 = vor.u32 %v10091_v28, %v7134_v30  ;;  %v10119_v45 = vld [vmem:[#allocation5 + $0x4ac] sm:$0xf]  ;;  %v7246_v46 = vld [vmem:[#allocation5 + $0x4b8] sm:$0xf0] }
  0xab   :  { %1586 = vmatpush.bf16.msra.mxu3 %v6897_v51  ;;  %v10105_v51 = vld [vmem:[#allocation5 + $0x434] sm:$0xf0]  ;;  %v7265_v39 = vor.u32 %v10123_v31, %v7262_v32  ;;  %v10079_v0 = vld [vmem:[#allocation5 + $0x36c] sm:$0xf]  ;;  %v7054_v31 = vld [vmem:[#allocation5 + $0x338] sm:$0xf0] }
  0xac   :  { %1548 = vmatpush.bf16.msra.mxu0 %v7261_v57  ;;  %v10007_v57 = vld [vmem:[#allocation5 + $0x12c] sm:$0xf] }
  0xad   :  { %1561 = vmatpush.bf16.msra.mxu1 %v7389_v58  ;;  %v6798_v58 = vld [vmem:[#allocation5 + $0x138] sm:$0xf0]  ;;  %v10075_v12 = vld [vmem:[#allocation5 + $0x34c] sm:$0xf] }
  0xae   :  { %1574 = vmatpush.bf16.msra.mxu2 %v6753_v59  ;;  %v7181_v59 = vor.u32 %v10105_v51, %v7180_v50  ;;  %v6801_v3 = vor.u32 %v10007_v57, %v6798_v58  ;;  %v7121_v50 = vor.u32 %v10087_v42, %v7118_v44  ;;  %v7249_v51 = vor.u32 %v10119_v45, %v7246_v46  ;;  %v10115_v57 = vld [vmem:[#allocation5 + $0x48c] sm:$0xf]  ;;  %v7230_v58 = vld [vmem:[#allocation5 + $0x498] sm:$0xf0] }
  0xaf   :  { %1587 = vmatpush.bf16.msra.mxu3 %v6881_v63  ;;  %v6673_v63 = vor.u32 %v9975_v55, %v6670_v56  ;;  %v7102_v56 = vld [vmem:[#allocation5 + $0x398] sm:$0xf0]  ;;  %v10071_v30 = vld [vmem:[#allocation5 + $0x32c] sm:$0xf] }
  0xb0   :  { %1549 = vmatpush.bf16.msra.mxu0 %v7245_v5  ;;  %v10003_v5 = vld [vmem:[#allocation5 + $0x10c] sm:$0xf]  ;;  %v7105_v61 = vor.u32 %v10083_v54, %v7102_v56  ;;  %v6910_v45 = vld [vmem:[#allocation5 + $0x218] sm:$0xf0]  ;;  %v7636_v56 = vld [vmem:[#allocation8 + $0x1c0] sm:$0xf] }
  0xb1   :  { %1562 = vmatpush.bf16.msra.mxu1 %v7373_v6  ;;  %v6782_v6 = vld [vmem:[#allocation5 + $0x118] sm:$0xf0]  ;;  %v10035_v42 = vld [vmem:[#allocation5 + $0x20c] sm:$0xf] }
  0xb2   :  { %1575 = vmatpush.bf16.msra.mxu2 %v6737_v7  ;;  %v10063_v7 = vld [vmem:[#allocation5 + $0x2ec] sm:$0xf] }
  0xb3   :  { %1588 = vmatpush.bf16.msra.mxu3 %v6865_v11  ;;  %v7150_v11 = vld [vmem:[#allocation5 + $0x3f8] sm:$0xf0]  ;;  %v10067_v46 = vld [vmem:[#allocation5 + $0x30c] sm:$0xf] }
  0xb4   :  { %1550 = vmatpush.bf16.msra.mxu0 %v7229_v17  ;;  %v7406_v17 = vld [vmem:[#allocation5 + $0x5f8] sm:$0xf0]  ;;  %v7153_v24 = vor.u32 %v10095_v9, %v7150_v11 }
  0xb5   :  { %1563 = vmatpush.bf16.msra.mxu1 %v7357_v21  ;;  %v6785_v21 = vor.u32 %v10003_v5, %v6782_v6  ;;  %v7409_v29 = vor.u32 %v10159_v16, %v7406_v17  ;;  %v10143_v5 = vld [vmem:[#allocation5 + $0x56c] sm:$0xf]  ;;  %v7342_v6 = vld [vmem:[#allocation5 + $0x578] sm:$0xf0] }
  0xb6   :  { %1576 = vmatpush.bf16.msra.mxu2 %v6721_v23  ;;  %v7025_v23 = vor.u32 %v10063_v7, %v7022_v8  ;;  %v7089_v8 = vor.u32 %v10079_v0, %v7086_v2  ;;  %v6942_v11 = vld [vmem:[#allocation5 + $0x258] sm:$0xf0]  ;;  %v7345_v13 = vor.u32 %v10143_v5, %v7342_v6  ;;  %v10139_v17 = vld [vmem:[#allocation5 + $0x54c] sm:$0xf]  ;;  %v7860_v5 = vld [vmem:[#allocation8 + $0x380] sm:$0xf] }
  0xb7   :  { %1589 = vmatpush.bf16.msra.mxu3 %v6849_v27  ;;  %v7006_v27 = vld [vmem:[#allocation5 + $0x2d8] sm:$0xf0]  ;;  %v10278_v6 = vld [vmem:[#allocation8 + $0x39c] sm:$0xf0] }
  0xb8   :  { %1551 = vmatpush.bf16.msra.mxu0 %v7213_v33  ;;  %v10155_v33 = vld [vmem:[#allocation5 + $0x5cc] sm:$0xf]  ;;  %v7198_v16 = vld [vmem:[#allocation5 + $0x458] sm:$0xf0] }
  0xb9   :  { %1564 = vmatpush.bf16.msra.mxu1 %v7341_v34  ;;  %v7390_v34 = vld [vmem:[#allocation5 + $0x5d8] sm:$0xf0] }
  0xba   :  { %1577 = vmatpush.bf16.msra.mxu2 %v6705_v36  ;;  %v7009_v36 = vor.u32 %v10059_v26, %v7006_v27  ;;  %v7393_v43 = vor.u32 %v10155_v33, %v7390_v34  ;;  %v10103_v34 = vld [vmem:[#allocation5 + $0x42c] sm:$0xf] }
  0xbb   :  { %1590 = vmatpush.bf16.msra.mxu3 %v6833_v41  ;;  %v6990_v41 = vld [vmem:[#allocation5 + $0x2b8] sm:$0xf0] }
  0xbc   :  { %1552 = vmatpush.bf16.msra.mxu0 %v7197_v47  ;;  %v10151_v47 = vld [vmem:[#allocation5 + $0x5ac] sm:$0xf] }
  0xbd   :  { %1565 = vmatpush.bf16.msra.mxu1 %v7325_v48  ;;  %v7374_v48 = vld [vmem:[#allocation5 + $0x5b8] sm:$0xf0] }
  0xbe   :  { %1578 = vmatpush.bf16.msra.mxu2 %v6689_v49  ;;  %v6993_v49 = vor.u32 %v10055_v40, %v6990_v41  ;;  %v7377_v55 = vor.u32 %v10151_v47, %v7374_v48  ;;  %v7310_v40 = vld [vmem:[#allocation5 + $0x538] sm:$0xf0] }
  0xbf   :  { %1591 = vmatpush.bf16.msra.mxu3 %v6817_v53  ;;  %v6974_v53 = vld [vmem:[#allocation5 + $0x298] sm:$0xf0] }
  0xc0   :  { %1553 = vmatpush.bf16.msra.mxu0 %v7181_v59  ;;  %v10147_v59 = vld [vmem:[#allocation5 + $0x58c] sm:$0xf]  ;;  %v6977_v60 = vor.u32 %v10051_v52, %v6974_v53  ;;  %v7038_v47 = vld [vmem:[#allocation5 + $0x318] sm:$0xf0] }
  0xc1   :  { %1566 = vmatpush.bf16.msra.mxu1 %v7309_v62  ;;  %v10047_v62 = vld [vmem:[#allocation5 + $0x26c] sm:$0xf] }
  0xc2   :  { %1579 = vmatpush.bf16.msra.mxu2 %v6673_v63  ;;  %v6958_v63 = vld [vmem:[#allocation5 + $0x278] sm:$0xf0]  ;;  %v10131_v52 = vld [vmem:[#allocation5 + $0x50c] sm:$0xf] }
  0xc3   :  { %1592 = vmatpush.bf16.msra.mxu3 %v6801_v3  ;;  %v10111_v3 = vld [vmem:[#allocation5 + $0x46c] sm:$0xf]  ;;  %v6961_v7 = vor.u32 %v10047_v62, %v6958_v63 }
  0xc4   :  { %1554 = vmatpush.bf16.msra.mxu0 %v7165_v10  ;;  %v7217_v9 = vor.u32 %v10111_v3, %v7214_v4  ;;  %v10043_v10 = vld [vmem:[#allocation5 + $0x24c] sm:$0xf]  ;;  %v1348_v26 = vpop.f32.mrf.mxu0  ;;  %v7604_v3 = vld [vmem:[#allocation8 + $0x180] sm:$0xf] }
  0xc5   :  { %1567 = vmatpush.bf16.msra.mxu1 %v7293_v14  ;;  %v7070_v14 = vld [vmem:[#allocation5 + $0x358] sm:$0xf0]  ;;  %v1361_v32 = vpop.f32.mrf.mxu1  ;;  %v10214_v4 = vld [vmem:[#allocation8 + $0x19c] sm:$0xf0] }
  0xc6   :  { %1580 = vmatpush.bf16.msra.mxu2 %v6657_v15  ;;  %v10107_v15 = vld [vmem:[#allocation5 + $0x44c] sm:$0xf]  ;;  %v7073_v27 = vor.u32 %v10075_v12, %v7070_v14  ;;  %v7572_v12 = vld [vmem:[#allocation8 + $0x140] sm:$0xf] }
  0xc7   :  { %1593 = vmatpush.bf16.msra.mxu3 %v6785_v21  ;;  %1555 = vmatmul.bf16.vlgmr.msra.gmra.mxu0 %v11187_v35  ;;  %v7326_v21 = vld [vmem:[#allocation5 + $0x558] sm:$0xf0]  ;;  %v7201_v28 = vor.u32 %v10107_v15, %v7198_v16  ;;  %v7828_v14 = vld [vmem:[#allocation8 + $0x340] sm:$0xf] }
  0xc8   :  { %1599 = vmatpush.bf16.msrb.mxu0 %v7025_v23  ;;  %1568 = vmatmul.bf16.vlgmr.msra.gmra.mxu1 %v11189_v38  ;;  %v11207_v23 = vld [vmem:[#allocation7] sm:$0xf]  ;;  %v7329_v33 = vor.u32 %v10139_v17, %v7326_v21  ;;  %v10270_v15 = vld [vmem:[#allocation8 + $0x35c] sm:$0xf0] }
  0xc9   :  { %1612 = vmatpush.bf16.msrb.mxu1 %v7153_v24  ;;  %1581 = vmatmul.bf16.vlgmr.msra.gmra.mxu2 %v11177_v19  ;;  %v7358_v19 = vld [vmem:[#allocation5 + $0x598] sm:$0xf0]  ;;  %v6945_v24 = vor.u32 %v10043_v10, %v6942_v11  ;;  %v7861_v11 = vor.u32 %v10278_v6, %v7860_v5  ;;  %v7829_v21 = vor.u32 %v10270_v15, %v7828_v14  ;;  %v7894_v5 = vld [vmem:[#allocation8 + $0x3e0] sm:$0xf0] }
  0xca   :  { %1625 = vmatpush.bf16.msrb.mxu2 %v7281_v25  ;;  %1594 = vmatmul.bf16.vlgmr.msra.gmra.mxu3 %v11181_v22  ;;  %v7233_v22 = vor.u32 %v10115_v57, %v7230_v58  ;;  %v7361_v1 = vor.u32 %v10147_v59, %v7358_v19  ;;  %v10039_v25 = vld [vmem:[#allocation5 + $0x22c] sm:$0xf]  ;;  %v10222_v57 = vld [vmem:[#allocation8 + $0x1dc] sm:$0xf0]  ;;  %v6913_v58 = vor.u32 %v10035_v42, %v6910_v45  ;;  %v7606_v14 = vld [vmem:[#allocation8 + $0x1a0] sm:$0xf0] }
  0xcb   :  { %1638 = vmatpush.bf16.msrb.mxu3 %v7409_v29  ;;  %v6926_v29 = vld [vmem:[#allocation5 + $0x238] sm:$0xf0]  ;;  %v7892_v59 = vld [vmem:[#allocation8 + $0x3c0] sm:$0xf]  ;;  %v7637_v0 = vor.u32 %v10222_v57, %v7636_v56 }
  0xcc   :  { %1600 = vmatpush.bf16.msrb.mxu0 %v7009_v36  ;;  %v7182_v36 = vld [vmem:[#allocation5 + $0x438] sm:$0xf0]  ;;  %v6929_v41 = vor.u32 %v10039_v25, %v6926_v29  ;;  %v10286_v19 = vld [vmem:[#allocation8 + $0x3dc] sm:$0xf0] }
  0xcd   :  { %1613 = vmatpush.bf16.msrb.mxu1 %v7137_v37  ;;  %v350_v37 = vperm.slane %v11207_v23, 0  ;;  %v7185_v44 = vor.u32 %v10103_v34, %v7182_v36  ;;  %v1363_v62 = vpop.f32.mrf.mxu1  ;;  %v7893_v2 = vor.u32 %v10286_v19, %v7892_v59  ;;  %v10198_v25 = vld [vmem:[#allocation8 + $0x11c] sm:$0xf0] }
  0xce   :  { %1626 = vmatpush.bf16.msrb.mxu2 %v7265_v39  ;;  %v10135_v39 = vld [vmem:[#allocation5 + $0x52c] sm:$0xf]  ;;  %v7476_v36 = vld [vmem:[#allocation8 + $0x80] sm:$0xf] }
  0xcf   :  { %1639 = vmatpush.bf16.msrb.mxu3 %v7393_v43  ;;  %v7057_v43 = vor.u32 %v10071_v30, %v7054_v31  ;;  %v1349_v53 = vadd.f32 %v1348_v26, %v350_v37  ;;  %v7796_v26 = vld [vmem:[#allocation8 + $0x300] sm:$0xf] }
  0xd0   :  { %1601 = vmatpush.bf16.msrb.mxu0 %v6993_v49  ;;  %v7313_v49 = vor.u32 %v10135_v39, %v7310_v40  ;;  %v7508_v30 = vld [vmem:[#allocation8 + $0xc0] sm:$0xf] }
  0xd1   :  { %1614 = vmatpush.bf16.msrb.mxu1 %v7121_v50  ;;  %v10099_v50 = vld [vmem:[#allocation5 + $0x40c] sm:$0xf]  ;;  %v10190_v31 = vld [vmem:[#allocation8 + $0xdc] sm:$0xf0] }
  0xd2   :  { %1627 = vmatpush.bf16.msrb.mxu2 %v7249_v51  ;;  %v7166_v51 = vld [vmem:[#allocation5 + $0x418] sm:$0xf0]  ;;  %v7509_v34 = vor.u32 %v10190_v31, %v7508_v30  ;;  %v10182_v39 = vld [vmem:[#allocation8 + $0x9c] sm:$0xf0]  ;;  %v10266_v30 = vld [vmem:[#allocation8 + $0x344] sm:$0xf] }
  0xd3   :  { %1640 = vmatpush.bf16.msrb.mxu3 %v7377_v55  ;;  %v1374_v48 = vpop.f32.mrf.mxu2  ;;  %v7294_v55 = vld [vmem:[#allocation5 + $0x518] sm:$0xf0]  ;;  %v8148_v40 = vld [vmem:[#allocation8 + $0x5c0] sm:$0xf]  ;;  %v7830_v31 = vld [vmem:[#allocation8 + $0x360] sm:$0xf0] }
  0xd4   :  { %1602 = vmatpush.bf16.msrb.mxu0 %v6977_v60  ;;  %v1387_v54 = vpop.f32.mrf.mxu3  ;;  %v1350_v60 = vpop.f32.mrf.mxu0  ;;  %v7297_v63 = vor.u32 %v10131_v52, %v7294_v55  ;;  %v7732_v42 = vld [vmem:[#allocation8 + $0x280] sm:$0xf] }
  0xd5   :  { %1615 = vmatpush.bf16.msrb.mxu1 %v7105_v61  ;;  %v7041_v61 = vor.u32 %v10067_v46, %v7038_v47  ;;  %v10174_v52 = vld [vmem:[#allocation8 + $0x5c] sm:$0xf0] }
  0xd6   :  { %1628 = vmatpush.bf16.msrb.mxu2 %v7233_v22  ;;  %v7169_v22 = vor.u32 %v10099_v50, %v7166_v51  ;;  %v7700_v55 = vld [vmem:[#allocation8 + $0x240] sm:$0xf] }
  0xd7   :  { %1641 = vmatpush.bf16.msrb.mxu3 %v7361_v1  ;;  %v1362_v1 = vadd.f32 %v1361_v32, %v1349_v53  ;;  %v7764_v32 = vld [vmem:[#allocation8 + $0x2c0] sm:$0xf] }
  0xd8   :  { %1603 = vmatpush.bf16.msrb.mxu0 %v6961_v7  ;;  %v8116_v53 = vld [vmem:[#allocation8 + $0x580] sm:$0xf] }
  0xd9   :  { %1616 = vmatpush.bf16.msrb.mxu1 %v7089_v8  ;;  %v7605_v8 = vor.u32 %v10214_v4, %v7604_v3  ;;  %v10238_v56 = vld [vmem:[#allocation8 + $0x25c] sm:$0xf0]  ;;  %v10282_v4 = vld [vmem:[#allocation8 + $0x3c4] sm:$0xf] }
  0xda   :  { %1629 = vmatpush.bf16.msrb.mxu2 %v7217_v9  ;;  %v1375_v9 = vadd.f32 %v1374_v48, %v1362_v1  ;;  %v7477_v48 = vor.u32 %v10182_v39, %v7476_v36  ;;  %v7412_v59 = vld [vmem:[#allocation8] sm:$0xf]  ;;  %v7701_v60 = vor.u32 %v10238_v56, %v7700_v55  ;;  %v7638_v1 = vld [vmem:[#allocation8 + $0x1e0] sm:$0xf0] }
  0xdb   :  { %1642 = vmatpush.bf16.msrb.mxu3 %v7345_v13  ;;  %v1376_v7 = vpop.f32.mrf.mxu2  ;;  %v10206_v13 = vld [vmem:[#allocation8 + $0x15c] sm:$0xf0]  ;;  %v10194_v36 = vld [vmem:[#allocation8 + $0x104] sm:$0xf] }
  0xdc   :  { %1604 = vmatpush.bf16.msrb.mxu0 %v6945_v24  ;;  %v1389_v10 = vpop.f32.mrf.mxu3  ;;  %v7573_v16 = vor.u32 %v10206_v13, %v7572_v12  ;;  %v1388_v17 = vadd.f32 %v1387_v54, %v1375_v9  ;;  %v7540_v24 = vld [vmem:[#allocation8 + $0x100] sm:$0xf]  ;;  %v7897_v12 = vor.u32 %v10282_v4, %v7894_v5  ;;  %v10210_v13 = vld [vmem:[#allocation8 + $0x184] sm:$0xf] }
  0xdd   :  { %1617 = vmatpush.bf16.msrb.mxu1 %v7073_v27  ;;  %v10342_v54 = vld [vmem:[#allocation8 + $0x59c] sm:$0xf0]  ;;  %v7766_v55 = vld [vmem:[#allocation8 + $0x2e0] sm:$0xf0] }
  0xde   :  { %1630 = vmatpush.bf16.msrb.mxu2 %v7201_v28  ;;  %v7541_v28 = vor.u32 %v10198_v25, %v7540_v24  ;;  %v8117_v57 = vor.u32 %v10342_v54, %v8116_v53  ;;  %v10166_v19 = vld [vmem:[#allocation8 + $0x1c] sm:$0xf0]  ;;  %v7609_v25 = vor.u32 %v10210_v13, %v7606_v14  ;;  %v10250_v54 = vld [vmem:[#allocation8 + $0x2c4] sm:$0xf] }
  0xdf   :  { %1643 = vmatpush.bf16.msrb.mxu3 %v7329_v33  ;;  %v10334_v62 = vld [vmem:[#allocation8 + $0x55c] sm:$0xf0]  ;;  %v7413_v7 = vor.u32 %v10166_v19, %v7412_v59  ;;  %v7769_v19 = vor.u32 %v10250_v54, %v7766_v55  ;;  %v8118_v13 = vld [vmem:[#allocation8 + $0x5a0] sm:$0xf0]  ;;  %v10279_v54 = vld [vmem:[#allocation8 + $0x3a4] sm:$0xf0] }
  0xe0   :  { %1605 = vmatpush.bf16.msrb.mxu0 %v6929_v41  ;;  %v10350_v41 = vld [vmem:[#allocation8 + $0x5dc] sm:$0xf0]  ;;  %v7702_v14 = vld [vmem:[#allocation8 + $0x260] sm:$0xf0] }
  0xe1   :  { %1618 = vmatpush.bf16.msrb.mxu1 %v7057_v43  ;;  %v10246_v43 = vld [vmem:[#allocation8 + $0x29c] sm:$0xf0]  ;;  %v8149_v45 = vor.u32 %v10350_v41, %v8148_v40  ;;  %v10258_v41 = vld [vmem:[#allocation8 + $0x304] sm:$0xf] }
  0xe2   :  { %1631 = vmatpush.bf16.msrb.mxu2 %v7185_v44  ;;  %v7733_v51 = vor.u32 %v10246_v43, %v7732_v42  ;;  %v8052_v10 = vld [vmem:[#allocation8 + $0x500] sm:$0xf]  ;;  %v7798_v42 = vld [vmem:[#allocation8 + $0x320] sm:$0xf0] }
  0xe3   :  { %1644 = vmatpush.bf16.msrb.mxu3 %v7313_v49  ;;  %v7444_v49 = vld [vmem:[#allocation8 + $0x40] sm:$0xf] }
  0xe4   :  { %1606 = vmatpush.bf16.msrb.mxu0 %v6913_v58  ;;  %v1400_v27 = vpop.f32.mrf.mxu0  ;;  %v7445_v58 = vor.u32 %v10174_v52, %v7444_v49  ;;  %v10186_v49 = vld [vmem:[#allocation8 + $0xc4] sm:$0xf]  ;;  %v10294_v59 = vld [vmem:[#allocation8 + $0x41c] sm:$0xf0] }
  0xe5   :  { %1619 = vmatpush.bf16.msrb.mxu1 %v7041_v61  ;;  %v1401_v29 = vadd.f32 %v1400_v27, %v1388_v17  ;;  %v7668_v61 = vld [vmem:[#allocation8 + $0x200] sm:$0xf]  ;;  %v10274_v17 = vld [vmem:[#allocation8 + $0x384] sm:$0xf] }
  0xe6   :  { %1632 = vmatpush.bf16.msrb.mxu2 %v7169_v22  ;;  %v8084_v22 = vld [vmem:[#allocation8 + $0x540] sm:$0xf] }
  0xe7   :  { %1645 = vmatpush.bf16.msrb.mxu3 %v7297_v63  ;;  %1607 = vmatmul.bf16.vlgmr.msrb.gmra.mxu0 %v11175_v18  ;;  %v10262_v18 = vld [vmem:[#allocation8 + $0x31c] sm:$0xf0]  ;;  %v8085_v3 = vor.u32 %v10334_v62, %v8084_v22  ;;  %v10346_v22 = vld [vmem:[#allocation8 + $0x5c4] sm:$0xf] }
  0xe8   :  { %3213 = vmatpush.bf16.msra.mxu0 %v7637_v0  ;;  %1620 = vmatmul.bf16.vlgmr.msrb.gmra.mxu1 %v11179_v20  ;;  %v1413_v20 = vpop.f32.mrf.mxu1  ;;  %v10230_v63 = vld [vmem:[#allocation8 + $0x21c] sm:$0xf0]  ;;  %v10218_v0 = vld [vmem:[#allocation8 + $0x1c4] sm:$0xf] }
  0xe9   :  { %3226 = vmatpush.bf16.msra.mxu1 %v7893_v2  ;;  %1633 = vmatmul.bf16.vlgmr.msrb.gmra.mxu2 %v11187_v35  ;;  %v7797_v35 = vor.u32 %v10262_v18, %v7796_v26  ;;  %v11214_v33 = vadd.f32 %v1413_v20, %v1401_v29  ;;  %v7641_v9 = vor.u32 %v10218_v0, %v7638_v1  ;;  %v8020_v26 = vld [vmem:[#allocation8 + $0x4c0] sm:$0xf]  ;;  %v7574_v29 = vld [vmem:[#allocation8 + $0x160] sm:$0xf0] }
  0xea   :  { %1646 = vmatmul.bf16.vlgmr.msrb.gmra.mxu3 %v11189_v38  ;;  %v10254_v38 = vld [vmem:[#allocation8 + $0x2dc] sm:$0xf0]  ;;  %3239 = vmatpush.bf16.msra.mxu2 %v8149_v45  ;;  %v8150_v62 = vld [vmem:[#allocation8 + $0x5e0] sm:$0xf0] }
  0xeb   :  { %1651 = vst [vmem:[#allocation16] sm:$0xff] %v11214_v33  ;;  %v7765_v37 = vor.u32 %v10254_v38, %v7764_v32  ;;  %v11224_v24 = vpack.c.bf16 %v11214_v33, %v11214_v33  ;;  %v10318_v18 = vld [vmem:[#allocation8 + $0x4dc] sm:$0xf0]  ;;  %v10242_v0 = vld [vmem:[#allocation8 + $0x284] sm:$0xf] }
  0xec   :  { %3214 = vmatpush.bf16.msra.mxu0 %v7605_v8  ;;  %v11217_v44 = vpop.f32.mrf.mxu2  ;;  %v1402_v47 = vpop.f32.mrf.mxu0  ;;  %v7669_v8 = vor.u32 %v10230_v63, %v7668_v61  ;;  %v8021_v20 = vor.u32 %v10318_v18, %v8020_v26  ;;  %v7988_v38 = vld [vmem:[#allocation8 + $0x480] sm:$0xf]  ;;  %v7734_v1 = vld [vmem:[#allocation8 + $0x2a0] sm:$0xf0] }
  0xed   :  { %3227 = vmatpush.bf16.msra.mxu1 %v7861_v11  ;;  %v11219_v46 = vpop.f32.mrf.mxu3  ;;  %v10326_v11 = vld [vmem:[#allocation8 + $0x51c] sm:$0xf0]  ;;  %v7801_v47 = vor.u32 %v10258_v41, %v7798_v42  ;;  %v10162_v26 = vld [vmem:[#allocation8 + $0x4] sm:$0xf] }
  0xee   :  { %3240 = vmatpush.bf16.msra.mxu2 %v8117_v57  ;;  %v8053_v15 = vor.u32 %v10326_v11, %v8052_v10  ;;  %v10310_v33 = vld [vmem:[#allocation8 + $0x49c] sm:$0xf0]  ;;  %v10178_v57 = vld [vmem:[#allocation8 + $0x84] sm:$0xf] }
  0xef   :  { %v7989_v39 = vor.u32 %v10310_v33, %v7988_v38  ;;  %v10302_v45 = vld [vmem:[#allocation8 + $0x45c] sm:$0xf0]  ;;  %v10234_v10 = vld [vmem:[#allocation8 + $0x244] sm:$0xf]  ;;  %v10223_v38 = vld [vmem:[#allocation8 + $0x1e4] sm:$0xf0] }
  0xf0   :  { %3215 = vmatpush.bf16.msra.mxu0 %v7573_v16  ;;  %v1415_v50 = vpop.f32.mrf.mxu1  ;;  %v351_v16 = vperm.slane %v11207_v23, 1  ;;  %v8340_v55 = vld [vmem:[#allocation8 + $0x740] sm:$0xf] }
  0xf1   :  { %3228 = vmatpush.bf16.msra.mxu1 %v7829_v21  ;;  %v7862_v21 = vld [vmem:[#allocation8 + $0x3a0] sm:$0xf0] }
  0xf2   :  { %3241 = vmatpush.bf16.msra.mxu2 %v8085_v3  ;;  %v7865_v27 = vor.u32 %v10274_v17, %v7862_v21  ;;  %v7510_v50 = vld [vmem:[#allocation8 + $0xe0] sm:$0xf0]  ;;  %v8404_v17 = vld [vmem:[#allocation8 + $0x7c0] sm:$0xf] }
  0xf3   :  { %v7513_v56 = vor.u32 %v10186_v49, %v7510_v50  ;;  %v10414_v21 = vld [vmem:[#allocation8 + $0x7dc] sm:$0xf0]  ;;  %v7612_v50 = vld [vmem:[#allocation8 + $0x188] sm:$0xf] }
  0xf4   :  { %3216 = vmatpush.bf16.msra.mxu0 %v7541_v28  ;;  %v1428_v2 = vpop.f32.mrf.mxu2  ;;  %v10202_v28 = vld [vmem:[#allocation8 + $0x144] sm:$0xf]  ;;  %v8405_v18 = vor.u32 %v10414_v21, %v8404_v17 }
  0xf5   :  { %3229 = vmatpush.bf16.msra.mxu1 %v7797_v35  ;;  %v1441_v6 = vpop.f32.mrf.mxu3  ;;  %v1427_v35 = vadd.f32 %v11217_v44, %v351_v16  ;;  %v7577_v32 = vor.u32 %v10202_v28, %v7574_v29  ;;  %v7956_v44 = vld [vmem:[#allocation8 + $0x440] sm:$0xf]  ;;  %v8153_v2 = vor.u32 %v10346_v22, %v8150_v62  ;;  %v7414_v28 = vld [vmem:[#allocation8 + $0x20] sm:$0xf0]  ;;  %v7836_v22 = vld [vmem:[#allocation8 + $0x348] sm:$0xf] }
  0xf6   :  { %3242 = vmatpush.bf16.msra.mxu2 %v8053_v15  ;;  %v10170_v6 = vld [vmem:[#allocation8 + $0x44] sm:$0xf]  ;;  %3252 = vmatpush.bf16.msra.mxu3 %v8405_v18  ;;  %v10191_v18 = vld [vmem:[#allocation8 + $0xe4] sm:$0xf0] }
  0xf7   :  { %v1440_v40 = vadd.f32 %v11219_v46, %v1427_v35  ;;  %v10226_v29 = vld [vmem:[#allocation8 + $0x204] sm:$0xf]  ;;  %v7705_v35 = vor.u32 %v10234_v10, %v7702_v14 }
  0xf8   :  { %3217 = vmatpush.bf16.msra.mxu0 %v7509_v34  ;;  %v7833_v34 = vor.u32 %v10266_v30, %v7830_v31  ;;  %v7644_v30 = vld [vmem:[#allocation8 + $0x1c8] sm:$0xf]  ;;  %v10330_v31 = vld [vmem:[#allocation8 + $0x544] sm:$0xf] }
  0xf9   :  { %3230 = vmatpush.bf16.msra.mxu1 %v7765_v37  ;;  %v7542_v37 = vld [vmem:[#allocation8 + $0x120] sm:$0xf0] }
  0xfa   :  { %3243 = vmatpush.bf16.msra.mxu2 %v8021_v20  ;;  %v7545_v43 = vor.u32 %v10194_v36, %v7542_v37  ;;  %v7670_v20 = vld [vmem:[#allocation8 + $0x220] sm:$0xf0]  ;;  %v8372_v36 = vld [vmem:[#allocation8 + $0x780] sm:$0xf] }
  0xfb   :  { %v10406_v37 = vld [vmem:[#allocation8 + $0x79c] sm:$0xf0]  ;;  %v7958_v17 = vld [vmem:[#allocation8 + $0x460] sm:$0xf0] }
  0xfc   :  { %3218 = vmatpush.bf16.msra.mxu0 %v7477_v48  ;;  %v8373_v42 = vor.u32 %v10406_v37, %v8372_v36  ;;  %v7484_v37 = vld [vmem:[#allocation8 + $0x88] sm:$0xf] }
  0xfd   :  { %3231 = vmatpush.bf16.msra.mxu1 %v7733_v51  ;;  %v7957_v51 = vor.u32 %v10302_v45, %v7956_v44  ;;  %v7673_v44 = vor.u32 %v10226_v29, %v7670_v20  ;;  %v7645_v45 = vor.u32 %v10223_v38, %v7644_v30  ;;  %v10255_v20 = vld [vmem:[#allocation8 + $0x2e4] sm:$0xf0]  ;;  %v8244_v30 = vld [vmem:[#allocation8 + $0x680] sm:$0xf] }
  0xfe   :  { %3244 = vmatpush.bf16.msra.mxu2 %v7989_v39  ;;  %v7900_v39 = vld [vmem:[#allocation8 + $0x3c8] sm:$0xf]  ;;  %3253 = vmatpush.bf16.msra.mxu3 %v8373_v42 }
  0xff   :  { %v10247_v42 = vld [vmem:[#allocation8 + $0x2a4] sm:$0xf0] }
 0x100   :  { %3219 = vmatpush.bf16.msra.mxu0 %v7445_v58  ;;  %v7924_v58 = vld [vmem:[#allocation8 + $0x400] sm:$0xf] }
 0x101   :  { %3232 = vmatpush.bf16.msra.mxu1 %v7701_v60  ;;  %v7478_v60 = vld [vmem:[#allocation8 + $0xa0] sm:$0xf0]  ;;  %v7925_v61 = vor.u32 %v10294_v59, %v7924_v58 }
 0x102   :  { %3245 = vmatpush.bf16.msra.mxu2 %v7957_v51  ;;  %v7481_v5 = vor.u32 %v10178_v57, %v7478_v60  ;;  %v10215_v51 = vld [vmem:[#allocation8 + $0x1a4] sm:$0xf0]  ;;  %v10314_v58 = vld [vmem:[#allocation8 + $0x4c4] sm:$0xf] }
 0x103   :  { %v7613_v57 = vor.u32 %v10215_v51, %v7612_v50  ;;  %v8022_v59 = vld [vmem:[#allocation8 + $0x4e0] sm:$0xf0]  ;;  %v7580_v60 = vld [vmem:[#allocation8 + $0x148] sm:$0xf] }
 0x104   :  { %3220 = vmatpush.bf16.msra.mxu0 %v7413_v7  ;;  %v1452_v48 = vpop.f32.mrf.mxu0  ;;  %v7446_v7 = vld [vmem:[#allocation8 + $0x60] sm:$0xf0]  ;;  %v8025_v62 = vor.u32 %v10314_v58, %v8022_v59  ;;  %v7452_v50 = vld [vmem:[#allocation8 + $0x48] sm:$0xf] }
 0x105   :  { %3233 = vmatpush.bf16.msra.mxu1 %v7669_v8  ;;  %v1453_v52 = vadd.f32 %v1452_v48, %v1440_v40  ;;  %v1465_v53 = vpop.f32.mrf.mxu1  ;;  %v10287_v40 = vld [vmem:[#allocation8 + $0x3e4] sm:$0xf0]  ;;  %v8054_v48 = vld [vmem:[#allocation8 + $0x520] sm:$0xf0] }
 0x106   :  { %3246 = vmatpush.bf16.msra.mxu2 %v7925_v61  ;;  %v7901_v49 = vor.u32 %v10287_v40, %v7900_v39  ;;  %v10207_v61 = vld [vmem:[#allocation8 + $0x164] sm:$0xf0]  ;;  %v10410_v59 = vld [vmem:[#allocation8 + $0x7c4] sm:$0xf] }
 0x107   :  { %3221 = vmatmul.bf16.vlgmr.msra.gmra.mxu0 %v11224_v24  ;;  %v1466_v46 = vadd.f32 %v1465_v53, %v1453_v52  ;;  %v7868_v52 = vld [vmem:[#allocation8 + $0x388] sm:$0xf] }
 0x108   :  { %3265 = vmatpush.bf16.msrb.mxu0 %v7641_v9  ;;  %v7737_v9 = vor.u32 %v10242_v0, %v7734_v1  ;;  %v8308_v0 = vld [vmem:[#allocation8 + $0x700] sm:$0xf]  ;;  %v10183_v39 = vld [vmem:[#allocation8 + $0xa4] sm:$0xf0] }
 0x109   :  { %3278 = vmatpush.bf16.msrb.mxu1 %v7897_v12  ;;  %v10338_v12 = vld [vmem:[#allocation8 + $0x584] sm:$0xf]  ;;  %v10390_v1 = vld [vmem:[#allocation8 + $0x71c] sm:$0xf0]  ;;  %v7740_v40 = vld [vmem:[#allocation8 + $0x288] sm:$0xf] }
 0x10a   :  { %3291 = vmatpush.bf16.msrb.mxu2 %v8153_v2  ;;  %v8121_v16 = vor.u32 %v10338_v12, %v8118_v13  ;;  %v8309_v2 = vor.u32 %v10390_v1, %v8308_v0  ;;  %v8276_v12 = vld [vmem:[#allocation8 + $0x6c0] sm:$0xf]  ;;  %v10175_v51 = vld [vmem:[#allocation8 + $0x64] sm:$0xf0] }
 0x10b   :  { %v10382_v13 = vld [vmem:[#allocation8 + $0x6dc] sm:$0xf0]  ;;  %v10167_v0 = vld [vmem:[#allocation8 + $0x24] sm:$0xf0] }
 0x10c   :  { %3266 = vmatpush.bf16.msrb.mxu0 %v7609_v25  ;;  %v1478_v63 = vpop.f32.mrf.mxu2  ;;  %v1454_v11 = vpop.f32.mrf.mxu0  ;;  %v8277_v14 = vor.u32 %v10382_v13, %v8276_v12  ;;  %v7676_v1 = vld [vmem:[#allocation8 + $0x208] sm:$0xf] }
 0x10d   :  { %3279 = vmatpush.bf16.msrb.mxu1 %v7865_v27  ;;  %v1479_v3 = vadd.f32 %v1478_v63, %v1466_v46  ;;  %v1491_v4 = vpop.f32.mrf.mxu3  ;;  %v1467_v15 = vpop.f32.mrf.mxu1  ;;  %v7449_v27 = vor.u32 %v10170_v6, %v7446_v7  ;;  %v10398_v46 = vld [vmem:[#allocation8 + $0x75c] sm:$0xf0]  ;;  %v10271_v63 = vld [vmem:[#allocation8 + $0x364] sm:$0xf0] }
 0x10e   :  { %3292 = vmatpush.bf16.msrb.mxu2 %v8121_v16  ;;  %v7837_v6 = vor.u32 %v10271_v63, %v7836_v22  ;;  %v7548_v7 = vld [vmem:[#allocation8 + $0x108] sm:$0xf]  ;;  %v10298_v16 = vld [vmem:[#allocation8 + $0x444] sm:$0xf] }
 0x10f   :  { %v1492_v8 = vadd.f32 %v1491_v4, %v1479_v3  ;;  %v7581_v3 = vor.u32 %v10207_v61, %v7580_v60  ;;  %v10306_v4 = vld [vmem:[#allocation8 + $0x484] sm:$0xf]  ;;  %v10263_v11 = vld [vmem:[#allocation8 + $0x324] sm:$0xf0]  ;;  %v7961_v29 = vor.u32 %v10298_v16, %v7958_v17  ;;  %v352_v60 = vperm.slane %v11207_v23, 2 }
 0x110   :  { %3267 = vmatpush.bf16.msrb.mxu0 %v7577_v32  ;;  %v8086_v32 = vld [vmem:[#allocation8 + $0x560] sm:$0xf0]  ;;  %v7453_v61 = vor.u32 %v10175_v51, %v7452_v50  ;;  %v7420_v22 = vld [vmem:[#allocation8 + $0x8] sm:$0xf]  ;;  %v10211_v16 = vld [vmem:[#allocation8 + $0x18c] sm:$0xf] }
 0x111   :  { %3280 = vmatpush.bf16.msrb.mxu1 %v7833_v34  ;;  %1652 = vst [vmem:[#allocation16 + $0x8] sm:$0xff] %v1492_v8  ;;  %v11229_v25 = vpack.c.bf16 %v1492_v8, %v1492_v8  ;;  %v8089_v34 = vor.u32 %v10330_v31, %v8086_v32  ;;  %v10199_v8 = vld [vmem:[#allocation8 + $0x124] sm:$0xf0]  ;;  %v10374_v31 = vld [vmem:[#allocation8 + $0x69c] sm:$0xf0] }
 0x112   :  { %v7549_v15 = vor.u32 %v10199_v8, %v7548_v7  ;;  %v8245_v32 = vor.u32 %v10374_v31, %v8244_v30  ;;  %v10402_v7 = vld [vmem:[#allocation8 + $0x784] sm:$0xf]  ;;  %v7614_v17 = vld [vmem:[#allocation8 + $0x1a8] sm:$0xf0] }
 0x113   :  { %3234 = vmatmul.bf16.vlgmr.msra.gmra.mxu1 %v11229_v25  ;;  %3293 = vmatpush.bf16.msrb.mxu2 %v8089_v34  ;;  %v7926_v34 = vld [vmem:[#allocation8 + $0x420] sm:$0xf0]  ;;  %v10203_v31 = vld [vmem:[#allocation8 + $0x14c] sm:$0xf] }
 0x114   :  { %3268 = vmatpush.bf16.msrb.mxu0 %v7545_v43  ;;  %v1480_v33 = vpop.f32.mrf.mxu2  ;;  %v7417_v43 = vor.u32 %v10162_v26, %v7414_v28  ;;  %v7516_v26 = vld [vmem:[#allocation8 + $0xc8] sm:$0xf]  ;;  %v8374_v8 = vld [vmem:[#allocation8 + $0x7a0] sm:$0xf0] }
 0x115   :  { %3281 = vmatpush.bf16.msrb.mxu1 %v7801_v47  ;;  %v1493_v41 = vpop.f32.mrf.mxu3  ;;  %v10322_v47 = vld [vmem:[#allocation8 + $0x504] sm:$0xf]  ;;  %v7517_v38 = vor.u32 %v10191_v18, %v7516_v26  ;;  %v7870_v26 = vld [vmem:[#allocation8 + $0x3a8] sm:$0xf0] }
 0x116   :  { %v8057_v53 = vor.u32 %v10322_v47, %v8054_v48  ;;  %v10290_v33 = vld [vmem:[#allocation8 + $0x404] sm:$0xf]  ;;  %v7485_v47 = vor.u32 %v10183_v39, %v7484_v37 }
 0x117   :  { %v7929_v41 = vor.u32 %v10290_v33, %v7926_v34  ;;  %v10394_v18 = vld [vmem:[#allocation8 + $0x744] sm:$0xf]  ;;  %v7838_v33 = vld [vmem:[#allocation8 + $0x368] sm:$0xf0] }
 0x118   :  { %3269 = vmatpush.bf16.msrb.mxu0 %v7513_v56  ;;  %3294 = vmatpush.bf16.msrb.mxu2 %v8057_v53  ;;  %v8341_v56 = vor.u32 %v10398_v46, %v8340_v55  ;;  %v10239_v55 = vld [vmem:[#allocation8 + $0x264] sm:$0xf0]  ;;  %v10386_v34 = vld [vmem:[#allocation8 + $0x704] sm:$0xf] }
 0x119   :  { %3282 = vmatpush.bf16.msrb.mxu1 %v7769_v19  ;;  %v7869_v19 = vor.u32 %v10279_v54, %v7868_v52  ;;  %v7708_v52 = vld [vmem:[#allocation8 + $0x248] sm:$0xf] }
 0x11a   :  { %3254 = vmatpush.bf16.msra.mxu3 %v8341_v56  ;;  %v8180_v56 = vld [vmem:[#allocation8 + $0x600] sm:$0xf]  ;;  %v7709_v63 = vor.u32 %v10239_v55, %v7708_v52  ;;  %v10251_v55 = vld [vmem:[#allocation8 + $0x2cc] sm:$0xf] }
 0x11c   :  { %3270 = vmatpush.bf16.msrb.mxu0 %v7481_v5  ;;  %3295 = vmatpush.bf16.msrb.mxu2 %v8025_v62  ;;  %v7990_v5 = vld [vmem:[#allocation8 + $0x4a0] sm:$0xf0] }
 0x11d   :  { %3283 = vmatpush.bf16.msrb.mxu1 %v7737_v9  ;;  %v7804_v9 = vld [vmem:[#allocation8 + $0x308] sm:$0xf]  ;;  %v7993_v10 = vor.u32 %v10306_v4, %v7990_v5  ;;  %v7646_v4 = vld [vmem:[#allocation8 + $0x1e8] sm:$0xf0] }
 0x11e   :  { %3255 = vmatpush.bf16.msra.mxu3 %v8309_v2  ;;  %v7805_v21 = vor.u32 %v10263_v11, %v7804_v9  ;;  %v10231_v2 = vld [vmem:[#allocation8 + $0x224] sm:$0xf0]  ;;  %v10283_v5 = vld [vmem:[#allocation8 + $0x3cc] sm:$0xf]  ;;  %v8377_v11 = vor.u32 %v10402_v7, %v8374_v8 }
 0x11f   :  { %v7677_v12 = vor.u32 %v10231_v2, %v7676_v1  ;;  %v7486_v1 = vld [vmem:[#allocation8 + $0xa8] sm:$0xf0]  ;;  %v8124_v8 = vld [vmem:[#allocation8 + $0x588] sm:$0xf] }
 0x120   :  { %3271 = vmatpush.bf16.msrb.mxu0 %v7449_v27  ;;  %3296 = vmatpush.bf16.msrb.mxu2 %v7993_v10  ;;  %v7772_v27 = vld [vmem:[#allocation8 + $0x2c8] sm:$0xf]  ;;  %v7421_v10 = vor.u32 %v10167_v0, %v7420_v22  ;;  %v10179_v0 = vld [vmem:[#allocation8 + $0x8c] sm:$0xf] }
 0x121   :  { %3284 = vmatpush.bf16.msrb.mxu1 %v7705_v35  ;;  %v7773_v36 = vor.u32 %v10255_v20, %v7772_v27  ;;  %v8342_v27 = vld [vmem:[#allocation8 + $0x760] sm:$0xf0]  ;;  %v7617_v20 = vor.u32 %v10211_v16, %v7614_v17  ;;  %v10243_v2 = vld [vmem:[#allocation8 + $0x28c] sm:$0xf] }
 0x122   :  { %3256 = vmatpush.bf16.msra.mxu3 %v8277_v14 }
 0x124   :  { %3272 = vmatpush.bf16.msrb.mxu0 %v7417_v43  ;;  %v1504_v28 = vpop.f32.mrf.mxu0  ;;  %3297 = vmatpush.bf16.msrb.mxu2 %v7961_v29  ;;  %v8212_v43 = vld [vmem:[#allocation8 + $0x640] sm:$0xf] }
 0x125   :  { %3285 = vmatpush.bf16.msrb.mxu1 %v7673_v44  ;;  %v11234_v35 = vpop.f32.mrf.mxu1  ;;  %v10366_v44 = vld [vmem:[#allocation8 + $0x65c] sm:$0xf0]  ;;  %v1505_v9 = vadd.f32 %v1504_v28, %v352_v60  ;;  %v8345_v28 = vor.u32 %v10394_v18, %v8342_v27  ;;  %v8156_v60 = vld [vmem:[#allocation8 + $0x5c8] sm:$0xf]  ;;  %v10354_v18 = vld [vmem:[#allocation8 + $0x604] sm:$0xf] }
 0x126   :  { %3257 = vmatpush.bf16.msra.mxu3 %v8245_v32  ;;  %v7582_v32 = vld [vmem:[#allocation8 + $0x168] sm:$0xf0]  ;;  %v8182_v27 = vld [vmem:[#allocation8 + $0x620] sm:$0xf0] }
 0x127   :  { %3273 = vmatmul.bf16.vlgmr.msrb.gmra.mxu0 %v11224_v24  ;;  %v1518_v29 = vadd.f32 %v11234_v35, %v1505_v9  ;;  %v7585_v39 = vor.u32 %v10203_v31, %v7582_v32  ;;  %v10343_v9 = vld [vmem:[#allocation8 + $0x5a4] sm:$0xf0]  ;;  %v10163_v32 = vld [vmem:[#allocation8 + $0xc] sm:$0xf] }
 0x128   :  { %3317 = vmatpush.bf16.msra.mxu0 %v7645_v45  ;;  %3286 = vmatmul.bf16.vlgmr.msrb.gmra.mxu1 %v11229_v25  ;;  %v8213_v45 = vor.u32 %v10366_v44, %v8212_v43  ;;  %v10259_v43 = vld [vmem:[#allocation8 + $0x30c] sm:$0xf]  ;;  %v8125_v16 = vor.u32 %v10343_v9, %v8124_v8  ;;  %v7812_v8 = vld [vmem:[#allocation8 + $0x310] sm:$0xf] }
 0x129   :  { %3330 = vmatpush.bf16.msra.mxu1 %v7901_v49  ;;  %3298 = vmatpush.bf16.msrb.mxu2 %v7929_v41  ;;  %v7741_v49 = vor.u32 %v10247_v42, %v7740_v40  ;;  %v10195_v41 = vld [vmem:[#allocation8 + $0x10c] sm:$0xf] }
 0x12a   :  { %3258 = vmatpush.bf16.msra.mxu3 %v8213_v45  ;;  %v7550_v42 = vld [vmem:[#allocation8 + $0x128] sm:$0xf0]  ;;  %v10378_v45 = vld [vmem:[#allocation8 + $0x6c4] sm:$0xf] }
 0x12b   :  { %v7806_v44 = vld [vmem:[#allocation8 + $0x328] sm:$0xf0]  ;;  %v7553_v51 = vor.u32 %v10195_v41, %v7550_v42  ;;  %v10288_v41 = vld [vmem:[#allocation8 + $0x3ec] sm:$0xf0]  ;;  %v8060_v42 = vld [vmem:[#allocation8 + $0x508] sm:$0xf] }
 0x12c   :  { %3318 = vmatpush.bf16.msra.mxu0 %v7613_v57  ;;  %v11236_v48 = vpop.f32.mrf.mxu2  ;;  %v1506_v53 = vpop.f32.mrf.mxu0  ;;  %v10358_v57 = vld [vmem:[#allocation8 + $0x61c] sm:$0xf0]  ;;  %v7809_v52 = vor.u32 %v10259_v43, %v7806_v44  ;;  %v10327_v43 = vld [vmem:[#allocation8 + $0x524] sm:$0xf0] }
 0x12d   :  { %3331 = vmatpush.bf16.msra.mxu1 %v7869_v19  ;;  %v11238_v54 = vpop.f32.mrf.mxu3  ;;  %v1519_v46 = vpop.f32.mrf.mxu1  ;;  %v8181_v58 = vor.u32 %v10358_v57, %v8180_v56  ;;  %v8406_v19 = vld [vmem:[#allocation8 + $0x7e0] sm:$0xf0]  ;;  %v1531_v35 = vadd.f32 %v11236_v48, %v1518_v29  ;;  %v10187_v48 = vld [vmem:[#allocation8 + $0xcc] sm:$0xf]  ;;  %v8092_v29 = vld [vmem:[#allocation8 + $0x548] sm:$0xf] }
 0x12e   :  { %v8409_v62 = vor.u32 %v10410_v59, %v8406_v19  ;;  %v7518_v53 = vld [vmem:[#allocation8 + $0xe8] sm:$0xf0]  ;;  %v10370_v57 = vld [vmem:[#allocation8 + $0x684] sm:$0xf] }
 0x12f   :  { %3259 = vmatpush.bf16.msra.mxu3 %v8181_v58  ;;  %v7774_v56 = vld [vmem:[#allocation8 + $0x2e8] sm:$0xf0]  ;;  %v8246_v58 = vld [vmem:[#allocation8 + $0x6a0] sm:$0xf0] }
 0x130   :  { %3319 = vmatpush.bf16.msra.mxu0 %v7581_v3  ;;  %v10219_v3 = vld [vmem:[#allocation8 + $0x1cc] sm:$0xf]  ;;  %v8249_v22 = vor.u32 %v10370_v57, %v8246_v58  ;;  %v10319_v57 = vld [vmem:[#allocation8 + $0x4e4] sm:$0xf0]  ;;  %v10816_v58 = vld [vmem:[#allocation7] sm:$0xf] }
 0x131   :  { %3332 = vmatpush.bf16.msra.mxu1 %v7837_v6  ;;  %v7902_v6 = vld [vmem:[#allocation8 + $0x3e8] sm:$0xf0]  ;;  %v7649_v13 = vor.u32 %v10219_v3, %v7646_v4 }
 0x132   :  { %v7742_v4 = vld [vmem:[#allocation8 + $0x2a8] sm:$0xf0] }
 0x133   :  { %3304 = vmatpush.bf16.msrb.mxu3 %v8409_v62 }
 0x134   :  { %3320 = vmatpush.bf16.msra.mxu0 %v7549_v15  ;;  %v1532_v23 = vpop.f32.mrf.mxu2  ;;  %v7905_v15 = vor.u32 %v10283_v5, %v7902_v6  ;;  %v10362_v5 = vld [vmem:[#allocation8 + $0x644] sm:$0xf] }
 0x135   :  { %3333 = vmatpush.bf16.msra.mxu1 %v7805_v21  ;;  %v1545_v14 = vpop.f32.mrf.mxu3  ;;  %v10275_v21 = vld [vmem:[#allocation8 + $0x38c] sm:$0xf]  ;;  %v8214_v6 = vld [vmem:[#allocation8 + $0x660] sm:$0xf0]  ;;  %v7489_v23 = vor.u32 %v10179_v0, %v7486_v1  ;;  %v7996_v0 = vld [vmem:[#allocation8 + $0x488] sm:$0xf] }
 0x136   :  { %v7873_v30 = vor.u32 %v10275_v21, %v7870_v26  ;;  %v7454_v14 = vld [vmem:[#allocation8 + $0x68] sm:$0xf0]  ;;  %v10311_v1 = vld [vmem:[#allocation8 + $0x4a4] sm:$0xf0] }
 0x137   :  { %3305 = vmatpush.bf16.msrb.mxu3 %v8377_v11  ;;  %v7745_v11 = vor.u32 %v10243_v2, %v7742_v4  ;;  %v7710_v21 = vld [vmem:[#allocation8 + $0x268] sm:$0xf0]  ;;  %v7997_v4 = vor.u32 %v10311_v1, %v7996_v0  ;;  %v10168_v0 = vld [vmem:[#allocation8 + $0x2c] sm:$0xf0] }
 0x138   :  { %3321 = vmatpush.bf16.msra.mxu0 %v7517_v38  ;;  %v10267_v38 = vld [vmem:[#allocation8 + $0x34c] sm:$0xf]  ;;  %v7684_v1 = vld [vmem:[#allocation8 + $0x210] sm:$0xf] }
 0x139   :  { %3334 = vmatpush.bf16.msra.mxu1 %v7773_v36  ;;  %v8310_v36 = vld [vmem:[#allocation8 + $0x720] sm:$0xf0]  ;;  %v7841_v40 = vor.u32 %v10267_v38, %v7838_v33  ;;  %v7422_v33 = vld [vmem:[#allocation8 + $0x28] sm:$0xf0] }
 0x13a   :  { %v8313_v37 = vor.u32 %v10386_v34, %v8310_v36  ;;  %v10227_v34 = vld [vmem:[#allocation8 + $0x20c] sm:$0xf]  ;;  %v7425_v44 = vor.u32 %v10163_v32, %v7422_v33 }
 0x13b   :  { %3306 = vmatpush.bf16.msrb.mxu3 %v8345_v28  ;;  %v10335_v28 = vld [vmem:[#allocation8 + $0x564] sm:$0xf0]  ;;  %v7678_v36 = vld [vmem:[#allocation8 + $0x228] sm:$0xf0] }
 0x13c   :  { %3322 = vmatpush.bf16.msra.mxu0 %v7485_v47  ;;  %v8278_v47 = vld [vmem:[#allocation8 + $0x6e0] sm:$0xf0] }
 0x13d   :  { %3335 = vmatpush.bf16.msra.mxu1 %v7741_v49  ;;  %v1544_v49 = vadd.f32 %v11238_v54, %v1531_v35  ;;  %v8281_v50 = vor.u32 %v10378_v45, %v8278_v47  ;;  %v7521_v54 = vor.u32 %v10187_v48, %v7518_v53  ;;  %v8093_v35 = vor.u32 %v10335_v28, %v8092_v29  ;;  %v7620_v48 = vld [vmem:[#allocation8 + $0x190] sm:$0xf]  ;;  %v7932_v28 = vld [vmem:[#allocation8 + $0x408] sm:$0xf] }
 0x13e   :  { %v7681_v45 = vor.u32 %v10227_v34, %v7678_v36  ;;  %v10216_v53 = vld [vmem:[#allocation8 + $0x1ac] sm:$0xf0] }
 0x13f   :  { %3307 = vmatpush.bf16.msrb.mxu3 %v8313_v37  ;;  %v7652_v37 = vld [vmem:[#allocation8 + $0x1d0] sm:$0xf] }
 0x140   :  { %3323 = vmatpush.bf16.msra.mxu0 %v7453_v61  ;;  %v10351_v61 = vld [vmem:[#allocation8 + $0x5e4] sm:$0xf0]  ;;  %v10256_v29 = vld [vmem:[#allocation8 + $0x2ec] sm:$0xf0] }
 0x141   :  { %3336 = vmatpush.bf16.msra.mxu1 %v7709_v63  ;;  %v7777_v63 = vor.u32 %v10251_v55, %v7774_v56  ;;  %v8157_v3 = vor.u32 %v10351_v61, %v8156_v60  ;;  %v7876_v55 = vld [vmem:[#allocation8 + $0x390] sm:$0xf]  ;;  %v8028_v56 = vld [vmem:[#allocation8 + $0x4c8] sm:$0xf] }
 0x142   :  { %v8029_v61 = vor.u32 %v10319_v57, %v8028_v56  ;;  %v7492_v36 = vld [vmem:[#allocation8 + $0x90] sm:$0xf] }
 0x143   :  { %3308 = vmatpush.bf16.msrb.mxu3 %v8281_v50  ;;  %v10240_v56 = vld [vmem:[#allocation8 + $0x26c] sm:$0xf0] }
 0x144   :  { %3324 = vmatpush.bf16.msra.mxu0 %v7421_v10  ;;  %v1556_v46 = vpop.f32.mrf.mxu0  ;;  %v8217_v10 = vor.u32 %v10362_v5, %v8214_v6  ;;  %v7556_v5 = vld [vmem:[#allocation8 + $0x110] sm:$0xf] }
 0x145   :  { %3337 = vmatpush.bf16.msra.mxu1 %v7677_v12  ;;  %v1557_v59 = vadd.f32 %v1556_v46, %v1544_v49  ;;  %v1569_v19 = vpop.f32.mrf.mxu1  ;;  %v10280_v46 = vld [vmem:[#allocation8 + $0x3ac] sm:$0xf0] }
 0x146   :  { %v7877_v60 = vor.u32 %v10280_v46, %v7876_v55  ;;  %v10200_v6 = vld [vmem:[#allocation8 + $0x12c] sm:$0xf0]  ;;  %v10415_v55 = vld [vmem:[#allocation8 + $0x7e4] sm:$0xf0] }
 0x147   :  { %3325 = vmatmul.bf16.vlgmr.msra.gmra.mxu0 %v11224_v24  ;;  %v1570_v62 = vadd.f32 %v1569_v19, %v1557_v59  ;;  %3309 = vmatpush.bf16.msrb.mxu3 %v8249_v22  ;;  %v353_v59 = vperm.slane %v10816_v58, 3  ;;  %v7621_v19 = vor.u32 %v10216_v53, %v7620_v48  ;;  %v7588_v22 = vld [vmem:[#allocation8 + $0x150] sm:$0xf]  ;;  %v10331_v58 = vld [vmem:[#allocation8 + $0x54c] sm:$0xf] }
 0x148   :  { %3369 = vmatpush.bf16.msrb.mxu0 %v7649_v13  ;;  %3338 = vmatmul.bf16.vlgmr.msra.gmra.mxu1 %v11229_v25  ;;  %v10171_v13 = vld [vmem:[#allocation8 + $0x4c] sm:$0xf]  ;;  %v7716_v46 = vld [vmem:[#allocation8 + $0x250] sm:$0xf] }
 0x149   :  { %3382 = vmatpush.bf16.msrb.mxu1 %v7905_v15  ;;  %1653 = vst [vmem:[#allocation16 + $0x10] sm:$0xff] %v1570_v62  ;;  %v11246_v7 = vpack.c.bf16 %v1570_v62, %v1570_v62  ;;  %v10235_v15 = vld [vmem:[#allocation8 + $0x24c] sm:$0xf]  ;;  %v7457_v31 = vor.u32 %v10171_v13, %v7454_v14  ;;  %v7844_v62 = vld [vmem:[#allocation8 + $0x350] sm:$0xf]  ;;  %v7557_v13 = vor.u32 %v10200_v6, %v7556_v5 }
 0x14a   :  { %v7713_v38 = vor.u32 %v10235_v15, %v7710_v21  ;;  %v10192_v21 = vld [vmem:[#allocation8 + $0xec] sm:$0xf0]  ;;  %v10220_v5 = vld [vmem:[#allocation8 + $0x1d4] sm:$0xf] }
 0x14b   :  { %3247 = vmatmul.bf16.vlgmr.msra.gmra.mxu2 %v11246_v7  ;;  %3310 = vmatpush.bf16.msrb.mxu3 %v8217_v10  ;;  %v10264_v10 = vld [vmem:[#allocation8 + $0x32c] sm:$0xf0]  ;;  %v7654_v6 = vld [vmem:[#allocation8 + $0x1f0] sm:$0xf0] }
 0x14c   :  { %3370 = vmatpush.bf16.msrb.mxu0 %v7617_v20  ;;  %v11249_v12 = vpop.f32.mrf.mxu2  ;;  %3343 = vmatpush.bf16.msra.mxu2 %v8157_v3  ;;  %v1558_v26 = vpop.f32.mrf.mxu0  ;;  %v7813_v14 = vor.u32 %v10264_v10, %v7812_v8  ;;  %v10284_v8 = vld [vmem:[#allocation8 + $0x3d4] sm:$0xf] }
 0x14d   :  { %3383 = vmatpush.bf16.msrb.mxu1 %v7873_v30  ;;  %v11251_v17 = vpop.f32.mrf.mxu3  ;;  %v1571_v20 = vpop.f32.mrf.mxu1  ;;  %v8185_v30 = vor.u32 %v10354_v18, %v8182_v27  ;;  %v1583_v9 = vadd.f32 %v11249_v12, %v353_v59  ;;  %v7780_v26 = vld [vmem:[#allocation8 + $0x2d0] sm:$0xf]  ;;  %v10347_v12 = vld [vmem:[#allocation8 + $0x5cc] sm:$0xf] }
 0x14e   :  { %v10295_v20 = vld [vmem:[#allocation8 + $0x424] sm:$0xf0]  ;;  %v7781_v33 = vor.u32 %v10256_v29, %v7780_v26  ;;  %v8094_v59 = vld [vmem:[#allocation8 + $0x568] sm:$0xf0]  ;;  %v10212_v29 = vld [vmem:[#allocation8 + $0x194] sm:$0xf] }
 0x14f   :  { %3311 = vmatpush.bf16.msrb.mxu3 %v8185_v30  ;;  %v1596_v18 = vadd.f32 %v11251_v17, %v1583_v9  ;;  %v7933_v34 = vor.u32 %v10295_v20, %v7932_v28  ;;  %v10339_v17 = vld [vmem:[#allocation8 + $0x58c] sm:$0xf]  ;;  %v7910_v9 = vld [vmem:[#allocation8 + $0x3f0] sm:$0xf0] }
 0x150   :  { %3371 = vmatpush.bf16.msrb.mxu0 %v7585_v39  ;;  %3344 = vmatpush.bf16.msra.mxu2 %v8125_v16  ;;  %v10224_v39 = vld [vmem:[#allocation8 + $0x1ec] sm:$0xf0]  ;;  %v7913_v26 = vor.u32 %v10284_v8, %v7910_v9  ;;  %v7622_v20 = vld [vmem:[#allocation8 + $0x1b0] sm:$0xf0] }
 0x151   :  { %3384 = vmatpush.bf16.msrb.mxu1 %v7841_v40  ;;  %v7908_v40 = vld [vmem:[#allocation8 + $0x3d0] sm:$0xf]  ;;  %v7653_v47 = vor.u32 %v10224_v39, %v7652_v37 }
 0x152   :  { %v7909_v50 = vor.u32 %v10288_v41, %v7908_v40  ;;  %v7524_v16 = vld [vmem:[#allocation8 + $0xd0] sm:$0xf]  ;;  %v8126_v41 = vld [vmem:[#allocation8 + $0x5a8] sm:$0xf0] }
 0x153   :  { %v7748_v39 = vld [vmem:[#allocation8 + $0x290] sm:$0xf]  ;;  %v8129_v53 = vor.u32 %v10339_v17, %v8126_v41  ;;  %v10268_v17 = vld [vmem:[#allocation8 + $0x354] sm:$0xf] }
 0x154   :  { %3372 = vmatpush.bf16.msrb.mxu0 %v7553_v51  ;;  %v1584_v49 = vpop.f32.mrf.mxu2  ;;  %3345 = vmatpush.bf16.msra.mxu2 %v8093_v35  ;;  %v8061_v51 = vor.u32 %v10327_v43, %v8060_v42  ;;  %v10184_v35 = vld [vmem:[#allocation8 + $0xac] sm:$0xf0]  ;;  %v7846_v41 = vld [vmem:[#allocation8 + $0x370] sm:$0xf0] }
 0x155   :  { %3385 = vmatpush.bf16.msrb.mxu1 %v7809_v52  ;;  %v1597_v52 = vpop.f32.mrf.mxu3  ;;  %v10248_v40 = vld [vmem:[#allocation8 + $0x2ac] sm:$0xf0]  ;;  %v7493_v43 = vor.u32 %v10184_v35, %v7492_v36  ;;  %v8316_v36 = vld [vmem:[#allocation8 + $0x708] sm:$0xf] }
 0x156   :  { %v7460_v49 = vld [vmem:[#allocation8 + $0x50] sm:$0xf]  ;;  %v10391_v35 = vld [vmem:[#allocation8 + $0x724] sm:$0xf0] }
 0x158   :  { %3373 = vmatpush.bf16.msrb.mxu0 %v7521_v54  ;;  %3346 = vmatpush.bf16.msra.mxu2 %v8061_v51  ;;  %v10208_v54 = vld [vmem:[#allocation8 + $0x16c] sm:$0xf0] }
 0x159   :  { %3386 = vmatpush.bf16.msrb.mxu1 %v7777_v63  ;;  %v10272_v63 = vld [vmem:[#allocation8 + $0x36c] sm:$0xf0]  ;;  %v7589_v2 = vor.u32 %v10208_v54, %v7588_v22  ;;  %v10407_v22 = vld [vmem:[#allocation8 + $0x7a4] sm:$0xf0] }
 0x15a   :  { %v7845_v3 = vor.u32 %v10272_v63, %v7844_v62  ;;  %v7717_v62 = vor.u32 %v10240_v56, %v7716_v46  ;;  %v7428_v63 = vld [vmem:[#allocation8 + $0x10] sm:$0xf]  ;;  %v10299_v46 = vld [vmem:[#allocation8 + $0x44c] sm:$0xf] }
 0x15b   :  { %3299 = vmatmul.bf16.vlgmr.msrb.gmra.mxu2 %v11246_v7  ;;  %v7429_v10 = vor.u32 %v10168_v0, %v7428_v63  ;;  %v7966_v56 = vld [vmem:[#allocation8 + $0x468] sm:$0xf0]  ;;  %v7782_v63 = vld [vmem:[#allocation8 + $0x2f0] sm:$0xf0] }
 0x15c   :  { %3374 = vmatpush.bf16.msrb.mxu0 %v7489_v23  ;;  %3347 = vmatpush.bf16.msra.mxu2 %v8029_v61  ;;  %v7964_v23 = vld [vmem:[#allocation8 + $0x448] sm:$0xf] }
 0x15d   :  { %3387 = vmatpush.bf16.msrb.mxu1 %v7745_v11  ;;  %v10303_v11 = vld [vmem:[#allocation8 + $0x464] sm:$0xf0] }
 0x15e   :  { %v7965_v15 = vor.u32 %v10303_v11, %v7964_v23  ;;  %v8380_v61 = vld [vmem:[#allocation8 + $0x788] sm:$0xf]  ;;  %v10323_v23 = vld [vmem:[#allocation8 + $0x50c] sm:$0xf] }
 0x15f   :  { %v8062_v11 = vld [vmem:[#allocation8 + $0x528] sm:$0xf0] }
 0x160   :  { %3375 = vmatpush.bf16.msrb.mxu0 %v7457_v31  ;;  %3348 = vmatpush.bf16.msra.mxu2 %v7997_v4  ;;  %v8158_v31 = vld [vmem:[#allocation8 + $0x5e8] sm:$0xf0]  ;;  %v10232_v4 = vld [vmem:[#allocation8 + $0x22c] sm:$0xf0]  ;;  %v8065_v28 = vor.u32 %v10323_v23, %v8062_v11  ;;  %v10367_v23 = vld [vmem:[#allocation8 + $0x664] sm:$0xf0] }
 0x161   :  { %3388 = vmatpush.bf16.msrb.mxu1 %v7713_v38  ;;  %v7525_v38 = vor.u32 %v10192_v21, %v7524_v16  ;;  %v8161_v37 = vor.u32 %v10347_v12, %v8158_v31  ;;  %v7657_v21 = vor.u32 %v10220_v5, %v7654_v6  ;;  %v7878_v12 = vld [vmem:[#allocation8 + $0x3b0] sm:$0xf0]  ;;  %v10315_v31 = vld [vmem:[#allocation8 + $0x4cc] sm:$0xf]  ;;  %v8164_v5 = vld [vmem:[#allocation8 + $0x5d0] sm:$0xf] }
 0x162   :  { %v10352_v6 = vld [vmem:[#allocation8 + $0x5ec] sm:$0xf0] }
 0x164   :  { %3376 = vmatpush.bf16.msrb.mxu0 %v7425_v44  ;;  %v1608_v27 = vpop.f32.mrf.mxu0  ;;  %3349 = vmatpush.bf16.msra.mxu2 %v7965_v15  ;;  %v7685_v15 = vor.u32 %v10232_v4, %v7684_v1  ;;  %v10291_v1 = vld [vmem:[#allocation8 + $0x40c] sm:$0xf] }
 0x165   :  { %3389 = vmatpush.bf16.msrb.mxu1 %v7681_v45  ;;  %v1621_v30 = vpop.f32.mrf.mxu1  ;;  %v1609_v32 = vadd.f32 %v1608_v27, %v1596_v18  ;;  %v7749_v45 = vor.u32 %v10248_v40, %v7748_v39  ;;  %v8348_v18 = vld [vmem:[#allocation8 + $0x748] sm:$0xf]  ;;  %v7590_v40 = vld [vmem:[#allocation8 + $0x170] sm:$0xf0] }
 0x166   :  { %v10399_v27 = vld [vmem:[#allocation8 + $0x764] sm:$0xf0] }
 0x167   :  { %3377 = vmatmul.bf16.vlgmr.msrb.gmra.mxu0 %v11224_v24  ;;  %v1622_v42 = vadd.f32 %v1621_v30, %v1609_v32  ;;  %v10276_v30 = vld [vmem:[#allocation8 + $0x394] sm:$0xf]  ;;  %v8030_v32 = vld [vmem:[#allocation8 + $0x4e8] sm:$0xf0] }
 0x168   :  { %3421 = vmatpush.bf16.msra.mxu0 %v7653_v47  ;;  %3390 = vmatmul.bf16.vlgmr.msrb.gmra.mxu1 %v11229_v25  ;;  %v8412_v47 = vld [vmem:[#allocation8 + $0x7c8] sm:$0xf]  ;;  %v8033_v39 = vor.u32 %v10315_v31, %v8030_v32  ;;  %v8414_v31 = vld [vmem:[#allocation8 + $0x7e8] sm:$0xf0]  ;;  %v10172_v32 = vld [vmem:[#allocation8 + $0x54] sm:$0xf] }
 0x169   :  { %3434 = vmatpush.bf16.msra.mxu1 %v7909_v50  ;;  %3350 = vmatpush.bf16.msra.mxu2 %v7933_v34  ;;  %v10176_v50 = vld [vmem:[#allocation8 + $0x6c] sm:$0xf0]  ;;  %v8413_v54 = vor.u32 %v10415_v55, %v8412_v47  ;;  %v7881_v34 = vor.u32 %v10276_v30, %v7878_v12  ;;  %v7849_v47 = vor.u32 %v10268_v17, %v7846_v41  ;;  %v7814_v55 = vld [vmem:[#allocation8 + $0x330] sm:$0xf0]  ;;  %v10411_v30 = vld [vmem:[#allocation8 + $0x7cc] sm:$0xf] }
 0x16a   :  { %v11267_v17 = vld [vmem:[#allocation10] sm:$0xff]  ;;  %v8417_v41 = vor.u32 %v10411_v30, %v8414_v31  ;;  %v8286_v31 = vld [vmem:[#allocation8 + $0x6e8] sm:$0xf0] }
 0x16c   :  { %3422 = vmatpush.bf16.msra.mxu0 %v7621_v19  ;;  %v1634_v44 = vpop.f32.mrf.mxu2  ;;  %v1610_v48 = vpop.f32.mrf.mxu0  ;;  %3351 = vmatmul.bf16.vlgmr.msra.gmra.mxu2 %v11246_v7 }
 0x16d   :  { %3435 = vmatpush.bf16.msra.mxu1 %v7877_v60  ;;  %v1635_v51 = vadd.f32 %v1634_v44, %v1622_v42  ;;  %v1647_v52 = vpop.f32.mrf.mxu3  ;;  %3395 = vmatpush.bf16.msrb.mxu2 %v8161_v37  ;;  %v1623_v57 = vpop.f32.mrf.mxu1  ;;  %v7461_v60 = vor.u32 %v10176_v50, %v7460_v49  ;;  %v10204_v37 = vld [vmem:[#allocation8 + $0x154] sm:$0xf]  ;;  %v10307_v42 = vld [vmem:[#allocation8 + $0x48c] sm:$0xf]  ;;  %v8317_v44 = vor.u32 %v10391_v35, %v8316_v36  ;;  %v8284_v49 = vld [vmem:[#allocation8 + $0x6c8] sm:$0xf] }
 0x16e   :  { %v10383_v50 = vld [vmem:[#allocation8 + $0x6e4] sm:$0xf0]  ;;  %v7558_v48 = vld [vmem:[#allocation8 + $0x130] sm:$0xf0] }
 0x16f   :  { %v1648_v19 = vadd.f32 %v1647_v52, %v1635_v51  ;;  %v10196_v51 = vld [vmem:[#allocation8 + $0x114] sm:$0xf]  ;;  %v8285_v57 = vor.u32 %v10383_v50, %v8284_v49 }
 0x170   :  { %3423 = vmatpush.bf16.msra.mxu0 %v7589_v2  ;;  %v10236_v36 = vld [vmem:[#allocation8 + $0x254] sm:$0xf] }
 0x171   :  { %3436 = vmatpush.bf16.msra.mxu1 %v7845_v3  ;;  %1654 = vst [vmem:[#allocation16 + $0x18] sm:$0xff] %v1648_v19  ;;  %v11259_v2 = vpack.c.bf16 %v1648_v19, %v1648_v19  ;;  %3396 = vmatpush.bf16.msrb.mxu2 %v8129_v53  ;;  %v8097_v3 = vor.u32 %v10331_v58, %v8094_v59  ;;  %v10260_v53 = vld [vmem:[#allocation8 + $0x314] sm:$0xf]  ;;  %v8252_v19 = vld [vmem:[#allocation8 + $0x688] sm:$0xf] }
 0x172   :  { %v7561_v58 = vor.u32 %v10196_v51, %v7558_v48  ;;  %v7817_v59 = vor.u32 %v10260_v53, %v7814_v55  ;;  %v7718_v35 = vld [vmem:[#allocation8 + $0x270] sm:$0xf0]  ;;  %v7660_v48 = vld [vmem:[#allocation8 + $0x1d8] sm:$0xf] }
 0x173   :  { %3260 = vmatmul.bf16.vlgmr.msra.gmra.mxu3 %v11259_v2  ;;  %v7430_v49 = vld [vmem:[#allocation8 + $0x30] sm:$0xf0]  ;;  %v10225_v53 = vld [vmem:[#allocation8 + $0x1f4] sm:$0xf0] }
 0x174   :  { %3424 = vmatpush.bf16.msra.mxu0 %v7557_v13  ;;  %3356 = vmatpush.bf16.msra.mxu3 %v8413_v54  ;;  %v1636_v13 = vpop.f32.mrf.mxu2  ;;  %v7526_v54 = vld [vmem:[#allocation8 + $0xf0] sm:$0xf0]  ;;  %v7916_v55 = vld [vmem:[#allocation8 + $0x3d8] sm:$0xf] }
 0x175   :  { %3437 = vmatpush.bf16.msra.mxu1 %v7813_v14  ;;  %v8381_v14 = vor.u32 %v10407_v22, %v8380_v61  ;;  %v1649_v16 = vpop.f32.mrf.mxu3  ;;  %3397 = vmatpush.bf16.msrb.mxu2 %v8097_v3  ;;  %v10188_v61 = vld [vmem:[#allocation8 + $0xd4] sm:$0xf]  ;;  %v7969_v22 = vor.u32 %v10299_v46, %v7966_v56  ;;  %v7934_v3 = vld [vmem:[#allocation8 + $0x428] sm:$0xf0]  ;;  %v10289_v46 = vld [vmem:[#allocation8 + $0x3f4] sm:$0xf0] }
 0x176   :  { %v7529_v8 = vor.u32 %v10188_v61, %v7526_v54  ;;  %v7937_v11 = vor.u32 %v10291_v1, %v7934_v3  ;;  %v10180_v13 = vld [vmem:[#allocation8 + $0x94] sm:$0xf]  ;;  %v8068_v56 = vld [vmem:[#allocation8 + $0x510] sm:$0xf]  ;;  %v7661_v61 = vor.u32 %v10225_v53, %v7660_v48  ;;  %v8350_v54 = vld [vmem:[#allocation8 + $0x768] sm:$0xf0] }
 0x177   :  { %v10244_v16 = vld [vmem:[#allocation8 + $0x294] sm:$0xf]  ;;  %v7628_v1 = vld [vmem:[#allocation8 + $0x198] sm:$0xf]  ;;  %v7940_v53 = vld [vmem:[#allocation8 + $0x410] sm:$0xf] }
 0x178   :  { %3425 = vmatpush.bf16.msra.mxu0 %v7525_v38  ;;  %3357 = vmatpush.bf16.msra.mxu3 %v8381_v14  ;;  %v8349_v38 = vor.u32 %v10399_v27, %v8348_v18  ;;  %v7494_v14 = vld [vmem:[#allocation8 + $0xb0] sm:$0xf0]  ;;  %v8132_v18 = vld [vmem:[#allocation8 + $0x590] sm:$0xf]  ;;  %v10217_v3 = vld [vmem:[#allocation8 + $0x1b4] sm:$0xf0] }
 0x179   :  { %3438 = vmatpush.bf16.msra.mxu1 %v7781_v33  ;;  %v7625_v33 = vor.u32 %v10212_v29, %v7622_v20  ;;  %3398 = vmatpush.bf16.msrb.mxu2 %v8065_v28  ;;  %v10344_v27 = vld [vmem:[#allocation8 + $0x5ac] sm:$0xf0]  ;;  %v7497_v29 = vor.u32 %v10180_v13, %v7494_v14  ;;  %v8188_v28 = vld [vmem:[#allocation8 + $0x608] sm:$0xf]  ;;  %v10228_v50 = vld [vmem:[#allocation8 + $0x214] sm:$0xf] }
 0x17a   :  { %v10359_v20 = vld [vmem:[#allocation8 + $0x624] sm:$0xf0]  ;;  %v7686_v51 = vld [vmem:[#allocation8 + $0x230] sm:$0xf0]  ;;  %v8318_v13 = vld [vmem:[#allocation8 + $0x728] sm:$0xf0] }
 0x17b   :  { %v10257_v48 = vld [vmem:[#allocation8 + $0x2f4] sm:$0xf0] }
 0x17c   :  { %3426 = vmatpush.bf16.msra.mxu0 %v7493_v43  ;;  %v7998_v43 = vld [vmem:[#allocation8 + $0x4a8] sm:$0xf0]  ;;  %3358 = vmatpush.bf16.msra.mxu3 %v8349_v38  ;;  %v7462_v38 = vld [vmem:[#allocation8 + $0x70] sm:$0xf0] }
 0x17d   :  { %3439 = vmatpush.bf16.msra.mxu1 %v7749_v45  ;;  %v7593_v45 = vor.u32 %v10204_v37, %v7590_v40  ;;  %3399 = vmatpush.bf16.msrb.mxu2 %v8033_v39  ;;  %v8001_v52 = vor.u32 %v10307_v42, %v7998_v43  ;;  %v8189_v37 = vor.u32 %v10359_v20, %v8188_v28  ;;  %v8100_v39 = vld [vmem:[#allocation8 + $0x550] sm:$0xf]  ;;  %v10403_v43 = vld [vmem:[#allocation8 + $0x78c] sm:$0xf] }
 0x17e   :  { %v10336_v40 = vld [vmem:[#allocation8 + $0x56c] sm:$0xf0]  ;;  %v7465_v42 = vor.u32 %v10172_v32, %v7462_v38 }
 0x17f   :  { %v8004_v28 = vld [vmem:[#allocation8 + $0x490] sm:$0xf] }
 0x180   :  { %3427 = vmatpush.bf16.msra.mxu0 %v7461_v60  ;;  %3359 = vmatpush.bf16.msra.mxu3 %v8317_v44  ;;  %v10375_v60 = vld [vmem:[#allocation8 + $0x6a4] sm:$0xf0]  ;;  %v8382_v44 = vld [vmem:[#allocation8 + $0x7a8] sm:$0xf0] }
 0x181   :  { %3440 = vmatpush.bf16.msra.mxu1 %v7717_v62  ;;  %3400 = vmatpush.bf16.msrb.mxu2 %v8001_v52  ;;  %v10252_v62 = vld [vmem:[#allocation8 + $0x2d4] sm:$0xf]  ;;  %v8253_v4 = vor.u32 %v10375_v60, %v8252_v19  ;;  %v8101_v52 = vor.u32 %v10336_v40, %v8100_v39  ;;  %v1917_v19 = vperm.slane %v11267_v17, 0  ;;  %v7689_v60 = vor.u32 %v10228_v50, %v7686_v51  ;;  %v10304_v39 = vld [vmem:[#allocation8 + $0x46c] sm:$0xf0] }
 0x182   :  { %v7785_v9 = vor.u32 %v10252_v62, %v7782_v63  ;;  %v7917_v62 = vor.u32 %v10289_v46, %v7916_v55  ;;  %v10193_v50 = vld [vmem:[#allocation8 + $0xf4] sm:$0xf0]  ;;  %v10296_v55 = vld [vmem:[#allocation8 + $0x42c] sm:$0xf0] }
 0x183   :  { %3312 = vmatmul.bf16.vlgmr.msrb.gmra.mxu3 %v11259_v2  ;;  %v7788_v51 = vld [vmem:[#allocation8 + $0x2d8] sm:$0xf] }
 0x184   :  { %3428 = vmatpush.bf16.msra.mxu0 %v7429_v10  ;;  %v11264_v0 = vpop.f32.mrf.mxu0  ;;  %3360 = vmatpush.bf16.msra.mxu3 %v8285_v57  ;;  %v8220_v10 = vld [vmem:[#allocation8 + $0x648] sm:$0xf]  ;;  %v10328_v57 = vld [vmem:[#allocation8 + $0x52c] sm:$0xf0] }
 0x185   :  { %3441 = vmatpush.bf16.msra.mxu1 %v7685_v15  ;;  %3401 = vmatpush.bf16.msrb.mxu2 %v7969_v22  ;;  %v8165_v15 = vor.u32 %v10352_v6, %v8164_v5  ;;  %v10395_v22 = vld [vmem:[#allocation8 + $0x74c] sm:$0xf]  ;;  %v8069_v63 = vor.u32 %v10328_v57, %v8068_v56  ;;  %v10281_v5 = vld [vmem:[#allocation8 + $0x3b4] sm:$0xf0]  ;;  %v8036_v6 = vld [vmem:[#allocation8 + $0x4d0] sm:$0xf] }
 0x186   :  { %v10348_v56 = vld [vmem:[#allocation8 + $0x5d4] sm:$0xf] }
 0x187   :  { %3429 = vmatmul.bf16.vlgmr.msra.gmra.mxu0 %v11224_v24  ;;  %v8166_v57 = vld [vmem:[#allocation8 + $0x5f0] sm:$0xf0] }
 0x188   :  { %3473 = vmatpush.bf16.msrb.mxu0 %v7657_v21  ;;  %3442 = vmatmul.bf16.vlgmr.msra.gmra.mxu1 %v11229_v25  ;;  %v7750_v21 = vld [vmem:[#allocation8 + $0x2b0] sm:$0xf0] }
 0x189   :  { %3486 = vmatpush.bf16.msrb.mxu1 %v7913_v26  ;;  %3361 = vmatpush.bf16.msra.mxu3 %v8253_v4  ;;  %v8221_v26 = vor.u32 %v10367_v23, %v8220_v10  ;;  %v7753_v12 = vor.u32 %v10244_v16, %v7750_v21  ;;  %v7884_v4 = vld [vmem:[#allocation8 + $0x398] sm:$0xf]  ;;  %v3223_v10 = vadd.f32 %v11264_v0, %v1917_v19  ;;  %v10312_v0 = vld [vmem:[#allocation8 + $0x4ac] sm:$0xf0]  ;;  %v8222_v19 = vld [vmem:[#allocation8 + $0x668] sm:$0xf0] }
 0x18a   :  { %3402 = vmatpush.bf16.msrb.mxu2 %v7937_v11  ;;  %v7629_v23 = vor.u32 %v10217_v3, %v7628_v1  ;;  %v10387_v11 = vld [vmem:[#allocation8 + $0x70c] sm:$0xf]  ;;  %v7596_v21 = vld [vmem:[#allocation8 + $0x158] sm:$0xf]  ;;  %v8005_v38 = vor.u32 %v10312_v0, %v8004_v28 }
 0x18b   :  { %v8321_v20 = vor.u32 %v10387_v11, %v8318_v13  ;;  %v7756_v1 = vld [vmem:[#allocation8 + $0x298] sm:$0xf] }
 0x18c   :  { %3474 = vmatpush.bf16.msrb.mxu0 %v7625_v33  ;;  %v3224_v33 = vpop.f32.mrf.mxu0  ;;  %v10249_v3 = vld [vmem:[#allocation8 + $0x2b4] sm:$0xf0] }
 0x18d   :  { %3487 = vmatpush.bf16.msrb.mxu1 %v7881_v34  ;;  %v8133_v34 = vor.u32 %v10344_v27, %v8132_v18  ;;  %3362 = vmatpush.bf16.msra.mxu3 %v8221_v26  ;;  %v10209_v26 = vld [vmem:[#allocation8 + $0x174] sm:$0xf0]  ;;  %v7757_v13 = vor.u32 %v10249_v3, %v7756_v1 }
 0x18e   :  { %3447 = vmatpush.bf16.msra.mxu2 %v8165_v15  ;;  %v7885_v15 = vor.u32 %v10281_v5, %v7884_v4  ;;  %v7852_v18 = vld [vmem:[#allocation8 + $0x358] sm:$0xf]  ;;  %v7597_v30 = vor.u32 %v10209_v26, %v7596_v21  ;;  %v10340_v5 = vld [vmem:[#allocation8 + $0x594] sm:$0xf] }
 0x18f   :  { %3403 = vmatmul.bf16.vlgmr.msrb.gmra.mxu2 %v11246_v7  ;;  %v7564_v33 = vld [vmem:[#allocation8 + $0x118] sm:$0xf] }
 0x190   :  { %3475 = vmatpush.bf16.msrb.mxu0 %v7593_v45  ;;  %v10164_v45 = vld [vmem:[#allocation8 + $0x14] sm:$0xf]  ;;  %v3235_v14 = vpop.f32.mrf.mxu1  ;;  %v10241_v28 = vld [vmem:[#allocation8 + $0x274] sm:$0xf0] }
 0x191   :  { %3488 = vmatpush.bf16.msrb.mxu1 %v7849_v47  ;;  %v7721_v47 = vor.u32 %v10236_v36, %v7718_v35  ;;  %3363 = vmatpush.bf16.msra.mxu3 %v8189_v37  ;;  %v11274_v27 = vadd.f32 %v3235_v14, %v3223_v10  ;;  %v7820_v36 = vld [vmem:[#allocation8 + $0x318] sm:$0xf]  ;;  %v7972_v37 = vld [vmem:[#allocation8 + $0x450] sm:$0xf]  ;;  %v8190_v10 = vld [vmem:[#allocation8 + $0x628] sm:$0xf0] }
 0x192   :  { %3448 = vmatpush.bf16.msra.mxu2 %v8133_v34  ;;  %v10201_v34 = vld [vmem:[#allocation8 + $0x134] sm:$0xf0]  ;;  %v10416_v14 = vld [vmem:[#allocation8 + $0x7ec] sm:$0xf0] }
 0x193   :  { %v10265_v35 = vld [vmem:[#allocation8 + $0x334] sm:$0xf0] }
 0x194   :  { %3476 = vmatpush.bf16.msrb.mxu0 %v7561_v58  ;;  %v8385_v58 = vor.u32 %v10403_v43, %v8382_v44  ;;  %3364 = vmatmul.bf16.vlgmr.msra.gmra.mxu3 %v11259_v2  ;;  %v8254_v43 = vld [vmem:[#allocation8 + $0x6a8] sm:$0xf0] }
 0x195   :  { %3489 = vmatpush.bf16.msrb.mxu1 %v7817_v59  ;;  %3408 = vmatpush.bf16.msrb.mxu3 %v8417_v41  ;;  %v7433_v59 = vor.u32 %v10164_v45, %v7430_v49  ;;  %v7565_v41 = vor.u32 %v10201_v34, %v7564_v33  ;;  %v7821_v45 = vor.u32 %v10265_v35, %v7820_v36  ;;  %v7532_v49 = vld [vmem:[#allocation8 + $0xd8] sm:$0xf]  ;;  %v10408_v33 = vld [vmem:[#allocation8 + $0x7ac] sm:$0xf0] }
 0x196   :  { %3449 = vmatpush.bf16.msra.mxu2 %v8101_v52  ;;  %v7436_v34 = vld [vmem:[#allocation8 + $0x18] sm:$0xf] }
 0x197   :  { %v10169_v35 = vld [vmem:[#allocation8 + $0x34] sm:$0xf0] }
 0x198   :  { %3477 = vmatpush.bf16.msrb.mxu0 %v7529_v8  ;;  %v10320_v8 = vld [vmem:[#allocation8 + $0x4ec] sm:$0xf0]  ;;  %v3237_v44 = vpop.f32.mrf.mxu1 }
 0x199   :  { %3490 = vmatpush.bf16.msrb.mxu1 %v7785_v9  ;;  %3409 = vmatpush.bf16.msrb.mxu3 %v8385_v58  ;;  %v8353_v9 = vor.u32 %v10395_v22, %v8350_v54  ;;  %v8037_v16 = vor.u32 %v10320_v8, %v8036_v6  ;;  %v7533_v58 = vor.u32 %v10193_v50, %v7532_v49  ;;  %v7500_v54 = vld [vmem:[#allocation8 + $0x98] sm:$0xf]  ;;  %v8134_v6 = vld [vmem:[#allocation8 + $0x5b0] sm:$0xf0]  ;;  %v7918_v44 = vld [vmem:[#allocation8 + $0x3f8] sm:$0xf0] }
 0x19a   :  { %3450 = vmatpush.bf16.msra.mxu2 %v8069_v63  ;;  %v7941_v22 = vor.u32 %v10296_v55, %v7940_v53  ;;  %v8169_v63 = vor.u32 %v10348_v56, %v8166_v57  ;;  %v7437_v50 = vor.u32 %v10169_v35, %v7436_v34  ;;  %v10400_v53 = vld [vmem:[#allocation8 + $0x76c] sm:$0xf0]  ;;  %v10213_v57 = vld [vmem:[#allocation8 + $0x19c] sm:$0xf] }
 0x19b   :  { %v7534_v35 = vld [vmem:[#allocation8 + $0xf8] sm:$0xf0] }
 0x19c   :  { %3478 = vmatpush.bf16.msrb.mxu0 %v7497_v29  ;;  %v10273_v29 = vld [vmem:[#allocation8 + $0x374] sm:$0xf0] }
 0x19d   :  { %3491 = vmatpush.bf16.msrb.mxu1 %v7753_v12  ;;  %3410 = vmatpush.bf16.msrb.mxu3 %v8353_v9  ;;  %v10379_v12 = vld [vmem:[#allocation8 + $0x6cc] sm:$0xf]  ;;  %v7853_v32 = vor.u32 %v10273_v29, %v7852_v18  ;;  %v8137_v18 = vor.u32 %v10340_v5, %v8134_v6  ;;  %v7724_v29 = vld [vmem:[#allocation8 + $0x258] sm:$0xf]  ;;  %v7598_v5 = vld [vmem:[#allocation8 + $0x178] sm:$0xf0] }
 0x19e   :  { %3451 = vmatpush.bf16.msra.mxu2 %v8037_v16  ;;  %v8289_v40 = vor.u32 %v10379_v12, %v8286_v31  ;;  %v10355_v9 = vld [vmem:[#allocation8 + $0x60c] sm:$0xf]  ;;  %v10177_v16 = vld [vmem:[#allocation8 + $0x74] sm:$0xf0]  ;;  %v8102_v12 = vld [vmem:[#allocation8 + $0x570] sm:$0xf0]  ;;  %v7725_v36 = vor.u32 %v10241_v28, %v7724_v29 }
 0x19f   :  { %v10269_v6 = vld [vmem:[#allocation8 + $0x35c] sm:$0xf]  ;;  %v10300_v28 = vld [vmem:[#allocation8 + $0x454] sm:$0xf] }
 0x1a0   :  { %3479 = vmatpush.bf16.msrb.mxu0 %v7465_v42  ;;  %v10371_v42 = vld [vmem:[#allocation8 + $0x68c] sm:$0xf]  ;;  %v7822_v29 = vld [vmem:[#allocation8 + $0x338] sm:$0xf0] }
 0x1a1   :  { %3492 = vmatpush.bf16.msrb.mxu1 %v7721_v47  ;;  %3411 = vmatpush.bf16.msrb.mxu3 %v8321_v20  ;;  %v7973_v47 = vor.u32 %v10304_v39, %v7972_v37  ;;  %v8257_v46 = vor.u32 %v10371_v42, %v8254_v43  ;;  %v8193_v20 = vor.u32 %v10355_v9, %v8190_v10  ;;  %v7692_v37 = vld [vmem:[#allocation8 + $0x218] sm:$0xf]  ;;  %v7662_v42 = vld [vmem:[#allocation8 + $0x1f8] sm:$0xf0]  ;;  %v10308_v9 = vld [vmem:[#allocation8 + $0x494] sm:$0xf] }
 0x1a2   :  { %3452 = vmatpush.bf16.msra.mxu2 %v8005_v38  ;;  %v8388_v38 = vld [vmem:[#allocation8 + $0x790] sm:$0xf]  ;;  %v10233_v39 = vld [vmem:[#allocation8 + $0x234] sm:$0xf0]  ;;  %v10285_v43 = vld [vmem:[#allocation8 + $0x3dc] sm:$0xf] }
 0x1a3   :  { %v8389_v49 = vor.u32 %v10408_v33, %v8388_v38  ;;  %v8006_v10 = vld [vmem:[#allocation8 + $0x4b0] sm:$0xf0]  ;;  %v10376_v38 = vld [vmem:[#allocation8 + $0x6ac] sm:$0xf0] }
 0x1a4   :  { %3480 = vmatpush.bf16.msrb.mxu0 %v7433_v59  ;;  %v3274_v52 = vpop.f32.mrf.mxu0  ;;  %v10363_v59 = vld [vmem:[#allocation8 + $0x64c] sm:$0xf] }
 0x1a5   :  { %3493 = vmatpush.bf16.msrb.mxu1 %v7689_v60  ;;  %3412 = vmatpush.bf16.msrb.mxu3 %v8289_v40  ;;  %v1918_v60 = vperm.slane %v11267_v17, 1  ;;  %v8225_v4 = vor.u32 %v10363_v59, %v8222_v19  ;;  %v3287_v26 = vpop.f32.mrf.mxu1  ;;  %v10277_v59 = vld [vmem:[#allocation8 + $0x39c] sm:$0xf] }
 0x1a6   :  { %3453 = vmatpush.bf16.msra.mxu2 %v7973_v47  ;;  %v8070_v47 = vld [vmem:[#allocation8 + $0x530] sm:$0xf0]  ;;  %v7886_v19 = vld [vmem:[#allocation8 + $0x3b8] sm:$0xf0] }
 0x1a7   :  { %3481 = vmatmul.bf16.vlgmr.msrb.gmra.mxu0 %v11224_v24  ;;  %v3275_v11 = vadd.f32 %v3274_v52, %v1918_v60  ;;  %v10316_v60 = vld [vmem:[#allocation8 + $0x4d4] sm:$0xf]  ;;  %v7889_v1 = vor.u32 %v10277_v59, %v7886_v19  ;;  %v7758_v59 = vld [vmem:[#allocation8 + $0x2b8] sm:$0xf0] }
 0x1a8   :  { %3525 = vmatpush.bf16.msra.mxu0 %v7661_v61  ;;  %3494 = vmatmul.bf16.vlgmr.msrb.gmra.mxu1 %v11229_v25  ;;  %v7789_v61 = vor.u32 %v10257_v48, %v7788_v51  ;;  %v7693_v51 = vor.u32 %v10233_v39, %v7692_v37  ;;  %v8356_v48 = vld [vmem:[#allocation8 + $0x750] sm:$0xf]  ;;  %v10253_v37 = vld [vmem:[#allocation8 + $0x2dc] sm:$0xf] }
 0x1a9   :  { %3538 = vmatpush.bf16.msra.mxu1 %v7917_v62  ;;  %v10185_v62 = vld [vmem:[#allocation8 + $0xb4] sm:$0xf0]  ;;  %3413 = vmatpush.bf16.msrb.mxu3 %v8257_v46  ;;  %v11278_v0 = vadd.f32 %v3287_v26, %v3275_v11  ;;  %v7921_v46 = vor.u32 %v10285_v43, %v7918_v44  ;;  %v7566_v26 = vld [vmem:[#allocation8 + $0x138] sm:$0xf0] }
 0x1aa   :  { %v7501_v8 = vor.u32 %v10185_v62, %v7500_v54  ;;  %3454 = vmatpush.bf16.msra.mxu2 %v7941_v22  ;;  %v8357_v22 = vor.u32 %v10400_v53, %v8356_v48  ;;  %v8324_v62 = vld [vmem:[#allocation8 + $0x710] sm:$0xf] }
 0x1ac   :  { %3526 = vmatpush.bf16.msra.mxu0 %v7629_v23  ;;  %v8420_v23 = vld [vmem:[#allocation8 + $0x7d0] sm:$0xf]  ;;  %v3276_v21 = vpop.f32.mrf.mxu0 }
 0x1ad   :  { %3539 = vmatpush.bf16.msra.mxu1 %v7885_v15  ;;  %v7468_v15 = vld [vmem:[#allocation8 + $0x58] sm:$0xf]  ;;  %3414 = vmatpush.bf16.msrb.mxu3 %v8225_v4  ;;  %v8421_v31 = vor.u32 %v10416_v14, %v8420_v23  ;;  %v3289_v55 = vpop.f32.mrf.mxu1  ;;  %v10205_v4 = vld [vmem:[#allocation8 + $0x15c] sm:$0xf]  ;;  %v10384_v14 = vld [vmem:[#allocation8 + $0x6ec] sm:$0xf0] }
 0x1ae   :  { %3499 = vmatpush.bf16.msrb.mxu2 %v8169_v63  ;;  %v10392_v63 = vld [vmem:[#allocation8 + $0x72c] sm:$0xf0]  ;;  %v7601_v11 = vor.u32 %v10205_v4, %v7598_v5  ;;  %v10197_v21 = vld [vmem:[#allocation8 + $0x11c] sm:$0xf] }
 0x1af   :  { %3455 = vmatmul.bf16.vlgmr.msra.gmra.mxu2 %v11246_v7  ;;  %v8325_v23 = vor.u32 %v10392_v63, %v8324_v62  ;;  %v10360_v62 = vld [vmem:[#allocation8 + $0x62c] sm:$0xf0]  ;;  %v10412_v63 = vld [vmem:[#allocation8 + $0x7d4] sm:$0xf]  ;;  %v10173_v4 = vld [vmem:[#allocation8 + $0x5c] sm:$0xf] }
 0x1b0   :  { %3527 = vmatpush.bf16.msra.mxu0 %v7597_v30  ;;  %v10332_v30 = vld [vmem:[#allocation8 + $0x554] sm:$0xf]  ;;  %v7470_v5 = vld [vmem:[#allocation8 + $0x78] sm:$0xf0] }
 0x1b1   :  { %3540 = vmatpush.bf16.msra.mxu1 %v7853_v32  ;;  %v7469_v32 = vor.u32 %v10177_v16, %v7468_v15  ;;  %v8105_v40 = vor.u32 %v10332_v30, %v8102_v12  ;;  %3415 = vmatpush.bf16.msrb.mxu3 %v8193_v20  ;;  %v8009_v16 = vor.u32 %v10308_v9, %v8006_v10  ;;  %v7974_v20 = vld [vmem:[#allocation8 + $0x470] sm:$0xf0]  ;;  %v1919_v30 = vperm.slane %v11267_v17, 2  ;;  %v10237_v9 = vld [vmem:[#allocation8 + $0x25c] sm:$0xf] }
 0x1b2   :  { %3500 = vmatpush.bf16.msrb.mxu2 %v8137_v18  ;;  %v10261_v18 = vld [vmem:[#allocation8 + $0x31c] sm:$0xf]  ;;  %v7977_v34 = vor.u32 %v10300_v28, %v7974_v20 }
 0x1b3   :  { %v7825_v33 = vor.u32 %v10261_v18, %v7822_v29  ;;  %v7726_v10 = vld [vmem:[#allocation8 + $0x278] sm:$0xf0] }
 0x1b4   :  { %3528 = vmatpush.bf16.msra.mxu0 %v7565_v41  ;;  %v10221_v41 = vld [vmem:[#allocation8 + $0x1dc] sm:$0xf]  ;;  %3416 = vmatmul.bf16.vlgmr.msrb.gmra.mxu3 %v11259_v2  ;;  %v7729_v18 = vor.u32 %v10237_v9, %v7726_v10  ;;  %v10472_v9 = vld [vmem:[#allocation11 + $0x1ac] sm:$0xf0]  ;;  %v1920_v10 = vperm.slane %v11267_v17, 3 }
 0x1b5   :  { %3541 = vmatpush.bf16.msra.mxu1 %v7821_v45  ;;  %v10324_v45 = vld [vmem:[#allocation8 + $0x514] sm:$0xf]  ;;  %3460 = vmatpush.bf16.msra.mxu3 %v8421_v31  ;;  %v7665_v52 = vor.u32 %v10221_v41, %v7662_v42  ;;  %v7569_v31 = vor.u32 %v10197_v21, %v7566_v26  ;;  %v10165_v29 = vld [vmem:[#allocation8 + $0x1c] sm:$0xf] }
 0x1b6   :  { %3501 = vmatpush.bf16.msrb.mxu2 %v8105_v40  ;;  %v8073_v56 = vor.u32 %v10324_v45, %v8070_v47  ;;  %v7790_v40 = vld [vmem:[#allocation8 + $0x2f8] sm:$0xf0]  ;;  %v10292_v41 = vld [vmem:[#allocation8 + $0x414] sm:$0xf]  ;;  %v8172_v47 = vld [vmem:[#allocation8 + $0x5d8] sm:$0xf] }
 0x1b7   :  { %v7942_v42 = vld [vmem:[#allocation8 + $0x430] sm:$0xf0]  ;;  %v7793_v53 = vor.u32 %v10253_v37, %v7790_v40  ;;  %v7438_v28 = vld [vmem:[#allocation8 + $0x38] sm:$0xf0] }
 0x1b8   :  { %3529 = vmatpush.bf16.msra.mxu0 %v7533_v58  ;;  %v7630_v58 = vld [vmem:[#allocation8 + $0x1b8] sm:$0xf0]  ;;  %v7945_v55 = vor.u32 %v10292_v41, %v7942_v42  ;;  %v10404_v21 = vld [vmem:[#allocation8 + $0x794] sm:$0xf]  ;;  %v8532_v42 = vld [vmem:[#allocation11 + $0xc0] sm:$0xf] }
 0x1b9   :  { %3542 = vmatpush.bf16.msra.mxu1 %v7789_v61  ;;  %v8038_v61 = vld [vmem:[#allocation8 + $0x4f0] sm:$0xf0]  ;;  %3461 = vmatpush.bf16.msra.mxu3 %v8389_v49  ;;  %v7633_v54 = vor.u32 %v10213_v57, %v7630_v58  ;;  %v10353_v49 = vld [vmem:[#allocation8 + $0x5f4] sm:$0xf0]  ;;  %v10245_v58 = vld [vmem:[#allocation8 + $0x29c] sm:$0xf] }
 0x1ba   :  { %3502 = vmatpush.bf16.msrb.mxu2 %v8073_v56  ;;  %v8041_v3 = vor.u32 %v10316_v60, %v8038_v61  ;;  %v7502_v56 = vld [vmem:[#allocation8 + $0xb8] sm:$0xf0]  ;;  %v8173_v57 = vor.u32 %v10353_v49, %v8172_v47  ;;  %v8140_v60 = vld [vmem:[#allocation8 + $0x598] sm:$0xf]  ;;  %v8390_v26 = vld [vmem:[#allocation8 + $0x7b0] sm:$0xf0] }
 0x1bb   :  { %v10345_v61 = vld [vmem:[#allocation8 + $0x5b4] sm:$0xf0]  ;;  %v10229_v20 = vld [vmem:[#allocation8 + $0x21c] sm:$0xf]  ;;  %v10396_v37 = vld [vmem:[#allocation8 + $0x754] sm:$0xf] }
 0x1bc   :  { %3530 = vmatpush.bf16.msra.mxu0 %v7501_v8  ;;  %v7854_v8 = vld [vmem:[#allocation8 + $0x378] sm:$0xf0]  ;;  %v10321_v47 = vld [vmem:[#allocation8 + $0x4f4] sm:$0xf0] }
 0x1bd   :  { %3543 = vmatpush.bf16.msra.mxu1 %v7757_v13  ;;  %3462 = vmatpush.bf16.msra.mxu3 %v8357_v22  ;;  %v8292_v13 = vld [vmem:[#allocation8 + $0x6d0] sm:$0xf]  ;;  %v7857_v15 = vor.u32 %v10269_v6, %v7854_v8  ;;  %v8141_v8 = vor.u32 %v10345_v61, %v8140_v60  ;;  %v10480_v49 = vld [vmem:[#allocation11 + $0x1ec] sm:$0xf0] }
 0x1be   :  { %3503 = vmatpush.bf16.msrb.mxu2 %v8041_v3  ;;  %v8293_v12 = vor.u32 %v10384_v14, %v8292_v13  ;;  %v8422_v3 = vld [vmem:[#allocation8 + $0x7f0] sm:$0xf0]  ;;  %v8108_v13 = vld [vmem:[#allocation8 + $0x558] sm:$0xf] }
 0x1bf   :  { %v10337_v14 = vld [vmem:[#allocation8 + $0x574] sm:$0xf0] }
 0x1c0   :  { %3531 = vmatpush.bf16.msra.mxu0 %v7469_v32  ;;  %v8260_v32 = vld [vmem:[#allocation8 + $0x690] sm:$0xf]  ;;  %v10313_v60 = vld [vmem:[#allocation8 + $0x4b4] sm:$0xf0] }
 0x1c1   :  { %3544 = vmatpush.bf16.msra.mxu1 %v7725_v36  ;;  %3463 = vmatpush.bf16.msra.mxu3 %v8325_v23  ;;  %v10189_v36 = vld [vmem:[#allocation8 + $0xdc] sm:$0xf]  ;;  %v8261_v45 = vor.u32 %v10376_v38, %v8260_v32  ;;  %v10448_v32 = vld [vmem:[#allocation11 + $0xec] sm:$0xf0] }
 0x1c2   :  { %3504 = vmatpush.bf16.msrb.mxu2 %v8009_v16  ;;  %v7473_v16 = vor.u32 %v10173_v4, %v7470_v5  ;;  %v8076_v38 = vld [vmem:[#allocation8 + $0x518] sm:$0xf]  ;;  %v8500_v4 = vld [vmem:[#allocation11 + $0x80] sm:$0xf] }
 0x1c3   :  { %v10476_v61 = vld [vmem:[#allocation11 + $0x1cc] sm:$0xf0] }
 0x1c4   :  { %3532 = vmatpush.bf16.msra.mxu0 %v7437_v50  ;;  %v3326_v39 = vpop.f32.mrf.mxu0  ;;  %v7537_v50 = vor.u32 %v10189_v36, %v7534_v35  ;;  %v7441_v36 = vor.u32 %v10165_v29, %v7438_v28  ;;  %v10436_v5 = vld [vmem:[#allocation11 + $0x8c] sm:$0xf0] }
 0x1c5   :  { %3545 = vmatpush.bf16.msra.mxu1 %v7693_v51  ;;  %v3327_v43 = vadd.f32 %v3326_v39, %v1919_v30  ;;  %v3339_v44 = vpop.f32.mrf.mxu1  ;;  %3464 = vmatpush.bf16.msra.mxu3 %v8293_v12  ;;  %v8228_v51 = vld [vmem:[#allocation8 + $0x650] sm:$0xf]  ;;  %v8109_v30 = vor.u32 %v10337_v14, %v8108_v13  ;;  %v7694_v12 = vld [vmem:[#allocation8 + $0x238] sm:$0xf0]  ;;  %v8358_v39 = vld [vmem:[#allocation8 + $0x770] sm:$0xf0]  ;;  %v8501_v14 = vor.u32 %v10436_v5, %v8500_v4 }
 0x1c6   :  { %3505 = vmatpush.bf16.msrb.mxu2 %v7977_v34  ;;  %v8393_v34 = vor.u32 %v10404_v21, %v8390_v26  ;;  %v7697_v35 = vor.u32 %v10229_v20, %v7694_v12  ;;  %v8262_v13 = vld [vmem:[#allocation8 + $0x6b0] sm:$0xf0]  ;;  %v10432_v21 = vld [vmem:[#allocation11 + $0x6c] sm:$0xf0]  ;;  %v8628_v26 = vld [vmem:[#allocation11 + $0x180] sm:$0xf] }
 0x1c7   :  { %3533 = vmatmul.bf16.vlgmr.msra.gmra.mxu0 %v11224_v24  ;;  %v11285_v48 = vadd.f32 %v3339_v44, %v3327_v43  ;;  %v10444_v43 = vld [vmem:[#allocation11 + $0xcc] sm:$0xf0]  ;;  %v8676_v44 = vld [vmem:[#allocation11 + $0x1e0] sm:$0xf]  ;;  %v8110_v4 = vld [vmem:[#allocation8 + $0x578] sm:$0xf0] }
 0x1c8   :  { %3577 = vmatpush.bf16.msrb.mxu0 %v7665_v52  ;;  %3546 = vmatmul.bf16.vlgmr.msra.gmra.mxu1 %v11229_v25  ;;  %v10368_v52 = vld [vmem:[#allocation8 + $0x66c] sm:$0xf0]  ;;  %v7948_v28 = vld [vmem:[#allocation8 + $0x418] sm:$0xf] }
 0x1c9   :  { %3590 = vmatpush.bf16.msrb.mxu1 %v7921_v46  ;;  %v10181_v46 = vld [vmem:[#allocation8 + $0x9c] sm:$0xf]  ;;  %3465 = vmatpush.bf16.msra.mxu3 %v8261_v45  ;;  %v8229_v19 = vor.u32 %v10368_v52, %v8228_v51  ;;  %v8044_v45 = vld [vmem:[#allocation8 + $0x4d8] sm:$0xf]  ;;  %v8677_v51 = vor.u32 %v10480_v49, %v8676_v44  ;;  %v10388_v52 = vld [vmem:[#allocation8 + $0x714] sm:$0xf] }
 0x1ca   :  { %v7505_v22 = vor.u32 %v10181_v46, %v7502_v56  ;;  %3506 = vmatpush.bf16.msrb.mxu2 %v7945_v55  ;;  %v8533_v55 = vor.u32 %v10444_v43, %v8532_v42  ;;  %v8045_v46 = vor.u32 %v10321_v47, %v8044_v45  ;;  %v8516_v56 = vld [vmem:[#allocation11 + $0xa0] sm:$0xf]  ;;  %v10297_v20 = vld [vmem:[#allocation8 + $0x434] sm:$0xf0]  ;;  %v10341_v47 = vld [vmem:[#allocation8 + $0x59c] sm:$0xf] }
 0x1cb   :  { %v10428_v42 = vld [vmem:[#allocation11 + $0x4c] sm:$0xf0]  ;;  %v8612_v43 = vld [vmem:[#allocation11 + $0x160] sm:$0xf] }
 0x1cc   :  { %3578 = vmatpush.bf16.msrb.mxu0 %v7633_v54  ;;  %v8196_v54 = vld [vmem:[#allocation8 + $0x610] sm:$0xf]  ;;  %v3328_v6 = vpop.f32.mrf.mxu0  ;;  %v10464_v44 = vld [vmem:[#allocation11 + $0x16c] sm:$0xf0] }
 0x1cd   :  { %3591 = vmatpush.bf16.msrb.mxu1 %v7889_v1  ;;  %v7761_v1 = vor.u32 %v10245_v58, %v7758_v59  ;;  %v3341_v23 = vpop.f32.mrf.mxu1  ;;  %3466 = vmatpush.bf16.msra.mxu3 %v8229_v19  ;;  %v8660_v58 = vld [vmem:[#allocation11 + $0x1c0] sm:$0xf]  ;;  %v8012_v19 = vld [vmem:[#allocation8 + $0x498] sm:$0xf]  ;;  %v8613_v49 = vor.u32 %v10464_v44, %v8612_v43 }
 0x1ce   :  { %3551 = vmatpush.bf16.msra.mxu2 %v8173_v57  ;;  %v10440_v57 = vld [vmem:[#allocation11 + $0xac] sm:$0xf0]  ;;  %v11290_v59 = vpop.f32.mrf.mxu2 }
 0x1cf   :  { %3507 = vmatmul.bf16.vlgmr.msrb.gmra.mxu2 %v11246_v7  ;;  %v7980_v6 = vld [vmem:[#allocation8 + $0x458] sm:$0xf] }
 0x1d0   :  { %3579 = vmatpush.bf16.msrb.mxu0 %v7601_v11  ;;  %v8197_v11 = vor.u32 %v10360_v62, %v8196_v54  ;;  %v8661_v54 = vor.u32 %v10476_v61, %v8660_v58  ;;  %v10380_v62 = vld [vmem:[#allocation8 + $0x6d4] sm:$0xf]  ;;  %v10424_v58 = vld [vmem:[#allocation11 + $0x2c] sm:$0xf0] }
 0x1d1   :  { %3592 = vmatpush.bf16.msrb.mxu1 %v7857_v15  ;;  %v8425_v15 = vor.u32 %v10412_v63, %v8422_v3  ;;  %v8294_v63 = vld [vmem:[#allocation8 + $0x6f0] sm:$0xf0]  ;;  %v8013_v3 = vor.u32 %v10313_v60, %v8012_v19  ;;  %v8596_v19 = vld [vmem:[#allocation11 + $0x140] sm:$0xf]  ;;  %v10460_v60 = vld [vmem:[#allocation11 + $0x14c] sm:$0xf0] }
 0x1d2   :  { %3552 = vmatpush.bf16.msra.mxu2 %v8141_v8  ;;  %3467 = vmatpush.bf16.msra.mxu3 %v8197_v11  ;;  %v10305_v8 = vld [vmem:[#allocation8 + $0x474] sm:$0xf0]  ;;  %v10372_v11 = vld [vmem:[#allocation8 + $0x694] sm:$0xf] }
 0x1d4   :  { %3580 = vmatpush.bf16.msrb.mxu0 %v7569_v31  ;;  %v8548_v31 = vld [vmem:[#allocation11 + $0xe0] sm:$0xf] }
 0x1d5   :  { %3593 = vmatpush.bf16.msrb.mxu1 %v7825_v33  ;;  %v10329_v33 = vld [vmem:[#allocation8 + $0x534] sm:$0xf0]  ;;  %v8549_v40 = vor.u32 %v10448_v32, %v8548_v31  ;;  %3468 = vmatmul.bf16.vlgmr.msra.gmra.mxu3 %v11259_v2  ;;  %v8265_v32 = vor.u32 %v10372_v11, %v8262_v13 }
 0x1d6   :  { %3512 = vmatpush.bf16.msrb.mxu3 %v8425_v15  ;;  %3553 = vmatpush.bf16.msra.mxu2 %v8109_v30  ;;  %v8077_v41 = vor.u32 %v10329_v33, %v8076_v38  ;;  %v7981_v15 = vor.u32 %v10305_v8, %v7980_v6  ;;  %v3250_v29 = vpop.f32.mrf.mxu2  ;;  %v10468_v30 = vld [vmem:[#allocation11 + $0x18c] sm:$0xf0]  ;;  %v10349_v38 = vld [vmem:[#allocation8 + $0x5dc] sm:$0xf] }
 0x1d7   :  { %v8174_v33 = vld [vmem:[#allocation8 + $0x5f8] sm:$0xf0]  ;;  %v10409_v6 = vld [vmem:[#allocation8 + $0x7b4] sm:$0xf0]  ;;  %v8564_v29 = vld [vmem:[#allocation11 + $0x100] sm:$0xf] }
 0x1d8   :  { %3581 = vmatpush.bf16.msrb.mxu0 %v7537_v50  ;;  %v8361_v50 = vor.u32 %v10396_v37, %v8358_v39  ;;  %v8468_v39 = vld [vmem:[#allocation11 + $0x40] sm:$0xf]  ;;  %v8177_v45 = vor.u32 %v10349_v38, %v8174_v33  ;;  %v8332_v33 = vld [vmem:[#allocation8 + $0x718] sm:$0xf] }
 0x1d9   :  { %3594 = vmatpush.bf16.msrb.mxu1 %v7793_v53  ;;  %v8326_v53 = vld [vmem:[#allocation8 + $0x730] sm:$0xf0] }
 0x1da   :  { %3513 = vmatpush.bf16.msrb.mxu3 %v8393_v34  ;;  %3554 = vmatpush.bf16.msra.mxu2 %v8077_v41  ;;  %v8629_v34 = vor.u32 %v10468_v30, %v8628_v26  ;;  %v7949_v41 = vor.u32 %v10297_v20, %v7948_v28  ;;  %v10452_v28 = vld [vmem:[#allocation11 + $0x10c] sm:$0xf0] }
 0x1dc   :  { %3582 = vmatpush.bf16.msrb.mxu0 %v7505_v22  ;;  %v8329_v22 = vor.u32 %v10388_v52, %v8326_v53  ;;  %v10356_v52 = vld [vmem:[#allocation8 + $0x614] sm:$0xf] }
 0x1dd   :  { %3595 = vmatpush.bf16.msrb.mxu1 %v7761_v1  ;;  %v8517_v1 = vor.u32 %v10440_v57, %v8516_v56  ;;  %v8198_v53 = vld [vmem:[#allocation8 + $0x630] sm:$0xf0]  ;;  %v8469_v56 = vor.u32 %v10428_v42, %v8468_v39  ;;  %v8452_v57 = vld [vmem:[#allocation11 + $0x20] sm:$0xf]  ;;  %v10385_v42 = vld [vmem:[#allocation8 + $0x6f4] sm:$0xf0] }
 0x1de   :  { %3514 = vmatpush.bf16.msrb.mxu3 %v8361_v50  ;;  %3555 = vmatpush.bf16.msra.mxu2 %v8045_v46  ;;  %v10417_v46 = vld [vmem:[#allocation8 + $0x7f4] sm:$0xf0]  ;;  %v8453_v8 = vor.u32 %v10424_v58, %v8452_v57  ;;  %v10293_v58 = vld [vmem:[#allocation8 + $0x41c] sm:$0xf] }
 0x1e0   :  { %3583 = vmatpush.bf16.msrb.mxu0 %v7473_v16  ;;  %v8484_v16 = vld [vmem:[#allocation11 + $0x60] sm:$0xf] }
 0x1e1   :  { %3596 = vmatpush.bf16.msrb.mxu1 %v7729_v18  ;;  %v8485_v37 = vor.u32 %v10432_v21, %v8484_v16  ;;  %v8364_v21 = vld [vmem:[#allocation8 + $0x758] sm:$0xf] }
 0x1e2   :  { %3515 = vmatpush.bf16.msrb.mxu3 %v8329_v22  ;;  %3556 = vmatpush.bf16.msra.mxu2 %v8013_v3  ;;  %v11296_v22 = vpop.f32.mrf.mxu2  ;;  %v10333_v3 = vld [vmem:[#allocation8 + $0x55c] sm:$0xf] }
 0x1e3   :  { %v8113_v11 = vor.u32 %v10333_v3, %v8110_v4  ;;  %v10369_v3 = vld [vmem:[#allocation8 + $0x674] sm:$0xf0] }
 0x1e4   :  { %3584 = vmatpush.bf16.msrb.mxu0 %v7441_v36  ;;  %v3378_v18 = vpop.f32.mrf.mxu0  ;;  %v10364_v36 = vld [vmem:[#allocation8 + $0x654] sm:$0xf] }
 0x1e5   :  { %3597 = vmatpush.bf16.msrb.mxu1 %v7697_v35  ;;  %v3379_v12 = vadd.f32 %v3378_v18, %v1920_v10  ;;  %v3391_v31 = vpop.f32.mrf.mxu1  ;;  %v8230_v35 = vld [vmem:[#allocation8 + $0x670] sm:$0xf0]  ;;  %v10420_v10 = vld [vmem:[#allocation11 + $0xc] sm:$0xf0] }
 0x1e6   :  { %3557 = vmatpush.bf16.msra.mxu2 %v7981_v15  ;;  %v8233_v50 = vor.u32 %v10364_v36, %v8230_v35  ;;  %v8078_v15 = vld [vmem:[#allocation8 + $0x538] sm:$0xf0]  ;;  %v10401_v18 = vld [vmem:[#allocation8 + $0x774] sm:$0xf0] }
 0x1e7   :  { %3585 = vmatmul.bf16.vlgmr.msrb.gmra.mxu0 %v11224_v24  ;;  %v8644_v24 = vld [vmem:[#allocation11 + $0x1a0] sm:$0xf]  ;;  %v8365_v38 = vor.u32 %v10401_v18, %v8364_v21  ;;  %v10309_v35 = vld [vmem:[#allocation8 + $0x49c] sm:$0xf] }
 0x1e8   :  { %5191 = vmatpush.bf16.msra.mxu0 %v8549_v40  ;;  %3598 = vmatmul.bf16.vlgmr.msrb.gmra.mxu1 %v11229_v25  ;;  %v8297_v25 = vor.u32 %v10380_v62, %v8294_v63  ;;  %v8645_v23 = vor.u32 %v10472_v9, %v8644_v24  ;;  %v11294_v40 = vadd.f32 %v3391_v31, %v3379_v12  ;;  %v8396_v24 = vld [vmem:[#allocation8 + $0x798] sm:$0xf]  ;;  %v8436_v9 = vld [vmem:[#allocation11] sm:$0xf]  ;;  %v10317_v31 = vld [vmem:[#allocation8 + $0x4dc] sm:$0xf] }
 0x1e9   :  { %5204 = vmatpush.bf16.msra.mxu1 %v8677_v51  ;;  %v8142_v51 = vld [vmem:[#allocation8 + $0x5b8] sm:$0xf0]  ;;  %v8597_v62 = vor.u32 %v10460_v60, %v8596_v19  ;;  %v8397_v16 = vor.u32 %v10409_v6, %v8396_v24  ;;  %v8437_v26 = vor.u32 %v10420_v10, %v8436_v9  ;;  %v8565_v12 = vor.u32 %v10452_v28, %v8564_v29  ;;  %v9060_v6 = vld [vmem:[#allocation11 + $0x4e0] sm:$0xf]  ;;  %v10508_v10 = vld [vmem:[#allocation11 + $0x2cc] sm:$0xf0] }
 0x1ea   :  { %3516 = vmatpush.bf16.msrb.mxu3 %v8297_v25  ;;  %3558 = vmatpush.bf16.msra.mxu2 %v7949_v41  ;;  %v8580_v25 = vld [vmem:[#allocation11 + $0x120] sm:$0xf]  ;;  %v3302_v20 = vpop.f32.mrf.mxu2  ;;  %v8300_v41 = vld [vmem:[#allocation8 + $0x6d8] sm:$0xf]  ;;  %v7950_v19 = vld [vmem:[#allocation8 + $0x438] sm:$0xf0] }
 0x1eb   :  { %v8788_v9 = vld [vmem:[#allocation11 + $0x2c0] sm:$0xf]  ;;  %v10572_v29 = vld [vmem:[#allocation11 + $0x4cc] sm:$0xf0] }
 0x1ec   :  { %5192 = vmatpush.bf16.msra.mxu0 %v8533_v55  ;;  %v8428_v55 = vld [vmem:[#allocation8 + $0x7d8] sm:$0xf]  ;;  %v3380_v61 = vpop.f32.mrf.mxu0  ;;  %v9044_v18 = vld [vmem:[#allocation11 + $0x4c0] sm:$0xf] }
 0x1ed   :  { %5205 = vmatpush.bf16.msra.mxu1 %v8661_v54  ;;  %v8145_v54 = vor.u32 %v10341_v47, %v8142_v51  ;;  %v3393_v63 = vpop.f32.mrf.mxu1  ;;  %3559 = vmatmul.bf16.vlgmr.msra.gmra.mxu2 %v11246_v7  ;;  %v8429_v5 = vor.u32 %v10417_v46, %v8428_v55  ;;  %v7982_v47 = vld [vmem:[#allocation8 + $0x478] sm:$0xf0]  ;;  %v3249_v51 = vadd.f32 %v11290_v59, %v11274_v27 }
 0x1ee   :  { %3517 = vmatpush.bf16.msrb.mxu3 %v8265_v32  ;;  %3603 = vmatpush.bf16.msrb.mxu2 %v8177_v45  ;;  %v8046_v32 = vld [vmem:[#allocation8 + $0x4f8] sm:$0xf0]  ;;  %v10512_v63 = vld [vmem:[#allocation11 + $0x2ec] sm:$0xf0]  ;;  %v7953_v59 = vor.u32 %v10293_v58, %v7950_v19 }
 0x1ef   :  { %v8049_v36 = vor.u32 %v10317_v31, %v8046_v32  ;;  %v10301_v45 = vld [vmem:[#allocation8 + $0x45c] sm:$0xf]  ;;  %v9045_v31 = vor.u32 %v10572_v29, %v9044_v18  ;;  %v8692_v18 = vld [vmem:[#allocation11 + $0x200] sm:$0xf]  ;;  %v10484_v29 = vld [vmem:[#allocation11 + $0x20c] sm:$0xf0] }
 0x1f0   :  { %5193 = vmatpush.bf16.msra.mxu0 %v8517_v1  ;;  %v8201_v1 = vor.u32 %v10356_v52, %v8198_v53  ;;  %v8268_v52 = vld [vmem:[#allocation8 + $0x698] sm:$0xf]  ;;  %v7985_v46 = vor.u32 %v10301_v45, %v7982_v47  ;;  %v10397_v45 = vld [vmem:[#allocation8 + $0x75c] sm:$0xf] }
 0x1f1   :  { %5206 = vmatpush.bf16.msra.mxu1 %v8645_v23  ;;  %v10456_v23 = vld [vmem:[#allocation11 + $0x12c] sm:$0xf0] }
 0x1f2   :  { %3518 = vmatpush.bf16.msrb.mxu3 %v8233_v50  ;;  %3604 = vmatpush.bf16.msrb.mxu2 %v8145_v54  ;;  %v8581_v13 = vor.u32 %v10456_v23, %v8580_v25  ;;  %v11300_v43 = vpop.f32.mrf.mxu2  ;;  %v8301_v50 = vor.u32 %v10385_v42, %v8300_v41  ;;  %v10377_v53 = vld [vmem:[#allocation8 + $0x6b4] sm:$0xf0]  ;;  %v3301_v42 = vadd.f32 %v11296_v22, %v11278_v0  ;;  %v10389_v0 = vld [vmem:[#allocation8 + $0x71c] sm:$0xf] }
 0x1f3   :  { %v8269_v54 = vor.u32 %v10377_v53, %v8268_v52  ;;  %v10576_v25 = vld [vmem:[#allocation11 + $0x4ec] sm:$0xf0]  ;;  %v8740_v53 = vld [vmem:[#allocation11 + $0x260] sm:$0xf]  ;;  %v8334_v22 = vld [vmem:[#allocation8 + $0x738] sm:$0xf0] }
 0x1f4   :  { %5194 = vmatpush.bf16.msra.mxu0 %v8501_v14  ;;  %v10325_v14 = vld [vmem:[#allocation8 + $0x51c] sm:$0xf]  ;;  %v8204_v23 = vld [vmem:[#allocation8 + $0x618] sm:$0xf] }
 0x1f5   :  { %5207 = vmatpush.bf16.msra.mxu1 %v8629_v34  ;;  %v8081_v30 = vor.u32 %v10325_v14, %v8078_v15  ;;  %v10393_v34 = vld [vmem:[#allocation8 + $0x734] sm:$0xf0]  ;;  %v10413_v15 = vld [vmem:[#allocation8 + $0x7dc] sm:$0xf] }
 0x1f6   :  { %3519 = vmatpush.bf16.msrb.mxu3 %v8201_v1  ;;  %3605 = vmatpush.bf16.msrb.mxu2 %v8113_v11  ;;  %v8333_v39 = vor.u32 %v10393_v34, %v8332_v33  ;;  %v3261_v55 = vpop.f32.mrf.mxu3  ;;  %v8236_v1 = vld [vmem:[#allocation8 + $0x658] sm:$0xf]  ;;  %v8398_v33 = vld [vmem:[#allocation8 + $0x7b8] sm:$0xf0] }
 0x1f7   :  { %v10361_v11 = vld [vmem:[#allocation8 + $0x634] sm:$0xf0] }
 0x1f8   :  { %5195 = vmatpush.bf16.msra.mxu0 %v8485_v37  ;;  %v8014_v37 = vld [vmem:[#allocation8 + $0x4b8] sm:$0xf0]  ;;  %v8205_v20 = vor.u32 %v10361_v11, %v8204_v23  ;;  %v11319_v11 = vld [vmem:[#allocation10] sm:$0xff] }
 0x1f9   :  { %5208 = vmatpush.bf16.msra.mxu1 %v8613_v49  ;;  %3520 = vmatmul.bf16.vlgmr.msrb.gmra.mxu3 %v11259_v2  ;;  %v8017_v44 = vor.u32 %v10309_v35, %v8014_v37  ;;  %v1921_v49 = vperm.slane %v11267_v17, 4  ;;  %v10568_v35 = vld [vmem:[#allocation11 + $0x4ac] sm:$0xf0]  ;;  %v8756_v37 = vld [vmem:[#allocation11 + $0x280] sm:$0xf] }
 0x1fa   :  { %3564 = vmatpush.bf16.msra.mxu3 %v8429_v5  ;;  %3606 = vmatpush.bf16.msrb.mxu2 %v8081_v30  ;;  %v3354_v27 = vpop.f32.mrf.mxu2  ;;  %v8772_v30 = vld [vmem:[#allocation11 + $0x2a0] sm:$0xf] }
 0x1fb   :  { %v8302_v27 = vld [vmem:[#allocation8 + $0x6f8] sm:$0xf0] }
 0x1fc   :  { %5196 = vmatpush.bf16.msra.mxu0 %v8469_v56  ;;  %v3262_v56 = vadd.f32 %v3261_v55, %v3249_v51  ;;  %v10496_v55 = vld [vmem:[#allocation11 + $0x26c] sm:$0xf0] }
 0x1fd   :  { %5209 = vmatpush.bf16.msra.mxu1 %v8597_v62  ;;  %v8804_v62 = vld [vmem:[#allocation11 + $0x2e0] sm:$0xf]  ;;  %v8741_v19 = vor.u32 %v10496_v55, %v8740_v53 }
 0x1fe   :  { %3565 = vmatpush.bf16.msra.mxu3 %v8397_v16  ;;  %3607 = vmatpush.bf16.msrb.mxu2 %v8049_v36  ;;  %v3629_v17 = vmax.f32 %v3262_v56, 0.0  ;;  %v8805_v24 = vor.u32 %v10512_v63, %v8804_v62  ;;  %v3263_v14 = vpop.f32.mrf.mxu3  ;;  %v8430_v16 = vld [vmem:[#allocation8 + $0x7f8] sm:$0xf0]  ;;  %v9028_v36 = vld [vmem:[#allocation11 + $0x4a0] sm:$0xf] }
 0x1ff   :  { %v8433_v32 = vor.u32 %v10413_v15, %v8430_v16  ;;  %v9029_v41 = vor.u32 %v10568_v35, %v9028_v36  ;;  %v10492_v62 = vld [vmem:[#allocation11 + $0x24c] sm:$0xf0]  ;;  %v10373_v14 = vld [vmem:[#allocation8 + $0x69c] sm:$0xf]  ;;  %v8693_v35 = vor.u32 %v10484_v29, %v8692_v18  ;;  %v8932_v55 = vld [vmem:[#allocation11 + $0x3e0] sm:$0xf] }
 0x200   :  { %5197 = vmatpush.bf16.msra.mxu0 %v8453_v8  ;;  %v11307_v5 = vpack.c.bf16 %v3629_v17, %v3629_v17  ;;  %v8237_v8 = vor.u32 %v10369_v3, %v8236_v1  ;;  %v8337_v17 = vor.u32 %v10389_v0, %v8334_v22  ;;  %v10381_v1 = vld [vmem:[#allocation8 + $0x6dc] sm:$0xf]  ;;  %v10604_v0 = vld [vmem:[#allocation11 + $0x5cc] sm:$0xf0]  ;;  %v10442_v22 = vld [vmem:[#allocation11 + $0xc4] sm:$0xf] }
 0x201   :  { %5210 = vmatpush.bf16.msra.mxu1 %v8581_v13  ;;  %v9061_v13 = vor.u32 %v10576_v25, %v9060_v6  ;;  %v8305_v23 = vor.u32 %v10381_v1, %v8302_v27  ;;  %v8270_v15 = vld [vmem:[#allocation8 + $0x6b8] sm:$0xf0]  ;;  %v10540_v27 = vld [vmem:[#allocation11 + $0x3cc] sm:$0xf0] }
 0x202   :  { %3566 = vmatpush.bf16.msra.mxu3 %v8365_v38  ;;  %3608 = vmatpush.bf16.msrb.mxu2 %v8017_v44  ;;  %v10405_v38 = vld [vmem:[#allocation8 + $0x79c] sm:$0xf] }
 0x203   :  { %v8401_v44 = vor.u32 %v10405_v38, %v8398_v33  ;;  %v10365_v33 = vld [vmem:[#allocation8 + $0x65c] sm:$0xf] }
 0x204   :  { %5198 = vmatpush.bf16.msra.mxu0 %v8437_v26  ;;  %v3430_v57 = vpop.f32.mrf.mxu0  ;;  %v8789_v26 = vor.u32 %v10508_v10, %v8788_v9  ;;  %v8708_v9 = vld [vmem:[#allocation11 + $0x220] sm:$0xf]  ;;  %v10488_v10 = vld [vmem:[#allocation11 + $0x22c] sm:$0xf0] }
 0x205   :  { %5211 = vmatpush.bf16.msra.mxu1 %v8565_v12  ;;  %v3431_v60 = vadd.f32 %v3430_v57, %v1921_v49  ;;  %v3443_v61 = vpop.f32.mrf.mxu1  ;;  %v10504_v12 = vld [vmem:[#allocation11 + $0x2ac] sm:$0xf0]  ;;  %v9012_v49 = vld [vmem:[#allocation11 + $0x480] sm:$0xf]  ;;  %v8709_v16 = vor.u32 %v10488_v10, %v8708_v9  ;;  %v8518_v10 = vld [vmem:[#allocation11 + $0xb0] sm:$0xf0] }
 0x206   :  { %3567 = vmatpush.bf16.msra.mxu3 %v8333_v39  ;;  %3609 = vmatpush.bf16.msrb.mxu2 %v7985_v46  ;;  %v8773_v34 = vor.u32 %v10504_v12, %v8772_v30  ;;  %v10500_v39 = vld [vmem:[#allocation11 + $0x28c] sm:$0xf0]  ;;  %v3313_v47 = vpop.f32.mrf.mxu3  ;;  %v8273_v12 = vor.u32 %v10373_v14, %v8270_v15  ;;  %v10434_v15 = vld [vmem:[#allocation11 + $0x84] sm:$0xf] }
 0x207   :  { %v11305_v4 = vadd.f32 %v3443_v61, %v3431_v60  ;;  %5199 = vmatmul.bf16.vlgmr.msra.gmra.mxu0 %v11307_v5  ;;  %v3314_v51 = vadd.f32 %v3313_v47, %v3301_v42  ;;  %v8757_v52 = vor.u32 %v10500_v39, %v8756_v37  ;;  %v8996_v60 = vld [vmem:[#allocation11 + $0x460] sm:$0xf]  ;;  %v10560_v61 = vld [vmem:[#allocation11 + $0x46c] sm:$0xf0] }
 0x208   :  { %5243 = vmatpush.bf16.msrb.mxu0 %v9061_v13  ;;  %v8997_v63 = vor.u32 %v10560_v61, %v8996_v60  ;;  %v1922_v13 = vperm.slane %v11319_v11, 5  ;;  %v8948_v37 = vld [vmem:[#allocation11 + $0x400] sm:$0xf]  ;;  %v10548_v39 = vld [vmem:[#allocation11 + $0x40c] sm:$0xf0] }
 0x209   :  { %v3630_v56 = vmax.f32 %v3314_v51, 0.0  ;;  %v10608_v47 = vld [vmem:[#allocation11 + $0x5ec] sm:$0xf0] }
 0x20a   :  { %3568 = vmatpush.bf16.msra.mxu3 %v8301_v50  ;;  %3610 = vmatpush.bf16.msrb.mxu2 %v7953_v59  ;;  %v10564_v50 = vld [vmem:[#allocation11 + $0x48c] sm:$0xf0]  ;;  %v8980_v59 = vld [vmem:[#allocation11 + $0x440] sm:$0xf] }
 0x20b   :  { %v9013_v46 = vor.u32 %v10564_v50, %v9012_v49  ;;  %v11314_v58 = vpack.c.bf16 %v3630_v56, %v3630_v56  ;;  %v10357_v49 = vld [vmem:[#allocation8 + $0x61c] sm:$0xf] }
 0x20c   :  { %v3432_v21 = vpop.f32.mrf.mxu0  ;;  %5244 = vmatpush.bf16.msrb.mxu0 %v9045_v31  ;;  %v8206_v50 = vld [vmem:[#allocation8 + $0x638] sm:$0xf0] }
 0x20d   :  { %v3445_v28 = vpop.f32.mrf.mxu1  ;;  %3611 = vmatmul.bf16.vlgmr.msrb.gmra.mxu2 %v11246_v7  ;;  %v8366_v7 = vld [vmem:[#allocation8 + $0x778] sm:$0xf0]  ;;  %5212 = vmatmul.bf16.vlgmr.msra.gmra.mxu1 %v11314_v58  ;;  %v8964_v21 = vld [vmem:[#allocation11 + $0x420] sm:$0xf]  ;;  %v8209_v60 = vor.u32 %v10357_v49, %v8206_v50  ;;  %v10524_v50 = vld [vmem:[#allocation11 + $0x34c] sm:$0xf0] }
 0x20e   :  { %3569 = vmatpush.bf16.msra.mxu3 %v8269_v54  ;;  %5217 = vmatpush.bf16.msra.mxu2 %v8805_v24  ;;  %v8369_v57 = vor.u32 %v10397_v45, %v8366_v7  ;;  %v8724_v54 = vld [vmem:[#allocation11 + $0x240] sm:$0xf]  ;;  %v3315_v3 = vpop.f32.mrf.mxu3  ;;  %v10556_v24 = vld [vmem:[#allocation11 + $0x44c] sm:$0xf0]  ;;  %v10446_v7 = vld [vmem:[#allocation11 + $0xe4] sm:$0xf] }
 0x20f   :  { %v8725_v6 = vor.u32 %v10492_v62, %v8724_v54  ;;  %v8981_v25 = vor.u32 %v10556_v24, %v8980_v59  ;;  %v9188_v45 = vld [vmem:[#allocation11 + $0x5e0] sm:$0xf]  ;;  %v8534_v54 = vld [vmem:[#allocation11 + $0xd0] sm:$0xf0]  ;;  %v10600_v24 = vld [vmem:[#allocation11 + $0x5ac] sm:$0xf0] }
 0x210   :  { %5245 = vmatpush.bf16.msrb.mxu0 %v9029_v41  ;;  %v9189_v51 = vor.u32 %v10608_v47, %v9188_v45  ;;  %v8537_v1 = vor.u32 %v10442_v22, %v8534_v54  ;;  %v8916_v3 = vld [vmem:[#allocation11 + $0x3c0] sm:$0xf]  ;;  %v8470_v45 = vld [vmem:[#allocation11 + $0x50] sm:$0xf0] }
 0x211   :  { %v9156_v59 = vld [vmem:[#allocation11 + $0x5a0] sm:$0xf] }
 0x212   :  { %3570 = vmatpush.bf16.msra.mxu3 %v8237_v8  ;;  %5218 = vmatpush.bf16.msra.mxu2 %v8789_v26  ;;  %v11317_v8 = vpop.f32.mrf.mxu2  ;;  %v10552_v26 = vld [vmem:[#allocation11 + $0x42c] sm:$0xf0]  ;;  %v9157_v9 = vor.u32 %v10600_v24, %v9156_v59  ;;  %v8852_v49 = vld [vmem:[#allocation11 + $0x340] sm:$0xf] }
 0x213   :  { %v8965_v28 = vor.u32 %v10552_v26, %v8964_v21  ;;  %5256 = vmatpush.bf16.msrb.mxu1 %v9189_v51  ;;  %v8900_v21 = vld [vmem:[#allocation11 + $0x3a0] sm:$0xf]  ;;  %v10536_v26 = vld [vmem:[#allocation11 + $0x3ac] sm:$0xf0] }
 0x214   :  { %5246 = vmatpush.bf16.msrb.mxu0 %v9013_v46  ;;  %v10544_v46 = vld [vmem:[#allocation11 + $0x3ec] sm:$0xf0]  ;;  %v9092_v51 = vld [vmem:[#allocation11 + $0x520] sm:$0xf] }
 0x215   :  { %v8836_v54 = vld [vmem:[#allocation11 + $0x320] sm:$0xf] }
 0x216   :  { %3571 = vmatpush.bf16.msra.mxu3 %v8205_v20  ;;  %5219 = vmatpush.bf16.msra.mxu2 %v8773_v34  ;;  %v3353_v20 = vadd.f32 %v11300_v43, %v11285_v48  ;;  %v8238_v34 = vld [vmem:[#allocation8 + $0x678] sm:$0xf0] }
 0x217   :  { %v3365_v38 = vpop.f32.mrf.mxu3  ;;  %v8241_v43 = vor.u32 %v10365_v33, %v8238_v34  ;;  %v8486_v33 = vld [vmem:[#allocation11 + $0x70] sm:$0xf0] }
 0x218   :  { %5247 = vmatpush.bf16.msrb.mxu0 %v8997_v63  ;;  %v3366_v36 = vadd.f32 %v3365_v38, %v3353_v20  ;;  %v8884_v20 = vld [vmem:[#allocation11 + $0x380] sm:$0xf] }
 0x219   :  { %3572 = vmatmul.bf16.vlgmr.msra.gmra.mxu3 %v11259_v2 }
 0x21a   :  { %3616 = vmatpush.bf16.msrb.mxu3 %v8433_v32  ;;  %5220 = vmatpush.bf16.msra.mxu2 %v8757_v52  ;;  %v3406_v42 = vpop.f32.mrf.mxu2  ;;  %v3631_v48 = vmax.f32 %v3366_v36, 0.0  ;;  %v8550_v52 = vld [vmem:[#allocation11 + $0xf0] sm:$0xf0]  ;;  %v8868_v36 = vld [vmem:[#allocation11 + $0x360] sm:$0xf] }
 0x21b   :  { %v8553_v56 = vor.u32 %v10446_v7, %v8550_v52  ;;  %v10426_v42 = vld [vmem:[#allocation11 + $0x44] sm:$0xf]  ;;  %v1923_v7 = vperm.slane %v11319_v11, 6  ;;  %v10584_v52 = vld [vmem:[#allocation11 + $0x52c] sm:$0xf0] }
 0x21c   :  { %5248 = vmatpush.bf16.msrb.mxu0 %v8981_v25  ;;  %v11326_v53 = vpack.c.bf16 %v3631_v48, %v3631_v48  ;;  %v9140_v25 = vld [vmem:[#allocation11 + $0x580] sm:$0xf] }
 0x21e   :  { %3617 = vmatpush.bf16.msrb.mxu3 %v8401_v44  ;;  %5221 = vmatpush.bf16.msra.mxu2 %v8741_v19  ;;  %v8949_v44 = vor.u32 %v10548_v39, %v8948_v37  ;;  %v9108_v37 = vld [vmem:[#allocation11 + $0x540] sm:$0xf]  ;;  %v10588_v39 = vld [vmem:[#allocation11 + $0x54c] sm:$0xf0] }
 0x21f   :  { %v3367_v63 = vpop.f32.mrf.mxu3 }
 0x220   :  { %5249 = vmatpush.bf16.msrb.mxu0 %v8965_v28  ;;  %v8901_v28 = vor.u32 %v10536_v26, %v8900_v21  ;;  %v9076_v63 = vld [vmem:[#allocation11 + $0x500] sm:$0xf]  ;;  %v10516_v26 = vld [vmem:[#allocation11 + $0x30c] sm:$0xf0] }
 0x221   :  { %v8820_v21 = vld [vmem:[#allocation11 + $0x300] sm:$0xf] }
 0x222   :  { %3618 = vmatpush.bf16.msrb.mxu3 %v8369_v57  ;;  %5222 = vmatpush.bf16.msra.mxu2 %v8725_v6  ;;  %v9172_v57 = vld [vmem:[#allocation11 + $0x5c0] sm:$0xf]  ;;  %v10438_v6 = vld [vmem:[#allocation11 + $0xa4] sm:$0xf] }
 0x223   :  { %v9173_v61 = vor.u32 %v10604_v0, %v9172_v57  ;;  %v8521_v14 = vor.u32 %v10438_v6, %v8518_v10  ;;  %v8853_v0 = vor.u32 %v10524_v50, %v8852_v49  ;;  %v8438_v6 = vld [vmem:[#allocation11 + $0x10] sm:$0xf0]  ;;  %v10640_v10 = vld [vmem:[#allocation11 + $0x6ec] sm:$0xf0]  ;;  %v9252_v50 = vld [vmem:[#allocation11 + $0x660] sm:$0xf] }
 0x224   :  { %v3482_v30 = vpop.f32.mrf.mxu0  ;;  %5250 = vmatpush.bf16.msrb.mxu0 %v8949_v44  ;;  %v9109_v44 = vor.u32 %v10588_v39, %v9108_v37  ;;  %v8646_v37 = vld [vmem:[#allocation11 + $0x1b0] sm:$0xf0] }
 0x225   :  { %v3483_v31 = vadd.f32 %v3482_v30, %v1922_v13  ;;  %v3495_v32 = vpop.f32.mrf.mxu1  ;;  %5257 = vmatpush.bf16.msrb.mxu1 %v9173_v61  ;;  %v8917_v13 = vor.u32 %v10540_v27, %v8916_v3  ;;  %v10532_v30 = vld [vmem:[#allocation11 + $0x38c] sm:$0xf0]  ;;  %v3405_v3 = vadd.f32 %v11317_v8, %v11294_v40  ;;  %v9300_v40 = vld [vmem:[#allocation11 + $0x6c0] sm:$0xf] }
 0x226   :  { %3619 = vmatpush.bf16.msrb.mxu3 %v8337_v17  ;;  %5223 = vmatpush.bf16.msra.mxu2 %v8709_v16  ;;  %v8933_v17 = vor.u32 %v10544_v46, %v8932_v55  ;;  %v8502_v16 = vld [vmem:[#allocation11 + $0x90] sm:$0xf0]  ;;  %v8885_v34 = vor.u32 %v10532_v30, %v8884_v20  ;;  %v10422_v55 = vld [vmem:[#allocation11 + $0x24] sm:$0xf]  ;;  %v9093_v46 = vor.u32 %v10584_v52, %v9092_v51  ;;  %v10636_v8 = vld [vmem:[#allocation11 + $0x6cc] sm:$0xf0] }
 0x227   :  { %v11324_v41 = vadd.f32 %v3495_v32, %v3483_v31  ;;  %v8505_v29 = vor.u32 %v10434_v15, %v8502_v16  ;;  %v10592_v31 = vld [vmem:[#allocation11 + $0x56c] sm:$0xf0]  ;;  %v10430_v32 = vld [vmem:[#allocation11 + $0x64] sm:$0xf]  ;;  %v8678_v15 = vld [vmem:[#allocation11 + $0x1f0] sm:$0xf0] }
 0x228   :  { %5295 = vmatpush.bf16.msra.mxu0 %v8553_v56  ;;  %v8454_v56 = vld [vmem:[#allocation11 + $0x30] sm:$0xf0]  ;;  %v10624_v51 = vld [vmem:[#allocation11 + $0x66c] sm:$0xf0]  ;;  %v10462_v52 = vld [vmem:[#allocation11 + $0x164] sm:$0xf] }
 0x229   :  { %5258 = vmatpush.bf16.msrb.mxu1 %v9157_v9  ;;  %v8457_v22 = vor.u32 %v10422_v55, %v8454_v56  ;;  %v9316_v9 = vld [vmem:[#allocation11 + $0x6e0] sm:$0xf]  ;;  %v8662_v20 = vld [vmem:[#allocation11 + $0x1d0] sm:$0xf0]  ;;  %v9253_v55 = vor.u32 %v10624_v51, %v9252_v50 }
 0x22a   :  { %3620 = vmatpush.bf16.msrb.mxu3 %v8305_v23  ;;  %5224 = vmatpush.bf16.msra.mxu2 %v8693_v35  ;;  %v10596_v23 = vld [vmem:[#allocation11 + $0x58c] sm:$0xf0]  ;;  %v9030_v50 = vld [vmem:[#allocation11 + $0x4b0] sm:$0xf0]  ;;  %v9412_v51 = vld [vmem:[#allocation11 + $0x7a0] sm:$0xf] }
 0x22b   :  { %v9141_v18 = vor.u32 %v10596_v23, %v9140_v25  ;;  %v10528_v35 = vld [vmem:[#allocation11 + $0x36c] sm:$0xf0] }
 0x22c   :  { %v3484_v19 = vpop.f32.mrf.mxu0  ;;  %5296 = vmatpush.bf16.msra.mxu0 %v8537_v1  ;;  %v8869_v47 = vor.u32 %v10528_v35, %v8868_v36  ;;  %v10418_v1 = vld [vmem:[#allocation11 + $0x4] sm:$0xf]  ;;  %v10632_v36 = vld [vmem:[#allocation11 + $0x6ac] sm:$0xf0] }
 0x22d   :  { %v3497_v62 = vpop.f32.mrf.mxu1  ;;  %5225 = vmatmul.bf16.vlgmr.msra.gmra.mxu2 %v11326_v53  ;;  %5259 = vmatpush.bf16.msrb.mxu1 %v9141_v18  ;;  %v8441_v23 = vor.u32 %v10418_v1, %v8438_v6  ;;  %v10470_v35 = vld [vmem:[#allocation11 + $0x1a4] sm:$0xf] }
 0x22e   :  { %3621 = vmatpush.bf16.msrb.mxu3 %v8273_v12  ;;  %v9124_v12 = vld [vmem:[#allocation11 + $0x560] sm:$0xf]  ;;  %v10520_v62 = vld [vmem:[#allocation11 + $0x32c] sm:$0xf0]  ;;  %v8649_v39 = vor.u32 %v10470_v35, %v8646_v37  ;;  %v10454_v1 = vld [vmem:[#allocation11 + $0x124] sm:$0xf] }
 0x22f   :  { %v9125_v38 = vor.u32 %v10592_v31, %v9124_v12  ;;  %v8837_v25 = vor.u32 %v10520_v62, %v8836_v54  ;;  %v8821_v12 = vor.u32 %v10516_v26, %v8820_v21  ;;  %v1924_v62 = vperm.slane %v11319_v11, 7  ;;  %v9204_v11 = vld [vmem:[#allocation11 + $0x600] sm:$0xf]  ;;  %v10450_v21 = vld [vmem:[#allocation11 + $0x104] sm:$0xf] }
 0x230   :  { %5297 = vmatpush.bf16.msra.mxu0 %v8521_v14  ;;  %v10478_v14 = vld [vmem:[#allocation11 + $0x1e4] sm:$0xf]  ;;  %v10668_v35 = vld [vmem:[#allocation11 + $0x7cc] sm:$0xf0] }
 0x231   :  { %5260 = vmatpush.bf16.msrb.mxu1 %v9125_v38  ;;  %v8681_v18 = vor.u32 %v10478_v14, %v8678_v15  ;;  %v9062_v14 = vld [vmem:[#allocation11 + $0x4f0] sm:$0xf0] }
 0x232   :  { %3622 = vmatpush.bf16.msrb.mxu3 %v8241_v43  ;;  %v11330_v48 = vpop.f32.mrf.mxu2  ;;  %v8473_v43 = vor.u32 %v10426_v42, %v8470_v45  ;;  %v10628_v45 = vld [vmem:[#allocation11 + $0x68c] sm:$0xf0] }
 0x234   :  { %5298 = vmatpush.bf16.msra.mxu0 %v8505_v29  ;;  %v10474_v29 = vld [vmem:[#allocation11 + $0x1c4] sm:$0xf] }
 0x235   :  { %5261 = vmatpush.bf16.msrb.mxu1 %v9109_v44  ;;  %v8665_v31 = vor.u32 %v10474_v29, %v8662_v20  ;;  %v9268_v44 = vld [vmem:[#allocation11 + $0x680] sm:$0xf] }
 0x236   :  { %3623 = vmatpush.bf16.msrb.mxu3 %v8209_v60 }
 0x237   :  { %v3417_v61 = vpop.f32.mrf.mxu3 }
 0x238   :  { %v3418_v16 = vadd.f32 %v3417_v61, %v3405_v3 }
 0x239   :  { %3624 = vmatmul.bf16.vlgmr.msrb.gmra.mxu3 %v11259_v2  ;;  %v8489_v2 = vor.u32 %v10430_v32, %v8486_v33  ;;  %5262 = vmatpush.bf16.msrb.mxu1 %v9093_v46  ;;  %v8614_v46 = vld [vmem:[#allocation11 + $0x170] sm:$0xf0] }
 0x23a   :  { %5230 = vmatpush.bf16.msra.mxu3 %v8933_v17  ;;  %v10580_v17 = vld [vmem:[#allocation11 + $0x50c] sm:$0xf0]  ;;  %v3458_v59 = vpop.f32.mrf.mxu2  ;;  %v3632_v32 = vmax.f32 %v3418_v16, 0.0  ;;  %v8617_v56 = vor.u32 %v10462_v52, %v8614_v46  ;;  %v10502_v46 = vld [vmem:[#allocation11 + $0x2a4] sm:$0xf] }
 0x23b   :  { %5299 = vmatpush.bf16.msra.mxu0 %v8489_v2  ;;  %v9077_v24 = vor.u32 %v10580_v17, %v9076_v63  ;;  %v9220_v63 = vld [vmem:[#allocation11 + $0x620] sm:$0xf]  ;;  %v10616_v17 = vld [vmem:[#allocation11 + $0x62c] sm:$0xf0]  ;;  %v8582_v59 = vld [vmem:[#allocation11 + $0x130] sm:$0xf0] }
 0x23c   :  { %v11337_v42 = vpack.c.bf16 %v3632_v32, %v3632_v32  ;;  %v9221_v3 = vor.u32 %v10616_v17, %v9220_v63  ;;  %v10612_v16 = vld [vmem:[#allocation11 + $0x60c] sm:$0xf0]  ;;  %v8758_v17 = vld [vmem:[#allocation11 + $0x290] sm:$0xf0] }
 0x23d   :  { %5263 = vmatpush.bf16.msrb.mxu1 %v9077_v24  ;;  %v3457_v24 = vadd.f32 %v11330_v48, %v11305_v4  ;;  %v9444_v48 = vld [vmem:[#allocation11 + $0x7e0] sm:$0xf]  ;;  %v10664_v52 = vld [vmem:[#allocation11 + $0x7ac] sm:$0xf0] }
 0x23e   :  { %5231 = vmatpush.bf16.msra.mxu3 %v8917_v13  ;;  %v9317_v13 = vor.u32 %v10640_v10, %v9316_v9  ;;  %v8585_v9 = vor.u32 %v10454_v1, %v8582_v59  ;;  %v10558_v59 = vld [vmem:[#allocation11 + $0x464] sm:$0xf] }
 0x23f   :  { %5300 = vmatpush.bf16.msra.mxu0 %v8473_v43  ;;  %v3419_v33 = vpop.f32.mrf.mxu3  ;;  %v10466_v43 = vld [vmem:[#allocation11 + $0x184] sm:$0xf] }
 0x240   :  { %5269 = vmatpush.bf16.msrb.mxu2 %v9317_v13  ;;  %v10574_v13 = vld [vmem:[#allocation11 + $0x4e4] sm:$0xf]  ;;  %v9046_v33 = vld [vmem:[#allocation11 + $0x4d0] sm:$0xf0] }
 0x241   :  { %5308 = vmatpush.bf16.msra.mxu1 %v8681_v18  ;;  %v9065_v20 = vor.u32 %v10574_v13, %v9062_v14  ;;  %v10554_v14 = vld [vmem:[#allocation11 + $0x444] sm:$0xf] }
 0x242   :  { %5232 = vmatpush.bf16.msra.mxu3 %v8901_v28  ;;  %v9301_v28 = vor.u32 %v10636_v8, %v9300_v40  ;;  %v9205_v40 = vor.u32 %v10612_v16, %v9204_v11  ;;  %v8566_v8 = vld [vmem:[#allocation11 + $0x110] sm:$0xf0]  ;;  %v9364_v16 = vld [vmem:[#allocation11 + $0x740] sm:$0xf] }
 0x243   :  { %5301 = vmatpush.bf16.msra.mxu0 %v8457_v22  ;;  %v10458_v22 = vld [vmem:[#allocation11 + $0x144] sm:$0xf]  ;;  %v8569_v4 = vor.u32 %v10450_v21, %v8566_v8  ;;  %v10652_v21 = vld [vmem:[#allocation11 + $0x74c] sm:$0xf0]  ;;  %v8726_v8 = vld [vmem:[#allocation11 + $0x250] sm:$0xf0] }
 0x244   :  { %v3534_v57 = vpop.f32.mrf.mxu0  ;;  %5270 = vmatpush.bf16.msrb.mxu2 %v9301_v28  ;;  %v10672_v28 = vld [vmem:[#allocation11 + $0x7ec] sm:$0xf0] }
 0x245   :  { %v3535_v19 = vadd.f32 %v3534_v57, %v1923_v7  ;;  %v3547_v60 = vpop.f32.mrf.mxu1  ;;  %5309 = vmatpush.bf16.msra.mxu1 %v8665_v31  ;;  %v8630_v7 = vld [vmem:[#allocation11 + $0x190] sm:$0xf0]  ;;  %v9236_v57 = vld [vmem:[#allocation11 + $0x640] sm:$0xf] }
 0x246   :  { %5233 = vmatpush.bf16.msra.mxu3 %v8885_v34  ;;  %v9284_v34 = vld [vmem:[#allocation11 + $0x6a0] sm:$0xf]  ;;  %v8633_v49 = vor.u32 %v10466_v43, %v8630_v7  ;;  %v8806_v31 = vld [vmem:[#allocation11 + $0x2f0] sm:$0xf0] }
 0x247   :  { %v11335_v27 = vadd.f32 %v3547_v60, %v3535_v19  ;;  %5302 = vmatpush.bf16.msra.mxu0 %v8441_v23  ;;  %v9285_v2 = vor.u32 %v10632_v36, %v9284_v34  ;;  %v8598_v60 = vld [vmem:[#allocation11 + $0x150] sm:$0xf0]  ;;  %v9428_v36 = vld [vmem:[#allocation11 + $0x7c0] sm:$0xf] }
 0x248   :  { %v8601_v54 = vor.u32 %v10458_v22, %v8598_v60  ;;  %v9014_v22 = vld [vmem:[#allocation11 + $0x490] sm:$0xf0]  ;;  %v9396_v60 = vld [vmem:[#allocation11 + $0x780] sm:$0xf] }
 0x249   :  { %5271 = vmatpush.bf16.msrb.mxu2 %v9285_v2  ;;  %5310 = vmatpush.bf16.msra.mxu1 %v8649_v39  ;;  %v10506_v2 = vld [vmem:[#allocation11 + $0x2c4] sm:$0xf]  ;;  %v9429_v39 = vor.u32 %v10668_v35, %v9428_v36 }
 0x24a   :  { %5234 = vmatpush.bf16.msra.mxu3 %v8869_v47  ;;  %v9269_v47 = vor.u32 %v10628_v45, %v9268_v44  ;;  %v8790_v44 = vld [vmem:[#allocation11 + $0x2d0] sm:$0xf0]  ;;  %v10546_v35 = vld [vmem:[#allocation11 + $0x404] sm:$0xf] }
 0x24b   :  { %v8793_v7 = vor.u32 %v10506_v2, %v8790_v44  ;;  %v8950_v2 = vld [vmem:[#allocation11 + $0x410] sm:$0xf0] }
 0x24c   :  { %v3536_v30 = vpop.f32.mrf.mxu0 }
 0x24d   :  { %v3549_v38 = vpop.f32.mrf.mxu1  ;;  %5272 = vmatpush.bf16.msrb.mxu2 %v9269_v47  ;;  %5311 = vmatpush.bf16.msra.mxu1 %v8633_v49  ;;  %v9445_v30 = vor.u32 %v10672_v28, %v9444_v48  ;;  %v10566_v49 = vld [vmem:[#allocation11 + $0x4a4] sm:$0xf] }
 0x24e   :  { %5235 = vmatpush.bf16.msra.mxu3 %v8853_v0  ;;  %v10620_v0 = vld [vmem:[#allocation11 + $0x64c] sm:$0xf0]  ;;  %v10570_v38 = vld [vmem:[#allocation11 + $0x4c4] sm:$0xf] }
 0x24f   :  { %v9237_v19 = vor.u32 %v10620_v0, %v9236_v57  ;;  %v9049_v47 = vor.u32 %v10570_v38, %v9046_v33  ;;  %v9033_v57 = vor.u32 %v10566_v49, %v9030_v50  ;;  %v10562_v0 = vld [vmem:[#allocation11 + $0x484] sm:$0xf]  ;;  %v8710_v33 = vld [vmem:[#allocation11 + $0x230] sm:$0xf0]  ;;  %v9332_v49 = vld [vmem:[#allocation11 + $0x700] sm:$0xf] }
 0x250   :  { %v10550_v28 = vld [vmem:[#allocation11 + $0x424] sm:$0xf]  ;;  %v10644_v50 = vld [vmem:[#allocation11 + $0x70c] sm:$0xf0] }
 0x251   :  { %5273 = vmatpush.bf16.msrb.mxu2 %v9253_v55  ;;  %5312 = vmatpush.bf16.msra.mxu1 %v8617_v56  ;;  %v9413_v55 = vor.u32 %v10664_v52, %v9412_v51  ;;  %v8774_v56 = vld [vmem:[#allocation11 + $0x2b0] sm:$0xf0]  ;;  %v10482_v51 = vld [vmem:[#allocation11 + $0x204] sm:$0xf] }
 0x252   :  { %5236 = vmatpush.bf16.msra.mxu3 %v8837_v25  ;;  %v11340_v61 = vpop.f32.mrf.mxu2 }
 0x255   :  { %5274 = vmatpush.bf16.msrb.mxu2 %v9237_v19  ;;  %5313 = vmatpush.bf16.msra.mxu1 %v8601_v54  ;;  %v8777_v19 = vor.u32 %v10502_v46, %v8774_v56  ;;  %v10660_v54 = vld [vmem:[#allocation11 + $0x78c] sm:$0xf0]  ;;  %v8694_v46 = vld [vmem:[#allocation11 + $0x210] sm:$0xf0] }
 0x256   :  { %5237 = vmatpush.bf16.msra.mxu3 %v8821_v12  ;;  %v10510_v12 = vld [vmem:[#allocation11 + $0x2e4] sm:$0xf]  ;;  %v9397_v63 = vor.u32 %v10660_v54, %v9396_v60  ;;  %v8697_v56 = vor.u32 %v10482_v51, %v8694_v46  ;;  %v8934_v60 = vld [vmem:[#allocation11 + $0x3f0] sm:$0xf0] }
 0x257   :  { %v8809_v34 = vor.u32 %v10510_v12, %v8806_v31  ;;  %v10648_v12 = vld [vmem:[#allocation11 + $0x72c] sm:$0xf0]  ;;  %v10486_v31 = vld [vmem:[#allocation11 + $0x224] sm:$0xf] }
 0x258   :  { %v3469_v23 = vpop.f32.mrf.mxu3 }
 0x259   :  { %5238 = vmatmul.bf16.vlgmr.msra.gmra.mxu3 %v11337_v42  ;;  %5275 = vmatpush.bf16.msrb.mxu2 %v9221_v3  ;;  %v3470_v15 = vadd.f32 %v3469_v23, %v3457_v24  ;;  %v9017_v3 = vor.u32 %v10562_v0, %v9014_v22  ;;  %v8998_v24 = vld [vmem:[#allocation11 + $0x470] sm:$0xf0]  ;;  %v10602_v22 = vld [vmem:[#allocation11 + $0x5c4] sm:$0xf] }
 0x25a   :  { %5314 = vmatpush.bf16.msra.mxu1 %v8585_v9  ;;  %v3510_v18 = vpop.f32.mrf.mxu2  ;;  %5282 = vmatpush.bf16.msrb.mxu3 %v9445_v30  ;;  %v10656_v9 = vld [vmem:[#allocation11 + $0x76c] sm:$0xf0]  ;;  %v8742_v23 = vld [vmem:[#allocation11 + $0x270] sm:$0xf0]  ;;  %v9001_v13 = vor.u32 %v10558_v59, %v8998_v24  ;;  %v9348_v30 = vld [vmem:[#allocation11 + $0x720] sm:$0xf] }
 0x25b   :  { %v3633_v29 = vmax.f32 %v3470_v15, 0.0  ;;  %v8982_v15 = vld [vmem:[#allocation11 + $0x450] sm:$0xf0]  ;;  %v10490_v18 = vld [vmem:[#allocation11 + $0x244] sm:$0xf]  ;;  %v9349_v38 = vor.u32 %v10648_v12, %v9348_v30 }
 0x25c   :  { %v8985_v48 = vor.u32 %v10554_v14, %v8982_v15  ;;  %v8918_v59 = vld [vmem:[#allocation11 + $0x3d0] sm:$0xf0]  ;;  %v10534_v15 = vld [vmem:[#allocation11 + $0x3a4] sm:$0xf] }
 0x25d   :  { %5276 = vmatpush.bf16.msrb.mxu2 %v9205_v40  ;;  %v11347_v32 = vpack.c.bf16 %v3633_v29, %v3633_v29  ;;  %v9365_v40 = vor.u32 %v10652_v21, %v9364_v16  ;;  %v8886_v30 = vld [vmem:[#allocation11 + $0x390] sm:$0xf0] }
 0x25e   :  { %5315 = vmatpush.bf16.msra.mxu1 %v8569_v4  ;;  %5283 = vmatpush.bf16.msrb.mxu3 %v9429_v39  ;;  %v8729_v4 = vor.u32 %v10490_v18, %v8726_v8  ;;  %v8713_v39 = vor.u32 %v10486_v31, %v8710_v33  ;;  %v10594_v18 = vld [vmem:[#allocation11 + $0x584] sm:$0xf]  ;;  %v9142_v8 = vld [vmem:[#allocation11 + $0x590] sm:$0xf0] }
 0x25f   :  { %5251 = vmatmul.bf16.vlgmr.msrb.gmra.mxu0 %v11347_v32  ;;  %v9145_v12 = vor.u32 %v10594_v18, %v9142_v8  ;;  %v9126_v33 = vld [vmem:[#allocation11 + $0x570] sm:$0xf0]  ;;  %v9068_v18 = vld [vmem:[#allocation11 + $0x4e8] sm:$0xf] }
 0x260   :  { %5347 = vmatpush.bf16.msrb.mxu0 %v9065_v20  ;;  %v3471_v43 = vpop.f32.mrf.mxu3  ;;  %v8966_v20 = vld [vmem:[#allocation11 + $0x430] sm:$0xf0] }
 0x261   :  { %5321 = vmatpush.bf16.msra.mxu2 %v8809_v34  ;;  %v3509_v34 = vadd.f32 %v11340_v61, %v11324_v41  ;;  %v8969_v36 = vor.u32 %v10550_v28, %v8966_v20  ;;  %v8556_v43 = vld [vmem:[#allocation11 + $0xe8] sm:$0xf]  ;;  %v8953_v61 = vor.u32 %v10546_v35, %v8950_v2  ;;  %v10530_v20 = vld [vmem:[#allocation11 + $0x384] sm:$0xf] }
 0x262   :  { %5284 = vmatpush.bf16.msrb.mxu3 %v9413_v55  ;;  %v9333_v55 = vor.u32 %v10644_v50, %v9332_v49  ;;  %v8889_v35 = vor.u32 %v10530_v20, %v8886_v30  ;;  %v10526_v2 = vld [vmem:[#allocation11 + $0x364] sm:$0xf]  ;;  %v8476_v49 = vld [vmem:[#allocation11 + $0x48] sm:$0xf]  ;;  %v10429_v50 = vld [vmem:[#allocation11 + $0x54] sm:$0xf0] }
 0x263   :  { %v10514_v20 = vld [vmem:[#allocation11 + $0x304] sm:$0xf]  ;;  %v8822_v30 = vld [vmem:[#allocation11 + $0x310] sm:$0xf0] }
 0x264   :  { %v3586_v6 = vpop.f32.mrf.mxu0  ;;  %5348 = vmatpush.bf16.msrb.mxu0 %v9049_v47  ;;  %v10449_v47 = vld [vmem:[#allocation11 + $0xf4] sm:$0xf0] }
 0x265   :  { %v3587_v10 = vadd.f32 %v3586_v6, %v1924_v62  ;;  %v3599_v25 = vpop.f32.mrf.mxu1  ;;  %5322 = vmatpush.bf16.msra.mxu2 %v8793_v7  ;;  %v10498_v62 = vld [vmem:[#allocation11 + $0x284] sm:$0xf]  ;;  %v9380_v6 = vld [vmem:[#allocation11 + $0x760] sm:$0xf]  ;;  %v8557_v0 = vor.u32 %v10449_v47, %v8556_v43 }
 0x266   :  { %v8761_v1 = vor.u32 %v10498_v62, %v8758_v17  ;;  %5285 = vmatpush.bf16.msrb.mxu3 %v9397_v63  ;;  %v9174_v62 = vld [vmem:[#allocation11 + $0x5d0] sm:$0xf0]  ;;  %v8540_v63 = vld [vmem:[#allocation11 + $0xc8] sm:$0xf]  ;;  %v10445_v17 = vld [vmem:[#allocation11 + $0xd4] sm:$0xf0] }
 0x267   :  { %v11345_v26 = vadd.f32 %v3599_v25, %v3587_v10  ;;  %v10494_v10 = vld [vmem:[#allocation11 + $0x264] sm:$0xf]  ;;  %v9381_v25 = vor.u32 %v10656_v9, %v9380_v6  ;;  %v9177_v6 = vor.u32 %v10602_v22, %v9174_v62  ;;  %v8541_v9 = vor.u32 %v10445_v17, %v8540_v63  ;;  %v8460_v22 = vld [vmem:[#allocation11 + $0x28] sm:$0xf]  ;;  %v8838_v17 = vld [vmem:[#allocation11 + $0x330] sm:$0xf0] }
 0x268   :  { %5349 = vmatpush.bf16.msrb.mxu0 %v9033_v57  ;;  %v8745_v11 = vor.u32 %v10494_v10, %v8742_v23  ;;  %v10598_v10 = vld [vmem:[#allocation11 + $0x5a4] sm:$0xf]  ;;  %v8524_v23 = vld [vmem:[#allocation11 + $0xa8] sm:$0xf] }
 0x269   :  { %5323 = vmatpush.bf16.msra.mxu2 %v8777_v19  ;;  %v10542_v19 = vld [vmem:[#allocation11 + $0x3e4] sm:$0xf] }
 0x26a   :  { %5286 = vmatpush.bf16.msrb.mxu3 %v9381_v25  ;;  %v9158_v25 = vld [vmem:[#allocation11 + $0x5b0] sm:$0xf0]  ;;  %v10586_v43 = vld [vmem:[#allocation11 + $0x544] sm:$0xf] }
 0x26b   :  { %v9161_v16 = vor.u32 %v10598_v10, %v9158_v25  ;;  %v10518_v63 = vld [vmem:[#allocation11 + $0x324] sm:$0xf]  ;;  %v9078_v10 = vld [vmem:[#allocation11 + $0x510] sm:$0xf0]  ;;  %v8444_v25 = vld [vmem:[#allocation11 + $0x8] sm:$0xf] }
 0x26c   :  { %v3588_v37 = vpop.f32.mrf.mxu0  ;;  %5350 = vmatpush.bf16.msrb.mxu0 %v9017_v3  ;;  %v10538_v3 = vld [vmem:[#allocation11 + $0x3c4] sm:$0xf] }
 0x26d   :  { %v3601_v45 = vpop.f32.mrf.mxu1  ;;  %5324 = vmatpush.bf16.msra.mxu2 %v8761_v1  ;;  %v10606_v37 = vld [vmem:[#allocation11 + $0x5e4] sm:$0xf]  ;;  %v8937_v1 = vor.u32 %v10542_v19, %v8934_v60  ;;  %v8921_v14 = vor.u32 %v10538_v3, %v8918_v59  ;;  %v10425_v19 = vld [vmem:[#allocation11 + $0x34] sm:$0xf0] }
 0x26e   :  { %5287 = vmatpush.bf16.msrb.mxu3 %v9365_v40  ;;  %v9190_v45 = vld [vmem:[#allocation11 + $0x5f0] sm:$0xf0]  ;;  %v8461_v59 = vor.u32 %v10425_v19, %v8460_v22  ;;  %v8636_v22 = vld [vmem:[#allocation11 + $0x188] sm:$0xf]  ;;  %v10469_v19 = vld [vmem:[#allocation11 + $0x194] sm:$0xf0] }
 0x26f   :  { %5303 = vmatmul.bf16.vlgmr.msra.gmra.mxu0 %v11307_v5  ;;  %v9193_v57 = vor.u32 %v10606_v37, %v9190_v45  ;;  %v8870_v37 = vld [vmem:[#allocation11 + $0x370] sm:$0xf0] }
 0x270   :  { %v11350_v29 = vpop.f32.mrf.mxu2  ;;  %5351 = vmatpush.bf16.msrb.mxu0 %v9001_v13  ;;  %v10441_v13 = vld [vmem:[#allocation11 + $0xb4] sm:$0xf0]  ;;  %v8873_v51 = vor.u32 %v10526_v2, %v8870_v37  ;;  %v9052_v2 = vld [vmem:[#allocation11 + $0x4c8] sm:$0xf] }
 0x271   :  { %5325 = vmatpush.bf16.msra.mxu2 %v8745_v11  ;;  %v8902_v11 = vld [vmem:[#allocation11 + $0x3b0] sm:$0xf0]  ;;  %v8525_v21 = vor.u32 %v10441_v13, %v8524_v23  ;;  %v3561_v62 = vadd.f32 %v11350_v29, %v11335_v27  ;;  %v10421_v23 = vld [vmem:[#allocation11 + $0x14] sm:$0xf0]  ;;  %v8841_v13 = vor.u32 %v10518_v63, %v8838_v17  ;;  %v8684_v27 = vld [vmem:[#allocation11 + $0x1e8] sm:$0xf]  ;;  %v8637_v17 = vor.u32 %v10469_v19, %v8636_v22 }
 0x272   :  { %5288 = vmatpush.bf16.msrb.mxu3 %v9349_v38  ;;  %v8905_v28 = vor.u32 %v10534_v15, %v8902_v11  ;;  %v10590_v38 = vld [vmem:[#allocation11 + $0x564] sm:$0xf]  ;;  %v10481_v29 = vld [vmem:[#allocation11 + $0x1f4] sm:$0xf0] }
 0x273   :  { %v10638_v11 = vld [vmem:[#allocation11 + $0x6e4] sm:$0xf]  ;;  %v10573_v37 = vld [vmem:[#allocation11 + $0x4d4] sm:$0xf0] }
 0x274   :  { %5352 = vmatpush.bf16.msrb.mxu0 %v8985_v48  ;;  %v10437_v48 = vld [vmem:[#allocation11 + $0x94] sm:$0xf0] }
 0x275   :  { %5326 = vmatpush.bf16.msra.mxu2 %v8729_v4  ;;  %v8508_v4 = vld [vmem:[#allocation11 + $0x88] sm:$0xf]  ;;  %v10565_v63 = vld [vmem:[#allocation11 + $0x494] sm:$0xf0] }
 0x276   :  { %5289 = vmatpush.bf16.msrb.mxu3 %v9333_v55  ;;  %v8509_v31 = vor.u32 %v10437_v48, %v8508_v4  ;;  %v8854_v55 = vld [vmem:[#allocation11 + $0x350] sm:$0xf0]  ;;  %v8445_v48 = vor.u32 %v10421_v23, %v8444_v25  ;;  %v10561_v25 = vld [vmem:[#allocation11 + $0x474] sm:$0xf0] }
 0x278   :  { %v3562_v52 = vpop.f32.mrf.mxu2  ;;  %5353 = vmatpush.bf16.msrb.mxu0 %v8969_v36  ;;  %v10433_v36 = vld [vmem:[#allocation11 + $0x74] sm:$0xf0] }
 0x279   :  { %5327 = vmatpush.bf16.msra.mxu2 %v8713_v39  ;;  %v3901_v39 = vld [vmem:[%s11521_s6] sm:$0xf]  ;;  %v10522_v52 = vld [vmem:[#allocation11 + $0x344] sm:$0xf] }
 0x27a   :  { %5334 = vmatpush.bf16.msra.mxu3 %v8937_v1  ;;  %v8857_v60 = vor.u32 %v10522_v52, %v8854_v55  ;;  %v9286_v52 = vld [vmem:[#allocation11 + $0x6b0] sm:$0xf0]  ;;  %v9036_v55 = vld [vmem:[#allocation11 + $0x4a8] sm:$0xf] }
 0x27c   :  { %v3521_v44 = vpop.f32.mrf.mxu3  ;;  %5354 = vmatpush.bf16.msrb.mxu0 %v8953_v61 }
 0x27d   :  { %v3522_v7 = vadd.f32 %v3521_v44, %v3509_v34  ;;  %5328 = vmatpush.bf16.msra.mxu2 %v8697_v56  ;;  %v8492_v34 = vld [vmem:[#allocation11 + $0x68] sm:$0xf]  ;;  %v9129_v44 = vor.u32 %v10590_v38, %v9126_v33  ;;  %v8477_v56 = vor.u32 %v10429_v50, %v8476_v49  ;;  %v10634_v33 = vld [vmem:[#allocation11 + $0x6c4] sm:$0xf] }
 0x27e   :  { %5335 = vmatpush.bf16.msra.mxu3 %v8921_v14  ;;  %v8493_v45 = vor.u32 %v10433_v36, %v8492_v34  ;;  %v8668_v34 = vld [vmem:[#allocation11 + $0x1c8] sm:$0xf]  ;;  %v10477_v36 = vld [vmem:[#allocation11 + $0x1d4] sm:$0xf0]  ;;  %v10630_v49 = vld [vmem:[#allocation11 + $0x6a4] sm:$0xf] }
 0x27f   :  { %v3634_v41 = vmax.f32 %v3522_v7, 0.0  ;;  %5355 = vmatmul.bf16.vlgmr.msrb.gmra.mxu0 %v11347_v32  ;;  %v9110_v7 = vld [vmem:[#allocation11 + $0x550] sm:$0xf0]  ;;  %v8652_v50 = vld [vmem:[#allocation11 + $0x1a8] sm:$0xf] }
 0x280   :  { %5399 = vmatpush.bf16.msra.mxu0 %v8557_v0  ;;  %v9113_v61 = vor.u32 %v10586_v43, %v9110_v7  ;;  %v9094_v0 = vld [vmem:[#allocation11 + $0x530] sm:$0xf0]  ;;  %v8669_v43 = vor.u32 %v10477_v36, %v8668_v34  ;;  %v9053_v7 = vor.u32 %v10573_v37, %v9052_v2  ;;  %v10553_v34 = vld [vmem:[#allocation11 + $0x434] sm:$0xf0]  ;;  %v8572_v37 = vld [vmem:[#allocation11 + $0x108] sm:$0xf] }
 0x281   :  { %v11355_v54 = vpack.c.bf16 %v3634_v41, %v3634_v41  ;;  %v3903_v41 = vperm.slane %v3901_v39, 0  ;;  %v8825_v39 = vor.u32 %v10514_v20, %v8822_v30  ;;  %v10614_v20 = vld [vmem:[#allocation11 + $0x624] sm:$0xf]  ;;  %v8588_v30 = vld [vmem:[#allocation11 + $0x128] sm:$0xf] }
 0x282   :  { %5336 = vmatpush.bf16.msra.mxu3 %v8905_v28  ;;  %v8685_v28 = vor.u32 %v10481_v29, %v8684_v27  ;;  %v8604_v27 = vld [vmem:[#allocation11 + $0x148] sm:$0xf]  ;;  %v10461_v29 = vld [vmem:[#allocation11 + $0x154] sm:$0xf0]  ;;  %v9206_v2 = vld [vmem:[#allocation11 + $0x610] sm:$0xf0] }
 0x283   :  { %5264 = vmatmul.bf16.vlgmr.msrb.gmra.mxu1 %v11355_v54 }
 0x284   :  { %5360 = vmatpush.bf16.msrb.mxu1 %v9193_v57  ;;  %v3523_v24 = vpop.f32.mrf.mxu3  ;;  %5400 = vmatpush.bf16.msra.mxu0 %v8541_v9  ;;  %v5200_v40 = vpop.f32.mrf.mxu0  ;;  %v10582_v57 = vld [vmem:[#allocation11 + $0x524] sm:$0xf] }
 0x285   :  { %v5201_v1 = vadd.f32 %v5200_v40, %v3903_v41  ;;  %v9097_v3 = vor.u32 %v10582_v57, %v9094_v0  ;;  %v10578_v24 = vld [vmem:[#allocation11 + $0x504] sm:$0xf]  ;;  %v10577_v40 = vld [vmem:[#allocation11 + $0x4f4] sm:$0xf0] }
 0x286   :  { %5337 = vmatpush.bf16.msra.mxu3 %v8889_v35  ;;  %v9081_v4 = vor.u32 %v10578_v24, %v9078_v10  ;;  %v9069_v38 = vor.u32 %v10577_v40, %v9068_v18  ;;  %v9302_v35 = vld [vmem:[#allocation11 + $0x6d0] sm:$0xf0]  ;;  %v10569_v41 = vld [vmem:[#allocation11 + $0x4b4] sm:$0xf0]  ;;  %v10626_v0 = vld [vmem:[#allocation11 + $0x684] sm:$0xf] }
 0x287   :  { %v9037_v57 = vor.u32 %v10569_v41, %v9036_v55  ;;  %v8620_v24 = vld [vmem:[#allocation11 + $0x168] sm:$0xf]  ;;  %v10557_v18 = vld [vmem:[#allocation11 + $0x454] sm:$0xf0] }
 0x288   :  { %5361 = vmatpush.bf16.msrb.mxu1 %v9177_v6  ;;  %5401 = vmatpush.bf16.msra.mxu0 %v8525_v21  ;;  %v9318_v21 = vld [vmem:[#allocation11 + $0x6f0] sm:$0xf0]  ;;  %v9004_v10 = vld [vmem:[#allocation11 + $0x468] sm:$0xf]  ;;  %v10513_v41 = vld [vmem:[#allocation11 + $0x2f4] sm:$0xf0] }
 0x28a   :  { %5338 = vmatpush.bf16.msra.mxu3 %v8873_v51  ;;  %v5213_v9 = vpop.f32.mrf.mxu1  ;;  %v10473_v51 = vld [vmem:[#allocation11 + $0x1b4] sm:$0xf0] }
 0x28b   :  { %v11367_v15 = vadd.f32 %v5213_v9, %v5201_v1  ;;  %v9254_v9 = vld [vmem:[#allocation11 + $0x670] sm:$0xf0] }
 0x28c   :  { %5362 = vmatpush.bf16.msrb.mxu1 %v9161_v16  ;;  %5402 = vmatpush.bf16.msra.mxu0 %v8509_v31  ;;  %v5202_v47 = vpop.f32.mrf.mxu0  ;;  %v9321_v31 = vor.u32 %v10638_v11, %v9318_v21  ;;  %v10618_v11 = vld [vmem:[#allocation11 + $0x644] sm:$0xf]  ;;  %v8988_v21 = vld [vmem:[#allocation11 + $0x448] sm:$0xf] }
 0x28d   :  { %v9305_v47 = vor.u32 %v10634_v33, %v9302_v35  ;;  %v8972_v33 = vld [vmem:[#allocation11 + $0x428] sm:$0xf]  ;;  %v10610_v35 = vld [vmem:[#allocation11 + $0x604] sm:$0xf] }
 0x28e   :  { %5339 = vmatpush.bf16.msra.mxu3 %v8857_v60  ;;  %v9270_v60 = vld [vmem:[#allocation11 + $0x690] sm:$0xf0]  ;;  %v9209_v22 = vor.u32 %v10610_v35, %v9206_v2  ;;  %v10501_v35 = vld [vmem:[#allocation11 + $0x294] sm:$0xf0]  ;;  %v9148_v2 = vld [vmem:[#allocation11 + $0x588] sm:$0xf] }
 0x28f   :  { %v9273_v1 = vor.u32 %v10626_v0, %v9270_v60  ;;  %v8558_v0 = vld [vmem:[#allocation11 + $0xf8] sm:$0xf0] }
 0x290   :  { %5363 = vmatpush.bf16.msrb.mxu1 %v9145_v12  ;;  %v11362_v46 = vpop.f32.mrf.mxu2  ;;  %5403 = vmatpush.bf16.msra.mxu0 %v8493_v45 }
 0x291   :  { %v3613_v36 = vadd.f32 %v11362_v46, %v11345_v26  ;;  %v9196_v26 = vld [vmem:[#allocation11 + $0x5e8] sm:$0xf]  ;;  %v10609_v46 = vld [vmem:[#allocation11 + $0x5f4] sm:$0xf0] }
 0x292   :  { %5340 = vmatpush.bf16.msra.mxu3 %v8841_v13  ;;  %v5215_v45 = vpop.f32.mrf.mxu1 }
 0x293   :  { %5316 = vmatmul.bf16.vlgmr.msra.gmra.mxu1 %v11314_v58  ;;  %v8973_v45 = vor.u32 %v10553_v34, %v8972_v33  ;;  %v9398_v33 = vld [vmem:[#allocation11 + $0x790] sm:$0xf0] }
 0x294   :  { %5364 = vmatpush.bf16.msrb.mxu1 %v9129_v44  ;;  %5404 = vmatpush.bf16.msra.mxu0 %v8477_v56  ;;  %v9289_v56 = vor.u32 %v10630_v49, %v9286_v52  ;;  %v8812_v52 = vld [vmem:[#allocation11 + $0x2e8] sm:$0xf] }
 0x296   :  { %5341 = vmatpush.bf16.msra.mxu3 %v8825_v39 }
 0x298   :  { %5365 = vmatpush.bf16.msrb.mxu1 %v9113_v61  ;;  %v3614_v16 = vpop.f32.mrf.mxu2  ;;  %5405 = vmatpush.bf16.msra.mxu0 %v8461_v59  ;;  %v8653_v61 = vor.u32 %v10473_v51, %v8652_v50  ;;  %v10622_v59 = vld [vmem:[#allocation11 + $0x664] sm:$0xf]  ;;  %v9446_v51 = vld [vmem:[#allocation11 + $0x7f0] sm:$0xf0] }
 0x299   :  { %v9257_v13 = vor.u32 %v10622_v59, %v9254_v9  ;;  %v9238_v16 = vld [vmem:[#allocation11 + $0x650] sm:$0xf0]  ;;  %v10670_v50 = vld [vmem:[#allocation11 + $0x7e4] sm:$0xf]  ;;  %v9180_v9 = vld [vmem:[#allocation11 + $0x5c8] sm:$0xf] }
 0x29c   :  { %v3573_v6 = vpop.f32.mrf.mxu3  ;;  %5366 = vmatpush.bf16.msrb.mxu1 %v9097_v3  ;;  %5406 = vmatpush.bf16.msra.mxu0 %v8445_v48  ;;  %v9241_v48 = vor.u32 %v10618_v11, %v9238_v16 }
 0x29d   :  { %v3574_v14 = vadd.f32 %v3573_v6, %v3561_v62  ;;  %v9020_v62 = vld [vmem:[#allocation11 + $0x488] sm:$0xf]  ;;  %v10465_v6 = vld [vmem:[#allocation11 + $0x174] sm:$0xf0] }
 0x29e   :  { %v9021_v3 = vor.u32 %v10565_v63, %v9020_v62  ;;  %v8621_v23 = vor.u32 %v10465_v6, %v8620_v24  ;;  %v9449_v62 = vor.u32 %v10670_v50, %v9446_v51  ;;  %v8813_v63 = vor.u32 %v10513_v41, %v8812_v52  ;;  %v8796_v24 = vld [vmem:[#allocation11 + $0x2c8] sm:$0xf]  ;;  %v10509_v6 = vld [vmem:[#allocation11 + $0x2d4] sm:$0xf0] }
 0x29f   :  { %v3635_v8 = vmax.f32 %v3574_v14, 0.0  ;;  %5407 = vmatmul.bf16.vlgmr.msra.gmra.mxu0 %v11307_v5  ;;  %v9005_v14 = vor.u32 %v10561_v25, %v9004_v10  ;;  %v10605_v10 = vld [vmem:[#allocation11 + $0x5d4] sm:$0xf0]  ;;  %v10443_v25 = vld [vmem:[#allocation11 + $0xcc] sm:$0xf]  ;;  %v8797_v11 = vor.u32 %v10509_v6, %v8796_v24 }
 0x2a0   :  { %5367 = vmatpush.bf16.msrb.mxu1 %v9081_v4  ;;  %5451 = vmatpush.bf16.msrb.mxu0 %v9069_v38  ;;  %v8605_v4 = vor.u32 %v10461_v29, %v8604_v27  ;;  %v9222_v38 = vld [vmem:[#allocation11 + $0x630] sm:$0xf0]  ;;  %v10662_v27 = vld [vmem:[#allocation11 + $0x7a4] sm:$0xf]  ;;  %v9181_v16 = vor.u32 %v10605_v10, %v9180_v9  ;;  %v8748_v51 = vld [vmem:[#allocation11 + $0x268] sm:$0xf] }
 0x2a1   :  { %v11369_v12 = vpack.c.bf16 %v3635_v8, %v3635_v8  ;;  %v9414_v29 = vld [vmem:[#allocation11 + $0x7b0] sm:$0xf0]  ;;  %v10497_v52 = vld [vmem:[#allocation11 + $0x274] sm:$0xf0]  ;;  %v10646_v9 = vld [vmem:[#allocation11 + $0x724] sm:$0xf] }
 0x2a2   :  { %v10593_v41 = vld [vmem:[#allocation11 + $0x574] sm:$0xf0]  ;;  %v9350_v10 = vld [vmem:[#allocation11 + $0x730] sm:$0xf0] }
 0x2a3   :  { %5277 = vmatmul.bf16.vlgmr.msrb.gmra.mxu2 %v11369_v12  ;;  %5368 = vmatmul.bf16.vlgmr.msrb.gmra.mxu1 %v11355_v54 }
 0x2a4   :  { %5412 = vmatpush.bf16.msra.mxu1 %v8685_v28  ;;  %v3575_v44 = vpop.f32.mrf.mxu3  ;;  %5373 = vmatpush.bf16.msrb.mxu2 %v9321_v31  ;;  %v8989_v28 = vor.u32 %v10557_v18, %v8988_v21  ;;  %v10457_v31 = vld [vmem:[#allocation11 + $0x134] sm:$0xf0]  ;;  %v8780_v18 = vld [vmem:[#allocation11 + $0x2a8] sm:$0xf] }
 0x2a5   :  { %5452 = vmatpush.bf16.msrb.mxu0 %v9053_v7  ;;  %v9225_v44 = vor.u32 %v10614_v20, %v9222_v38  ;;  %v10549_v7 = vld [vmem:[#allocation11 + $0x414] sm:$0xf0]  ;;  %v8526_v20 = vld [vmem:[#allocation11 + $0xb8] sm:$0xf0]  ;;  %v10658_v38 = vld [vmem:[#allocation11 + $0x784] sm:$0xf] }
 0x2a8   :  { %5413 = vmatpush.bf16.msra.mxu1 %v8669_v43  ;;  %5374 = vmatpush.bf16.msrb.mxu2 %v9305_v47  ;;  %v10453_v43 = vld [vmem:[#allocation11 + $0x114] sm:$0xf0]  ;;  %v8956_v47 = vld [vmem:[#allocation11 + $0x408] sm:$0xf] }
 0x2a9   :  { %5453 = vmatpush.bf16.msrb.mxu0 %v9037_v57  ;;  %v10447_v57 = vld [vmem:[#allocation11 + $0xec] sm:$0xf]  ;;  %v8957_v19 = vor.u32 %v10549_v7, %v8956_v47  ;;  %v10654_v47 = vld [vmem:[#allocation11 + $0x764] sm:$0xf]  ;;  %v9382_v7 = vld [vmem:[#allocation11 + $0x770] sm:$0xf0] }
 0x2aa   :  { %v8561_v59 = vor.u32 %v10447_v57, %v8558_v0  ;;  %v10650_v57 = vld [vmem:[#allocation11 + $0x744] sm:$0xf]  ;;  %v9366_v0 = vld [vmem:[#allocation11 + $0x750] sm:$0xf0] }
 0x2ab   :  { %v9369_v24 = vor.u32 %v10650_v57, %v9366_v0  ;;  %v10475_v57 = vld [vmem:[#allocation11 + $0x1cc] sm:$0xf] }
 0x2ac   :  { %5414 = vmatpush.bf16.msra.mxu1 %v8653_v61  ;;  %5375 = vmatpush.bf16.msrb.mxu2 %v9289_v56  ;;  %v8573_v56 = vor.u32 %v10453_v43, %v8572_v37  ;;  %v10597_v37 = vld [vmem:[#allocation11 + $0x594] sm:$0xf0] }
 0x2ad   :  { %5454 = vmatpush.bf16.msrb.mxu0 %v9021_v3  ;;  %v9197_v3 = vor.u32 %v10609_v46, %v9196_v26  ;;  %v10431_v26 = vld [vmem:[#allocation11 + $0x6c] sm:$0xf]  ;;  %v8494_v46 = vld [vmem:[#allocation11 + $0x78] sm:$0xf0] }
 0x2b0   :  { %5415 = vmatpush.bf16.msra.mxu1 %v8637_v17  ;;  %5376 = vmatpush.bf16.msrb.mxu2 %v9273_v1  ;;  %v5226_v40 = vpop.f32.mrf.mxu2  ;;  %v10666_v17 = vld [vmem:[#allocation11 + $0x7c4] sm:$0xf]  ;;  %v9430_v1 = vld [vmem:[#allocation11 + $0x7d0] sm:$0xf0] }
 0x2b1   :  { %v11375_v8 = vadd.f32 %v5226_v40, %v11367_v15  ;;  %5455 = vmatpush.bf16.msrb.mxu0 %v9005_v14  ;;  %v8589_v15 = vor.u32 %v10457_v31, %v8588_v30  ;;  %v9433_v14 = vor.u32 %v10666_v17, %v9430_v1  ;;  %v10505_v40 = vld [vmem:[#allocation11 + $0x2b4] sm:$0xf0]  ;;  %v9417_v30 = vor.u32 %v10662_v27, %v9414_v29  ;;  %v9116_v17 = vld [vmem:[#allocation11 + $0x548] sm:$0xf]  ;;  %v10423_v29 = vld [vmem:[#allocation11 + $0x2c] sm:$0xf] }
 0x2b2   :  { %v8781_v31 = vor.u32 %v10505_v40, %v8780_v18  ;;  %v10589_v1 = vld [vmem:[#allocation11 + $0x554] sm:$0xf0]  ;;  %v9353_v40 = vor.u32 %v10646_v9, %v9350_v10  ;;  %v10471_v10 = vld [vmem:[#allocation11 + $0x1ac] sm:$0xf] }
 0x2b3   :  { %5329 = vmatmul.bf16.vlgmr.msra.gmra.mxu2 %v11326_v53  ;;  %v10585_v27 = vld [vmem:[#allocation11 + $0x534] sm:$0xf0] }
 0x2b4   :  { %5416 = vmatpush.bf16.msra.mxu1 %v8621_v23  ;;  %5377 = vmatpush.bf16.msrb.mxu2 %v9257_v13  ;;  %v8542_v23 = vld [vmem:[#allocation11 + $0xd8] sm:$0xf0]  ;;  %v10633_v9 = vld [vmem:[#allocation11 + $0x6b4] sm:$0xf0] }
 0x2b5   :  { %5456 = vmatpush.bf16.msrb.mxu0 %v8989_v28  ;;  %v8545_v21 = vor.u32 %v10443_v25, %v8542_v23  ;;  %v10439_v28 = vld [vmem:[#allocation11 + $0xac] sm:$0xf]  ;;  %v9117_v25 = vor.u32 %v10589_v1, %v9116_v17  ;;  %v8908_v1 = vld [vmem:[#allocation11 + $0x3a8] sm:$0xf] }
 0x2b8   :  { %5417 = vmatpush.bf16.msra.mxu1 %v8605_v4  ;;  %5378 = vmatpush.bf16.msrb.mxu2 %v9241_v48  ;;  %v5228_v55 = vpop.f32.mrf.mxu2  ;;  %v9164_v4 = vld [vmem:[#allocation11 + $0x5a8] sm:$0xf]  ;;  %v10601_v48 = vld [vmem:[#allocation11 + $0x5b4] sm:$0xf0] }
 0x2b9   :  { %5457 = vmatpush.bf16.msrb.mxu0 %v8973_v45  ;;  %v9165_v34 = vor.u32 %v10601_v48, %v9164_v4  ;;  %v9401_v45 = vor.u32 %v10658_v38, %v9398_v33  ;;  %v9132_v55 = vld [vmem:[#allocation11 + $0x568] sm:$0xf]  ;;  %v9334_v48 = vld [vmem:[#allocation11 + $0x710] sm:$0xf0] }
 0x2ba   :  { %v9084_v33 = vld [vmem:[#allocation11 + $0x508] sm:$0xf] }
 0x2bc   :  { %v3625_v39 = vpop.f32.mrf.mxu3  ;;  %5418 = vmatpush.bf16.msra.mxu1 %v8589_v15  ;;  %5379 = vmatpush.bf16.msrb.mxu2 %v9225_v44  ;;  %v8764_v15 = vld [vmem:[#allocation11 + $0x288] sm:$0xf]  ;;  %v8510_v44 = vld [vmem:[#allocation11 + $0x98] sm:$0xf0] }
 0x2bd   :  { %v3626_v49 = vadd.f32 %v3625_v39, %v3613_v36  ;;  %5458 = vmatpush.bf16.msrb.mxu0 %v8957_v19  ;;  %v8529_v36 = vor.u32 %v10439_v28, %v8526_v20  ;;  %v10435_v39 = vld [vmem:[#allocation11 + $0x8c] sm:$0xf]  ;;  %v8765_v43 = vor.u32 %v10501_v35, %v8764_v15  ;;  %v8497_v19 = vor.u32 %v10431_v26, %v8494_v46  ;;  %v8700_v28 = vld [vmem:[#allocation11 + $0x208] sm:$0xf]  ;;  %v10485_v20 = vld [vmem:[#allocation11 + $0x214] sm:$0xf0] }
 0x2be   :  { %v8513_v50 = vor.u32 %v10435_v39, %v8510_v44  ;;  %v8446_v15 = vld [vmem:[#allocation11 + $0x18] sm:$0xf0]  ;;  %v8940_v35 = vld [vmem:[#allocation11 + $0x3e8] sm:$0xf]  ;;  %v10641_v39 = vld [vmem:[#allocation11 + $0x6f4] sm:$0xf0] }
 0x2bf   :  { %v3636_v61 = vmax.f32 %v3626_v49, 0.0  ;;  %v9149_v49 = vor.u32 %v10597_v37, %v9148_v2  ;;  %v10545_v2 = vld [vmem:[#allocation11 + $0x3f4] sm:$0xf0]  ;;  %v9324_v37 = vld [vmem:[#allocation11 + $0x6e8] sm:$0xf] }
 0x2c0   :  { %5419 = vmatpush.bf16.msra.mxu1 %v8573_v56  ;;  %5380 = vmatpush.bf16.msrb.mxu2 %v9209_v22  ;;  %v8749_v56 = vor.u32 %v10497_v52, %v8748_v51  ;;  %v9133_v22 = vor.u32 %v10593_v41, %v9132_v55  ;;  %v10479_v44 = vld [vmem:[#allocation11 + $0x1ec] sm:$0xf]  ;;  %v8941_v51 = vor.u32 %v10545_v2, %v8940_v35  ;;  %v8924_v55 = vld [vmem:[#allocation11 + $0x3c8] sm:$0xf]  ;;  %v10541_v41 = vld [vmem:[#allocation11 + $0x3d4] sm:$0xf0] }
 0x2c1   :  { %v11380_v60 = vpack.c.bf16 %v3636_v61, %v3636_v61  ;;  %5503 = vmatpush.bf16.msra.mxu0 %v8561_v59  ;;  %v9385_v61 = vor.u32 %v10654_v47, %v9382_v7  ;;  %v8478_v59 = vld [vmem:[#allocation11 + $0x58] sm:$0xf0]  ;;  %v10575_v7 = vld [vmem:[#allocation11 + $0x4ec] sm:$0xf]  ;;  %v9325_v52 = vor.u32 %v10641_v39, %v9324_v37  ;;  %v9260_v2 = vld [vmem:[#allocation11 + $0x668] sm:$0xf] }
 0x2c2   :  { %5459 = vmatmul.bf16.vlgmr.msrb.gmra.mxu0 %v11347_v32  ;;  %v8686_v47 = vld [vmem:[#allocation11 + $0x1f8] sm:$0xf0]  ;;  %v10625_v37 = vld [vmem:[#allocation11 + $0x674] sm:$0xf0]  ;;  %v10463_v39 = vld [vmem:[#allocation11 + $0x16c] sm:$0xf] }
 0x2c3   :  { %5290 = vmatmul.bf16.vlgmr.msrb.gmra.mxu3 %v11380_v60  ;;  %5420 = vmatmul.bf16.vlgmr.msra.gmra.mxu1 %v11314_v58  ;;  %v8689_v26 = vor.u32 %v10479_v44, %v8686_v47  ;;  %v8622_v44 = vld [vmem:[#allocation11 + $0x178] sm:$0xf0]  ;;  %v9261_v47 = vor.u32 %v10625_v37, %v9260_v2  ;;  %v9436_v2 = vld [vmem:[#allocation11 + $0x7c8] sm:$0xf]  ;;  %v10669_v37 = vld [vmem:[#allocation11 + $0x7d4] sm:$0xf0] }
 0x2c4   :  { %v3627_v13 = vpop.f32.mrf.mxu3  ;;  %5386 = vmatpush.bf16.msrb.mxu3 %v9449_v62  ;;  %5425 = vmatpush.bf16.msra.mxu2 %v8813_v63  ;;  %v8732_v62 = vld [vmem:[#allocation11 + $0x248] sm:$0xf]  ;;  %v10493_v63 = vld [vmem:[#allocation11 + $0x254] sm:$0xf0] }
 0x2c5   :  { %5464 = vmatpush.bf16.msrb.mxu1 %v9197_v3  ;;  %5381 = vmatmul.bf16.vlgmr.msrb.gmra.mxu2 %v11369_v12  ;;  %v10427_v3 = vld [vmem:[#allocation11 + $0x4c] sm:$0xf]  ;;  %v8733_v6 = vor.u32 %v10493_v63, %v8732_v62  ;;  %v8716_v13 = vld [vmem:[#allocation11 + $0x228] sm:$0xf]  ;;  %v9054_v62 = vld [vmem:[#allocation11 + $0x4d8] sm:$0xf0]  ;;  %v8925_v63 = vor.u32 %v10541_v41, %v8924_v55 }
 0x2c6   :  { %5504 = vmatpush.bf16.msra.mxu0 %v8545_v21  ;;  %v8481_v23 = vor.u32 %v10427_v3, %v8478_v59  ;;  %v10642_v21 = vld [vmem:[#allocation11 + $0x704] sm:$0xf]  ;;  %v10537_v3 = vld [vmem:[#allocation11 + $0x3b4] sm:$0xf0]  ;;  %v10459_v55 = vld [vmem:[#allocation11 + $0x14c] sm:$0xf] }
 0x2c8   :  { %5387 = vmatpush.bf16.msrb.mxu3 %v9433_v14  ;;  %5426 = vmatpush.bf16.msra.mxu2 %v8797_v11  ;;  %v10489_v14 = vld [vmem:[#allocation11 + $0x234] sm:$0xf0]  ;;  %v9100_v11 = vld [vmem:[#allocation11 + $0x528] sm:$0xf] }
 0x2c9   :  { %5465 = vmatpush.bf16.msrb.mxu1 %v9181_v16  ;;  %v8462_v16 = vld [vmem:[#allocation11 + $0x38] sm:$0xf0]  ;;  %v8717_v4 = vor.u32 %v10489_v14, %v8716_v13  ;;  %v8909_v14 = vor.u32 %v10537_v3, %v8908_v1  ;;  %v10455_v1 = vld [vmem:[#allocation11 + $0x12c] sm:$0xf] }
 0x2ca   :  { %5505 = vmatpush.bf16.msra.mxu0 %v8529_v36  ;;  %v8465_v38 = vor.u32 %v10423_v29, %v8462_v16  ;;  %v10419_v36 = vld [vmem:[#allocation11 + $0xc] sm:$0xf]  ;;  %v9038_v13 = vld [vmem:[#allocation11 + $0x4b8] sm:$0xf0]  ;;  %v10533_v29 = vld [vmem:[#allocation11 + $0x394] sm:$0xf0] }
 0x2cb   :  { %v8590_v3 = vld [vmem:[#allocation11 + $0x138] sm:$0xf0] }
 0x2cc   :  { %5388 = vmatpush.bf16.msrb.mxu3 %v9417_v30  ;;  %5427 = vmatpush.bf16.msra.mxu2 %v8781_v31  ;;  %v9101_v31 = vor.u32 %v10585_v27, %v9100_v11  ;;  %v8892_v27 = vld [vmem:[#allocation11 + $0x388] sm:$0xf] }
 0x2cd   :  { %5466 = vmatpush.bf16.msrb.mxu1 %v9165_v34  ;;  %v10581_v34 = vld [vmem:[#allocation11 + $0x514] sm:$0xf0] }
 0x2ce   :  { %5506 = vmatpush.bf16.msra.mxu0 %v8513_v50  ;;  %v8449_v50 = vor.u32 %v10419_v36, %v8446_v15  ;;  %v10529_v36 = vld [vmem:[#allocation11 + $0x374] sm:$0xf0] }
 0x2d0   :  { %5389 = vmatpush.bf16.msrb.mxu3 %v9401_v45  ;;  %5428 = vmatpush.bf16.msra.mxu2 %v8765_v43  ;;  %v9337_v45 = vor.u32 %v10642_v21, %v9334_v48  ;;  %v8701_v43 = vor.u32 %v10485_v20, %v8700_v28  ;;  %v8638_v28 = vld [vmem:[#allocation11 + $0x198] sm:$0xf0]  ;;  %v10563_v20 = vld [vmem:[#allocation11 + $0x48c] sm:$0xf] }
 0x2d1   :  { %5467 = vmatpush.bf16.msrb.mxu1 %v9149_v49  ;;  %v9070_v49 = vld [vmem:[#allocation11 + $0x4f8] sm:$0xf0] }
 0x2d2   :  { %5507 = vmatpush.bf16.msra.mxu0 %v8497_v19  ;;  %v9073_v46 = vor.u32 %v10575_v7, %v9070_v49  ;;  %v10571_v19 = vld [vmem:[#allocation11 + $0x4cc] sm:$0xf]  ;;  %v8860_v7 = vld [vmem:[#allocation11 + $0x348] sm:$0xf]  ;;  %v10525_v49 = vld [vmem:[#allocation11 + $0x354] sm:$0xf0] }
 0x2d3   :  { %5342 = vmatmul.bf16.vlgmr.msra.gmra.mxu3 %v11337_v42 }
 0x2d4   :  { %5390 = vmatpush.bf16.msrb.mxu3 %v9385_v61  ;;  %5429 = vmatpush.bf16.msra.mxu2 %v8749_v56  ;;  %v9308_v61 = vld [vmem:[#allocation11 + $0x6c8] sm:$0xf]  ;;  %v10637_v56 = vld [vmem:[#allocation11 + $0x6d4] sm:$0xf0] }
 0x2d5   :  { %5468 = vmatpush.bf16.msrb.mxu1 %v9133_v22  ;;  %v8670_v22 = vld [vmem:[#allocation11 + $0x1d8] sm:$0xf0]  ;;  %v9309_v17 = vor.u32 %v10637_v56, %v9308_v61  ;;  %v8861_v56 = vor.u32 %v10525_v49, %v8860_v7  ;;  %v10704_v7 = vld [vmem:[#allocation13 + $0xec] sm:$0xf0] }
 0x2d6   :  { %5508 = vmatpush.bf16.msra.mxu0 %v8481_v23  ;;  %v8673_v59 = vor.u32 %v10475_v57, %v8670_v22  ;;  %v10567_v23 = vld [vmem:[#allocation11 + $0x4ac] sm:$0xf]  ;;  %v8990_v61 = vld [vmem:[#allocation11 + $0x458] sm:$0xf0]  ;;  %v10521_v22 = vld [vmem:[#allocation11 + $0x334] sm:$0xf0] }
 0x2d7   :  { %v9041_v21 = vor.u32 %v10567_v23, %v9038_v13  ;;  %v9212_v23 = vld [vmem:[#allocation11 + $0x608] sm:$0xf]  ;;  %v8593_v13 = vor.u32 %v10455_v1, %v8590_v3  ;;  %v10499_v3 = vld [vmem:[#allocation11 + $0x28c] sm:$0xf] }
 0x2d8   :  { %5391 = vmatpush.bf16.msrb.mxu3 %v9369_v24  ;;  %5430 = vmatpush.bf16.msra.mxu2 %v8733_v6  ;;  %v9057_v24 = vor.u32 %v10571_v19, %v9054_v62  ;;  %v9292_v6 = vld [vmem:[#allocation11 + $0x6a8] sm:$0xf] }
 0x2d9   :  { %5469 = vmatpush.bf16.msrb.mxu1 %v9117_v25  ;;  %v8654_v25 = vld [vmem:[#allocation11 + $0x1b8] sm:$0xf0]  ;;  %v9293_v11 = vor.u32 %v10633_v9, %v9292_v6 }
 0x2da   :  { %5509 = vmatpush.bf16.msra.mxu0 %v8465_v38  ;;  %v8657_v16 = vor.u32 %v10471_v10, %v8654_v25  ;;  %v8893_v38 = vor.u32 %v10533_v29, %v8892_v27  ;;  %v8828_v10 = vld [vmem:[#allocation11 + $0x308] sm:$0xf]  ;;  %v10517_v25 = vld [vmem:[#allocation11 + $0x314] sm:$0xf0]  ;;  %v10451_v27 = vld [vmem:[#allocation11 + $0x10c] sm:$0xf] }
 0x2db   :  { %v8574_v29 = vld [vmem:[#allocation11 + $0x118] sm:$0xf0] }
 0x2dc   :  { %v5239_v18 = vpop.f32.mrf.mxu3  ;;  %5392 = vmatpush.bf16.msrb.mxu3 %v9353_v40  ;;  %5431 = vmatpush.bf16.msra.mxu2 %v8717_v4  ;;  %v10629_v40 = vld [vmem:[#allocation11 + $0x694] sm:$0xf0]  ;;  %v10467_v4 = vld [vmem:[#allocation11 + $0x18c] sm:$0xf]  ;;  %v5252_v48 = vpop.f32.mrf.mxu0 }
 0x2dd   :  { %v11388_v30 = vadd.f32 %v5239_v18, %v11375_v8  ;;  %5470 = vmatpush.bf16.msrb.mxu1 %v9101_v31  ;;  %v9085_v8 = vor.u32 %v10581_v34, %v9084_v33  ;;  %v9276_v18 = vld [vmem:[#allocation11 + $0x688] sm:$0xf]  ;;  %v9022_v31 = vld [vmem:[#allocation11 + $0x498] sm:$0xf0]  ;;  %v8641_v15 = vor.u32 %v10467_v4, %v8638_v28  ;;  %v10673_v4 = vld [vmem:[#allocation11 + $0x7f4] sm:$0xf0] }
 0x2de   :  { %5510 = vmatpush.bf16.msra.mxu0 %v8449_v50  ;;  %v9277_v33 = vor.u32 %v10629_v40, %v9276_v18  ;;  %v8876_v34 = vld [vmem:[#allocation11 + $0x368] sm:$0xf]  ;;  %v9025_v35 = vor.u32 %v10563_v20, %v9022_v31  ;;  %v8958_v18 = vld [vmem:[#allocation11 + $0x418] sm:$0xf0]  ;;  %v8829_v20 = vor.u32 %v10517_v25, %v8828_v10  ;;  %v10696_v10 = vld [vmem:[#allocation13 + $0xac] sm:$0xf0] }
 0x2df   :  { %v9452_v40 = vld [vmem:[#allocation11 + $0x7e8] sm:$0xf]  ;;  %v8814_v28 = vld [vmem:[#allocation11 + $0x2f8] sm:$0xf0] }
 0x2e0   :  { %5393 = vmatpush.bf16.msrb.mxu3 %v9337_v45  ;;  %5432 = vmatpush.bf16.msra.mxu2 %v8701_v43  ;;  %v10559_v45 = vld [vmem:[#allocation11 + $0x46c] sm:$0xf]  ;;  %v9006_v43 = vld [vmem:[#allocation11 + $0x478] sm:$0xf0] }
 0x2e1   :  { %5471 = vmatpush.bf16.msrb.mxu1 %v9085_v8  ;;  %5511 = vmatmul.bf16.vlgmr.msra.gmra.mxu0 %v11307_v5  ;;  %v11395_v5 = vadd.f32 %v5252_v48, %v11388_v30  ;;  %v8877_v30 = vor.u32 %v10529_v36, %v8876_v34  ;;  %v8625_v8 = vor.u32 %v10463_v39, %v8622_v44  ;;  %v10511_v48 = vld [vmem:[#allocation11 + $0x2ec] sm:$0xf] }
 0x2e2   :  { %5555 = vmatpush.bf16.msrb.mxu0 %v9073_v46  ;;  %v9009_v50 = vor.u32 %v10559_v45, %v9006_v43  ;;  %v10555_v46 = vld [vmem:[#allocation11 + $0x44c] sm:$0xf]  ;;  %v8577_v34 = vor.u32 %v10451_v27, %v8574_v29  ;;  %v8798_v45 = vld [vmem:[#allocation11 + $0x2d8] sm:$0xf0] }
 0x2e3   :  { %5433 = vmatmul.bf16.vlgmr.msra.gmra.mxu2 %v11326_v53  ;;  %5394 = vmatmul.bf16.vlgmr.msrb.gmra.mxu3 %v11380_v60  ;;  %v8993_v62 = vor.u32 %v10555_v46, %v8990_v61  ;;  %v10507_v44 = vld [vmem:[#allocation11 + $0x2cc] sm:$0xf]  ;;  %v8750_v29 = vld [vmem:[#allocation11 + $0x278] sm:$0xf0] }
 0x2e4   :  { %v5241_v0 = vpop.f32.mrf.mxu3  ;;  %5438 = vmatpush.bf16.msra.mxu3 %v8941_v51  ;;  %5477 = vmatpush.bf16.msrb.mxu2 %v9325_v52  ;;  %v9244_v51 = vld [vmem:[#allocation11 + $0x648] sm:$0xf]  ;;  %v10621_v52 = vld [vmem:[#allocation11 + $0x654] sm:$0xf0]  ;;  %v5254_v41 = vpop.f32.mrf.mxu0  ;;  %v10603_v43 = vld [vmem:[#allocation11 + $0x5cc] sm:$0xf] }
 0x2e5   :  { %5516 = vmatpush.bf16.msra.mxu1 %v8689_v26  ;;  %v8606_v26 = vld [vmem:[#allocation11 + $0x158] sm:$0xf0]  ;;  %v9245_v57 = vor.u32 %v10621_v52, %v9244_v51  ;;  %v8844_v0 = vld [vmem:[#allocation11 + $0x328] sm:$0xf]  ;;  %v10665_v52 = vld [vmem:[#allocation11 + $0x7b4] sm:$0xf0] }
 0x2e6   :  { %5472 = vmatmul.bf16.vlgmr.msrb.gmra.mxu1 %v11355_v54  ;;  %5556 = vmatpush.bf16.msrb.mxu0 %v9057_v24  ;;  %v8609_v19 = vor.u32 %v10459_v55, %v8606_v26  ;;  %v8974_v24 = vld [vmem:[#allocation11 + $0x438] sm:$0xf0]  ;;  %v8845_v6 = vor.u32 %v10521_v22, %v8844_v0  ;;  %v9420_v51 = vld [vmem:[#allocation11 + $0x7a8] sm:$0xf]  ;;  %v10503_v41 = vld [vmem:[#allocation11 + $0x2ac] sm:$0xf] }
 0x2e7   :  { %v8782_v26 = vld [vmem:[#allocation11 + $0x2b8] sm:$0xf0]  ;;  %v10599_v46 = vld [vmem:[#allocation11 + $0x5ac] sm:$0xf]  ;;  %v10700_v0 = vld [vmem:[#allocation13 + $0xcc] sm:$0xf0]  ;;  %v9421_v22 = vor.u32 %v10665_v52, %v9420_v51 }
 0x2e8   :  { %5439 = vmatpush.bf16.msra.mxu3 %v8925_v63  ;;  %5478 = vmatpush.bf16.msrb.mxu2 %v9309_v17  ;;  %v9228_v63 = vld [vmem:[#allocation11 + $0x628] sm:$0xf]  ;;  %v10617_v17 = vld [vmem:[#allocation11 + $0x634] sm:$0xf0]  ;;  %v10495_v27 = vld [vmem:[#allocation11 + $0x26c] sm:$0xf] }
 0x2e9   :  { %5517 = vmatpush.bf16.msra.mxu1 %v8673_v59  ;;  %v10551_v59 = vld [vmem:[#allocation11 + $0x42c] sm:$0xf]  ;;  %v9229_v9 = vor.u32 %v10617_v17, %v9228_v63  ;;  %v10661_v63 = vld [vmem:[#allocation11 + $0x794] sm:$0xf0]  ;;  %v8718_v52 = vld [vmem:[#allocation11 + $0x238] sm:$0xf0] }
 0x2ea   :  { %5557 = vmatpush.bf16.msrb.mxu0 %v9041_v21  ;;  %v10547_v21 = vld [vmem:[#allocation11 + $0x40c] sm:$0xf] }
 0x2eb   :  { %v8961_v36 = vor.u32 %v10547_v21, %v8958_v18  ;;  %v10591_v21 = vld [vmem:[#allocation11 + $0x56c] sm:$0xf] }
 0x2ec   :  { %5440 = vmatpush.bf16.msra.mxu3 %v8909_v14  ;;  %5479 = vmatpush.bf16.msrb.mxu2 %v9293_v11  ;;  %v8977_v14 = vor.u32 %v10551_v59, %v8974_v24  ;;  %v10613_v11 = vld [vmem:[#allocation11 + $0x614] sm:$0xf0]  ;;  %v8766_v59 = vld [vmem:[#allocation11 + $0x298] sm:$0xf0]  ;;  %v10595_v24 = vld [vmem:[#allocation11 + $0x58c] sm:$0xf] }
 0x2ed   :  { %5518 = vmatpush.bf16.msra.mxu1 %v8657_v16  ;;  %v11397_v16 = vpop.f32.mrf.mxu0  ;;  %v9213_v31 = vor.u32 %v10613_v11, %v9212_v23  ;;  %v8769_v23 = vor.u32 %v10499_v3, %v8766_v59  ;;  %v10487_v51 = vld [vmem:[#allocation11 + $0x22c] sm:$0xf]  ;;  %v8702_v3 = vld [vmem:[#allocation11 + $0x218] sm:$0xf0] }
 0x2ee   :  { %5558 = vmatpush.bf16.msrb.mxu0 %v9025_v35  ;;  %v8817_v35 = vor.u32 %v10511_v48, %v8814_v28  ;;  %v10692_v48 = vld [vmem:[#allocation13 + $0x8c] sm:$0xf0]  ;;  %v10579_v59 = vld [vmem:[#allocation11 + $0x50c] sm:$0xf] }
 0x2f0   :  { %5441 = vmatpush.bf16.msra.mxu3 %v8893_v38  ;;  %5480 = vmatpush.bf16.msrb.mxu2 %v9277_v33  ;;  %v10607_v38 = vld [vmem:[#allocation11 + $0x5ec] sm:$0xf]  ;;  %v9198_v33 = vld [vmem:[#allocation11 + $0x5f8] sm:$0xf0] }
 0x2f1   :  { %5519 = vmatpush.bf16.msra.mxu1 %v8641_v15  ;;  %v9453_v15 = vor.u32 %v10673_v4, %v9452_v40  ;;  %v9201_v39 = vor.u32 %v10607_v38, %v9198_v33  ;;  %v9134_v40 = vld [vmem:[#allocation11 + $0x578] sm:$0xf0]  ;;  %v9524_v4 = vld [vmem:[#allocation13 + $0x80] sm:$0xf]  ;;  %v10653_v38 = vld [vmem:[#allocation11 + $0x754] sm:$0xf0] }
 0x2f2   :  { %5559 = vmatpush.bf16.msrb.mxu0 %v9009_v50  ;;  %v8801_v50 = vor.u32 %v10507_v44, %v8798_v45  ;;  %v9137_v33 = vor.u32 %v10591_v21, %v9134_v40  ;;  %v10688_v44 = vld [vmem:[#allocation13 + $0x6c] sm:$0xf0]  ;;  %v11410_v45 = vld [vmem:[%s11521_s6] sm:$0xf]  ;;  %v10539_v21 = vld [vmem:[#allocation11 + $0x3cc] sm:$0xf] }
 0x2f3   :  { %s11085_s6 = smov [#allocation16]  }
 0x2f4   :  { %5442 = vmatpush.bf16.msra.mxu3 %v8877_v30  ;;  %5481 = vmatpush.bf16.msrb.mxu2 %v9261_v47  ;;  %v9182_v30 = vld [vmem:[#allocation11 + $0x5d8] sm:$0xf0]  ;;  %v9572_v47 = vld [vmem:[#allocation13 + $0xe0] sm:$0xf]  ;;  %s6610_s11 = sshll.u32 %s11085_s6, 4  ;;  %s6611_s11 = int_to_ptr.vmem [resolvable:$true] %s6610_s11 }
 0x2f5   :  { %5520 = vmatpush.bf16.msra.mxu1 %v8625_v8  ;;  %v5306_v49 = vpop.f32.mrf.mxu0  ;;  %v9437_v8 = vor.u32 %v10669_v37, %v9436_v2  ;;  %v9185_v55 = vor.u32 %v10603_v43, %v9182_v30  ;;  %v9573_v61 = vor.u32 %v10704_v7, %v9572_v47  ;;  %v9525_v2 = vor.u32 %v10692_v48, %v9524_v4  ;;  %v9118_v37 = vld [vmem:[#allocation11 + $0x558] sm:$0xf0]  ;;  %v10635_v4 = vld [vmem:[#allocation11 + $0x6cc] sm:$0xf]  ;;  %6615 = dma.vmem_to_hbm [thread:$0]  %s6611_s11, 512, %s6613_s14, [#allocation4]  }
 0x2f6   :  { %5560 = vmatpush.bf16.msrb.mxu0 %v8993_v62  ;;  %v9404_v62 = vld [vmem:[#allocation11 + $0x788] sm:$0xf]  ;;  %v3904_v43 = vperm.slane %v11410_v45, 1 }
 0x2f7   :  { %v9405_v25 = vor.u32 %v10661_v63, %v9404_v62  ;;  %v9356_v49 = vld [vmem:[#allocation11 + $0x728] sm:$0xf]  ;;  %v10483_v62 = vld [vmem:[#allocation11 + $0x20c] sm:$0xf] }
 0x2f8   :  { %5443 = vmatpush.bf16.msra.mxu3 %v8861_v56  ;;  %5482 = vmatpush.bf16.msrb.mxu2 %v9245_v57  ;;  %v9166_v56 = vld [vmem:[#allocation11 + $0x5b8] sm:$0xf0]  ;;  %v9556_v57 = vld [vmem:[#allocation13 + $0xc0] sm:$0xf] }
 0x2f9   :  { %5521 = vmatpush.bf16.msra.mxu1 %v8609_v19  ;;  %v8785_v19 = vor.u32 %v10503_v41, %v8782_v26  ;;  %v9169_v17 = vor.u32 %v10599_v46, %v9166_v56  ;;  %v9102_v26 = vld [vmem:[#allocation11 + $0x538] sm:$0xf0]  ;;  %v9492_v46 = vld [vmem:[#allocation13 + $0x40] sm:$0xf]  ;;  %v5305_v56 = vadd.f32 %v11397_v16, %v3904_v43  ;;  %v10639_v16 = vld [vmem:[#allocation11 + $0x6ec] sm:$0xf] }
 0x2fa   :  { %5561 = vmatpush.bf16.msrb.mxu0 %v8977_v14  ;;  %v10657_v14 = vld [vmem:[#allocation11 + $0x774] sm:$0xf0] }
 0x2fc   :  { %5444 = vmatpush.bf16.msra.mxu3 %v8845_v6  ;;  %5483 = vmatpush.bf16.msrb.mxu2 %v9229_v9  ;;  %v9150_v6 = vld [vmem:[#allocation11 + $0x598] sm:$0xf0]  ;;  %v9540_v9 = vld [vmem:[#allocation13 + $0xa0] sm:$0xf] }
 0x2fd   :  { %5522 = vmatpush.bf16.msra.mxu1 %v8593_v13  ;;  %v9388_v13 = vld [vmem:[#allocation11 + $0x768] sm:$0xf]  ;;  %v9153_v11 = vor.u32 %v10595_v24, %v9150_v6  ;;  %v9541_v18 = vor.u32 %v10696_v10, %v9540_v9  ;;  %v9086_v24 = vld [vmem:[#allocation11 + $0x518] sm:$0xf0]  ;;  %v10543_v9 = vld [vmem:[#allocation11 + $0x3ec] sm:$0xf] }
 0x2fe   :  { %5562 = vmatpush.bf16.msrb.mxu0 %v8961_v36  ;;  %v9389_v28 = vor.u32 %v10657_v14, %v9388_v13  ;;  %v10491_v36 = vld [vmem:[#allocation11 + $0x24c] sm:$0xf]  ;;  %v8942_v10 = vld [vmem:[#allocation11 + $0x3f8] sm:$0xf0]  ;;  %v10680_v13 = vld [vmem:[#allocation13 + $0x2c] sm:$0xf0] }
 0x300   :  { %5445 = vmatpush.bf16.msra.mxu3 %v8829_v20  ;;  %5484 = vmatpush.bf16.msrb.mxu2 %v9213_v31  ;;  %v11403_v1 = vpop.f32.mrf.mxu1  ;;  %v8753_v20 = vor.u32 %v10495_v27, %v8750_v29  ;;  %v9372_v31 = vld [vmem:[#allocation11 + $0x748] sm:$0xf]  ;;  %v9089_v27 = vor.u32 %v10579_v59, %v9086_v24  ;;  %v8945_v29 = vor.u32 %v10543_v9, %v8942_v10  ;;  %v8878_v24 = vld [vmem:[#allocation11 + $0x378] sm:$0xf0]  ;;  %v10724_v9 = vld [vmem:[#allocation13 + $0x18c] sm:$0xf0] }
 0x301   :  { %5523 = vmatpush.bf16.msra.mxu1 %v8577_v34  ;;  %5563 = vmatmul.bf16.vlgmr.msrb.gmra.mxu0 %v11347_v32  ;;  %v11405_v32 = vpop.f32.mrf.mxu0  ;;  %v9373_v47 = vor.u32 %v10653_v38, %v9372_v31  ;;  %v9310_v31 = vld [vmem:[#allocation11 + $0x6d8] sm:$0xf0]  ;;  %v9460_v38 = vld [vmem:[#allocation13] sm:$0xf]  ;;  %v10623_v10 = vld [vmem:[#allocation11 + $0x66c] sm:$0xf] }
 0x302   :  { %6393 = vmatpush.bf16.msra.mxu0 %v9573_v61  ;;  %v10684_v61 = vld [vmem:[#allocation13 + $0x4c] sm:$0xf0] }
 0x303   :  { %5446 = vmatmul.bf16.vlgmr.msra.gmra.mxu3 %v11337_v42  ;;  %5485 = vmatmul.bf16.vlgmr.msrb.gmra.mxu2 %v11369_v12 }
 0x304   :  { %5490 = vmatpush.bf16.msrb.mxu3 %v9453_v15  ;;  %5529 = vmatpush.bf16.msra.mxu2 %v8817_v35  ;;  %v8734_v15 = vld [vmem:[#allocation11 + $0x258] sm:$0xf0]  ;;  %v10587_v35 = vld [vmem:[#allocation11 + $0x54c] sm:$0xf] }
 0x305   :  { %5568 = vmatpush.bf16.msrb.mxu1 %v9201_v39  ;;  %v9508_v39 = vld [vmem:[#allocation13 + $0x60] sm:$0xf]  ;;  %v8737_v7 = vor.u32 %v10491_v36, %v8734_v15  ;;  %v9574_v36 = vld [vmem:[#allocation13 + $0xf0] sm:$0xf0] }
 0x306   :  { %5524 = vmatmul.bf16.vlgmr.msra.gmra.mxu1 %v11314_v58  ;;  %v9557_v58 = vor.u32 %v10700_v0, %v9556_v57  ;;  %v9509_v41 = vor.u32 %v10688_v44, %v9508_v39  ;;  %v8721_v0 = vor.u32 %v10487_v51, %v8718_v52  ;;  %v9313_v39 = vor.u32 %v10635_v4, %v9310_v31  ;;  %v8910_v44 = vld [vmem:[#allocation11 + $0x3b8] sm:$0xf0]  ;;  %v9558_v51 = vld [vmem:[#allocation13 + $0xd0] sm:$0xf0]  ;;  %v10720_v4 = vld [vmem:[#allocation13 + $0x16c] sm:$0xf0] }
 0x307   :  { %v10686_v31 = vld [vmem:[#allocation13 + $0x64] sm:$0xf] }
 0x308   :  { %5491 = vmatpush.bf16.msrb.mxu3 %v9437_v8  ;;  %5530 = vmatpush.bf16.msra.mxu2 %v8801_v50  ;;  %v5267_v34 = vpop.f32.mrf.mxu1  ;;  %v10649_v8 = vld [vmem:[#allocation11 + $0x734] sm:$0xf0]  ;;  %v9121_v50 = vor.u32 %v10587_v35, %v9118_v37 }
 0x309   :  { %5569 = vmatpush.bf16.msrb.mxu1 %v9185_v55  ;;  %6394 = vmatpush.bf16.msra.mxu0 %v9557_v58  ;;  %v5358_v30 = vpop.f32.mrf.mxu0  ;;  %v10583_v55 = vld [vmem:[#allocation11 + $0x52c] sm:$0xf]  ;;  %v9357_v57 = vor.u32 %v10649_v8, %v9356_v49  ;;  %v9493_v58 = vor.u32 %v10684_v61, %v9492_v46  ;;  %v10702_v34 = vld [vmem:[#allocation13 + $0xe4] sm:$0xf]  ;;  %v9294_v49 = vld [vmem:[#allocation11 + $0x6b8] sm:$0xf0] }
 0x30a   :  { %v9105_v63 = vor.u32 %v10583_v55, %v9102_v26  ;;  %v9684_v30 = vld [vmem:[#allocation13 + $0x1c0] sm:$0xf]  ;;  %v9577_v8 = vor.u32 %v10702_v34, %v9574_v36  ;;  %v10531_v55 = vld [vmem:[#allocation11 + $0x38c] sm:$0xf]  ;;  %v8894_v46 = vld [vmem:[#allocation11 + $0x398] sm:$0xf0] }
 0x30b   :  { %v9668_v61 = vld [vmem:[#allocation13 + $0x1a0] sm:$0xf] }
 0x30c   :  { %5492 = vmatpush.bf16.msrb.mxu3 %v9421_v22  ;;  %5531 = vmatpush.bf16.msra.mxu2 %v8785_v19  ;;  %v9340_v22 = vld [vmem:[#allocation11 + $0x708] sm:$0xf]  ;;  %v10645_v19 = vld [vmem:[#allocation11 + $0x714] sm:$0xf0] }
 0x30d   :  { %5570 = vmatpush.bf16.msrb.mxu1 %v9169_v17  ;;  %6395 = vmatpush.bf16.msra.mxu0 %v9541_v18  ;;  %v9341_v14 = vor.u32 %v10645_v19, %v9340_v22  ;;  %v8926_v18 = vld [vmem:[#allocation11 + $0x3d8] sm:$0xf0]  ;;  %v10694_v22 = vld [vmem:[#allocation13 + $0xa4] sm:$0xf]  ;;  %v9542_v19 = vld [vmem:[#allocation13 + $0xb0] sm:$0xf0] }
 0x30e   :  { %v8929_v35 = vor.u32 %v10539_v21, %v8926_v18  ;;  %v8862_v18 = vld [vmem:[#allocation11 + $0x358] sm:$0xf0] }
 0x310   :  { %5493 = vmatpush.bf16.msrb.mxu3 %v9405_v25  ;;  %5532 = vmatpush.bf16.msra.mxu2 %v8769_v23  ;;  %v5317_v17 = vpop.f32.mrf.mxu1  ;;  %v9326_v25 = vld [vmem:[#allocation11 + $0x6f8] sm:$0xf0]  ;;  %v9476_v23 = vld [vmem:[#allocation13 + $0x20] sm:$0xf] }
 0x311   :  { %5571 = vmatpush.bf16.msrb.mxu1 %v9153_v11  ;;  %6396 = vmatpush.bf16.msra.mxu0 %v9525_v2  ;;  %v11414_v6 = vadd.f32 %v5317_v17, %v5305_v56  ;;  %v8705_v11 = vor.u32 %v10483_v62, %v8702_v3  ;;  %v9329_v40 = vor.u32 %v10639_v16, %v9326_v25  ;;  %v10535_v2 = vld [vmem:[#allocation11 + $0x3ac] sm:$0xf]  ;;  %v10728_v56 = vld [vmem:[#allocation13 + $0x1ac] sm:$0xf0]  ;;  %v9262_v16 = vld [vmem:[#allocation11 + $0x678] sm:$0xf0] }
 0x312   :  { %v9477_v48 = vor.u32 %v10680_v13, %v9476_v23  ;;  %v8913_v52 = vor.u32 %v10535_v2, %v8910_v44  ;;  %v10527_v17 = vld [vmem:[#allocation11 + $0x36c] sm:$0xf]  ;;  %v9669_v3 = vor.u32 %v10728_v56, %v9668_v61  ;;  %v9545_v25 = vor.u32 %v10694_v22, %v9542_v19  ;;  %v10690_v23 = vld [vmem:[#allocation13 + $0x84] sm:$0xf]  ;;  %v9526_v13 = vld [vmem:[#allocation13 + $0x90] sm:$0xf0] }
 0x313   :  { %v9265_v21 = vor.u32 %v10623_v10, %v9262_v16  ;;  %v10716_v44 = vld [vmem:[#allocation13 + $0x14c] sm:$0xf0]  ;;  %v9214_v56 = vld [vmem:[#allocation11 + $0x618] sm:$0xf0]  ;;  %v10678_v22 = vld [vmem:[#allocation13 + $0x24] sm:$0xf] }
 0x314   :  { %5494 = vmatpush.bf16.msrb.mxu3 %v9389_v28  ;;  %5533 = vmatpush.bf16.msra.mxu2 %v8753_v20  ;;  %v9700_v28 = vld [vmem:[#allocation13 + $0x1e0] sm:$0xf]  ;;  %v10736_v20 = vld [vmem:[#allocation13 + $0x1ec] sm:$0xf0]  ;;  %v9478_v19 = vld [vmem:[#allocation13 + $0x30] sm:$0xf0] }
 0x315   :  { %5572 = vmatpush.bf16.msrb.mxu1 %v9137_v33  ;;  %6397 = vmatpush.bf16.msra.mxu0 %v9509_v41  ;;  %v10676_v33 = vld [vmem:[#allocation13 + $0xc] sm:$0xf0]  ;;  %v9701_v37 = vor.u32 %v10736_v20, %v9700_v28  ;;  %v9246_v28 = vld [vmem:[#allocation11 + $0x658] sm:$0xf0]  ;;  %v9529_v20 = vor.u32 %v10690_v23, %v9526_v13  ;;  %v9481_v16 = vor.u32 %v10678_v22, %v9478_v19  ;;  %v9702_v23 = vld [vmem:[#allocation13 + $0x1f0] sm:$0xf0] }
 0x316   :  { %v9461_v43 = vor.u32 %v10676_v33, %v9460_v38  ;;  %v9510_v38 = vld [vmem:[#allocation13 + $0x70] sm:$0xf0]  ;;  %v10712_v61 = vld [vmem:[#allocation13 + $0x12c] sm:$0xf0]  ;;  %v9438_v10 = vld [vmem:[#allocation11 + $0x7d8] sm:$0xf0] }
 0x317   :  { %v10674_v13 = vld [vmem:[#allocation13 + $0x4] sm:$0xf]  ;;  %v10647_v22 = vld [vmem:[#allocation11 + $0x72c] sm:$0xf]  ;;  %v9564_v19 = vld [vmem:[#allocation13 + $0xc8] sm:$0xf] }
 0x318   :  { %5495 = vmatpush.bf16.msrb.mxu3 %v9373_v47  ;;  %5534 = vmatpush.bf16.msra.mxu2 %v8737_v7  ;;  %v5319_v15 = vpop.f32.mrf.mxu1  ;;  %v10732_v47 = vld [vmem:[#allocation13 + $0x1cc] sm:$0xf0]  ;;  %v10631_v7 = vld [vmem:[#allocation11 + $0x6ac] sm:$0xf] }
 0x319   :  { %5573 = vmatpush.bf16.msrb.mxu1 %v9121_v50  ;;  %6398 = vmatpush.bf16.msra.mxu0 %v9493_v58  ;;  %v10698_v50 = vld [vmem:[#allocation13 + $0xc4] sm:$0xf]  ;;  %v9685_v41 = vor.u32 %v10732_v47, %v9684_v30  ;;  %v9297_v26 = vor.u32 %v10631_v7, %v9294_v49  ;;  %v9652_v58 = vld [vmem:[#allocation13 + $0x180] sm:$0xf]  ;;  %v10519_v15 = vld [vmem:[#allocation11 + $0x32c] sm:$0xf]  ;;  %v9513_v47 = vor.u32 %v10686_v31, %v9510_v38 }
 0x31a   :  { %v9230_v30 = vld [vmem:[#allocation11 + $0x638] sm:$0xf0]  ;;  %v10682_v7 = vld [vmem:[#allocation13 + $0x44] sm:$0xf]  ;;  %v9494_v49 = vld [vmem:[#allocation13 + $0x50] sm:$0xf0] }
 0x31b   :  { %v3905_v31 = vperm.slane %v11410_v45, 2 }
 0x31c   :  { %5496 = vmatpush.bf16.msrb.mxu3 %v9357_v57  ;;  %5535 = vmatpush.bf16.msra.mxu2 %v8721_v0  ;;  %v10627_v57 = vld [vmem:[#allocation11 + $0x68c] sm:$0xf]  ;;  %v9561_v0 = vor.u32 %v10698_v50, %v9558_v51 }
 0x31d   :  { %5574 = vmatpush.bf16.msrb.mxu1 %v9105_v63  ;;  %6399 = vmatpush.bf16.msra.mxu0 %v9477_v48  ;;  %v8897_v63 = vor.u32 %v10531_v55, %v8894_v46  ;;  %v10619_v48 = vld [vmem:[#allocation11 + $0x64c] sm:$0xf]  ;;  %v9604_v46 = vld [vmem:[#allocation13 + $0x120] sm:$0xf] }
 0x31e   :  { %v9249_v2 = vor.u32 %v10619_v48, %v9246_v28  ;;  %v10515_v51 = vld [vmem:[#allocation11 + $0x30c] sm:$0xf]  ;;  %v10730_v28 = vld [vmem:[#allocation13 + $0x1c4] sm:$0xf] }
 0x320   :  { %5497 = vmatpush.bf16.msrb.mxu3 %v9341_v14  ;;  %5536 = vmatpush.bf16.msra.mxu2 %v8705_v11  ;;  %v11421_v62 = vpop.f32.mrf.mxu1  ;;  %v8881_v11 = vor.u32 %v10527_v17, %v8878_v24  ;;  %v9605_v17 = vor.u32 %v10712_v61, %v9604_v46  ;;  %v10667_v24 = vld [vmem:[#allocation11 + $0x7cc] sm:$0xf]  ;;  %v10718_v46 = vld [vmem:[#allocation13 + $0x164] sm:$0xf]  ;;  %v9638_v61 = vld [vmem:[#allocation13 + $0x170] sm:$0xf0] }
 0x321   :  { %5575 = vmatpush.bf16.msrb.mxu1 %v9089_v27  ;;  %6400 = vmatpush.bf16.msra.mxu0 %v9461_v43  ;;  %v10523_v27 = vld [vmem:[#allocation11 + $0x34c] sm:$0xf] }
 0x322   :  { %v8865_v36 = vor.u32 %v10523_v27, %v8862_v18  ;;  %v10615_v43 = vld [vmem:[#allocation11 + $0x62c] sm:$0xf] }
 0x323   :  { %5498 = vmatmul.bf16.vlgmr.msrb.gmra.mxu3 %v11380_v60  ;;  %5537 = vmatmul.bf16.vlgmr.msra.gmra.mxu2 %v11326_v53  ;;  %v9278_v53 = vld [vmem:[#allocation11 + $0x698] sm:$0xf0]  ;;  %v10663_v18 = vld [vmem:[#allocation11 + $0x7ac] sm:$0xf] }
 0x324   :  { %5542 = vmatpush.bf16.msra.mxu3 %v8945_v29  ;;  %5581 = vmatpush.bf16.msrb.mxu2 %v9329_v40  ;;  %v9281_v59 = vor.u32 %v10627_v57, %v9278_v53  ;;  %v9653_v29 = vor.u32 %v10724_v9, %v9652_v58  ;;  %v9636_v40 = vld [vmem:[#allocation13 + $0x160] sm:$0xf]  ;;  %v10671_v57 = vld [vmem:[#allocation11 + $0x7ec] sm:$0xf]  ;;  %v9454_v53 = vld [vmem:[#allocation11 + $0x7f8] sm:$0xf0] }
 0x325   :  { %5576 = vmatmul.bf16.vlgmr.msrb.gmra.mxu1 %v11355_v54  ;;  %6445 = vmatpush.bf16.msrb.mxu0 %v9577_v8  ;;  %v11419_v54 = vpop.f32.mrf.mxu0  ;;  %v9588_v58 = vld [vmem:[#allocation13 + $0x100] sm:$0xf]  ;;  %v10708_v9 = vld [vmem:[#allocation13 + $0x10c] sm:$0xf0] }
 0x326   :  { %6406 = vmatpush.bf16.msra.mxu1 %v9701_v37  ;;  %v11423_v14 = vpop.f32.mrf.mxu2  ;;  %v8846_v37 = vld [vmem:[#allocation11 + $0x338] sm:$0xf0] }
 0x327   :  { %v8849_v50 = vor.u32 %v10519_v15, %v8846_v37  ;;  %v10726_v15 = vld [vmem:[#allocation13 + $0x1a4] sm:$0xf] }
 0x328   :  { %5543 = vmatpush.bf16.msra.mxu3 %v8929_v35  ;;  %5582 = vmatpush.bf16.msrb.mxu2 %v9313_v39  ;;  %v5371_v34 = vpop.f32.mrf.mxu1  ;;  %v9637_v35 = vor.u32 %v10720_v4, %v9636_v40  ;;  %v9620_v39 = vld [vmem:[#allocation13 + $0x140] sm:$0xf]  ;;  %v9422_v4 = vld [vmem:[#allocation11 + $0x7b8] sm:$0xf0] }
 0x329   :  { %6446 = vmatpush.bf16.msrb.mxu0 %v9561_v0  ;;  %v9621_v55 = vor.u32 %v10716_v44, %v9620_v39  ;;  %v9497_v0 = vor.u32 %v10682_v7, %v9494_v49  ;;  %v9425_v38 = vor.u32 %v10663_v18, %v9422_v4  ;;  %v10655_v39 = vld [vmem:[#allocation11 + $0x76c] sm:$0xf]  ;;  %v10722_v7 = vld [vmem:[#allocation13 + $0x184] sm:$0xf]  ;;  %v9654_v49 = vld [vmem:[#allocation13 + $0x190] sm:$0xf0] }
 0x32a   :  { %6407 = vmatpush.bf16.msra.mxu1 %v9685_v41  ;;  %v9233_v41 = vor.u32 %v10615_v43, %v9230_v30  ;;  %v9342_v4 = vld [vmem:[#allocation11 + $0x718] sm:$0xf0] }
 0x32c   :  { %5544 = vmatpush.bf16.msra.mxu3 %v8913_v52  ;;  %5583 = vmatpush.bf16.msrb.mxu2 %v9297_v26  ;;  %v8830_v52 = vld [vmem:[#allocation11 + $0x318] sm:$0xf0]  ;;  %v10611_v26 = vld [vmem:[#allocation11 + $0x60c] sm:$0xf] }
 0x32d   :  { %6447 = vmatpush.bf16.msrb.mxu0 %v9545_v25  ;;  %v5410_v33 = vpop.f32.mrf.mxu0  ;;  %v10734_v25 = vld [vmem:[#allocation13 + $0x1e4] sm:$0xf] }
 0x32e   :  { %6408 = vmatpush.bf16.msra.mxu1 %v9669_v3  ;;  %v5280_v8 = vpop.f32.mrf.mxu2  ;;  %v9217_v3 = vor.u32 %v10611_v26, %v9214_v56  ;;  %v9705_v40 = vor.u32 %v10734_v25, %v9702_v23  ;;  %v10659_v33 = vld [vmem:[#allocation11 + $0x78c] sm:$0xf]  ;;  %v9374_v26 = vld [vmem:[#allocation11 + $0x758] sm:$0xf0]  ;;  %v9828_v25 = vld [vmem:[#allocation13 + $0x2e0] sm:$0xf] }
 0x32f   :  { %v10768_v23 = vld [vmem:[#allocation13 + $0x2ec] sm:$0xf0] }
 0x330   :  { %5545 = vmatpush.bf16.msra.mxu3 %v8897_v63  ;;  %5584 = vmatpush.bf16.msrb.mxu2 %v9281_v59  ;;  %v8833_v63 = vor.u32 %v10515_v51, %v8830_v52  ;;  %v9457_v59 = vor.u32 %v10671_v57, %v9454_v53  ;;  %v9580_v52 = vld [vmem:[#allocation13 + $0xe8] sm:$0xf] }
 0x331   :  { %6448 = vmatpush.bf16.msrb.mxu0 %v9529_v20  ;;  %v9686_v20 = vld [vmem:[#allocation13 + $0x1d0] sm:$0xf0] }
 0x332   :  { %6409 = vmatpush.bf16.msra.mxu1 %v9653_v29  ;;  %v9589_v29 = vor.u32 %v10708_v9, %v9588_v58  ;;  %v9689_v34 = vor.u32 %v10730_v28, %v9686_v20  ;;  %v10714_v58 = vld [vmem:[#allocation13 + $0x144] sm:$0xf]  ;;  %v9622_v9 = vld [vmem:[#allocation13 + $0x150] sm:$0xf0]  ;;  %v9812_v20 = vld [vmem:[#allocation13 + $0x2c0] sm:$0xf] }
 0x333   :  { %v9625_v18 = vor.u32 %v10714_v58, %v9622_v9  ;;  %v9606_v28 = vld [vmem:[#allocation13 + $0x130] sm:$0xf0]  ;;  %v10677_v58 = vld [vmem:[#allocation13 + $0x14] sm:$0xf0] }
 0x334   :  { %5546 = vmatpush.bf16.msra.mxu3 %v8881_v11  ;;  %5585 = vmatpush.bf16.msrb.mxu2 %v9265_v21  ;;  %v9462_v11 = vld [vmem:[#allocation13 + $0x10] sm:$0xf0]  ;;  %v9441_v21 = vor.u32 %v10667_v24, %v9438_v10  ;;  %v9358_v24 = vld [vmem:[#allocation11 + $0x738] sm:$0xf0] }
 0x335   :  { %6449 = vmatpush.bf16.msrb.mxu0 %v9513_v47  ;;  %v9465_v48 = vor.u32 %v10674_v13, %v9462_v11  ;;  %v9390_v47 = vld [vmem:[#allocation11 + $0x778] sm:$0xf0]  ;;  %v9361_v13 = vor.u32 %v10647_v22, %v9358_v24  ;;  %v10643_v11 = vld [vmem:[#allocation11 + $0x70c] sm:$0xf]  ;;  %v10681_v22 = vld [vmem:[#allocation13 + $0x34] sm:$0xf0] }
 0x336   :  { %6410 = vmatpush.bf16.msra.mxu1 %v9637_v35  ;;  %v11425_v27 = vpop.f32.mrf.mxu2  ;;  %v9670_v35 = vld [vmem:[#allocation13 + $0x1b0] sm:$0xf0]  ;;  %v9468_v24 = vld [vmem:[#allocation13 + $0x8] sm:$0xf] }
 0x337   :  { %v9673_v44 = vor.u32 %v10726_v15, %v9670_v35  ;;  %v9532_v15 = vld [vmem:[#allocation13 + $0x88] sm:$0xf]  ;;  %v10693_v35 = vld [vmem:[#allocation13 + $0x94] sm:$0xf0] }
 0x338   :  { %5547 = vmatpush.bf16.msra.mxu3 %v8865_v36  ;;  %5586 = vmatpush.bf16.msrb.mxu2 %v9249_v2  ;;  %v9406_v36 = vld [vmem:[#allocation11 + $0x798] sm:$0xf0]  ;;  %v5266_v2 = vadd.f32 %v11403_v1, %v11395_v5  ;;  %v9393_v1 = vor.u32 %v10655_v39, %v9390_v47  ;;  %v10760_v39 = vld [vmem:[#allocation13 + $0x2ac] sm:$0xf0] }
 0x339   :  { %6450 = vmatpush.bf16.msrb.mxu0 %v9497_v0 }
 0x33a   :  { %6411 = vmatpush.bf16.msra.mxu1 %v9621_v55  ;;  %v5279_v8 = vadd.f32 %v11423_v14, %v5266_v2  ;;  %v10705_v55 = vld [vmem:[#allocation13 + $0xf4] sm:$0xf0] }
 0x33b   :  { %v9581_v57 = vor.u32 %v10705_v55, %v9580_v52  ;;  %v9500_v55 = vld [vmem:[#allocation13 + $0x48] sm:$0xf] }
 0x33c   :  { %5548 = vmatpush.bf16.msra.mxu3 %v8849_v50  ;;  %5587 = vmatpush.bf16.msrb.mxu2 %v9233_v41  ;;  %v9657_v41 = vor.u32 %v10722_v7, %v9654_v49  ;;  %v9516_v7 = vld [vmem:[#allocation13 + $0x68] sm:$0xf]  ;;  %v10689_v49 = vld [vmem:[#allocation13 + $0x74] sm:$0xf0] }
 0x33d   :  { %6451 = vmatpush.bf16.msrb.mxu0 %v9481_v16 }
 0x33e   :  { %6412 = vmatpush.bf16.msra.mxu1 %v9605_v17  ;;  %v5332_v37 = vpop.f32.mrf.mxu2  ;;  %v9641_v17 = vor.u32 %v10718_v46, %v9638_v61 }
 0x33f   :  { %v11433_v30 = vpop.f32.mrf.mxu0  ;;  %v10706_v37 = vld [vmem:[#allocation13 + $0x104] sm:$0xf] }
 0x340   :  { %5549 = vmatpush.bf16.msra.mxu3 %v8833_v63  ;;  %5588 = vmatpush.bf16.msrb.mxu2 %v9217_v3  ;;  %v5421_v43 = vpop.f32.mrf.mxu1  ;;  %v10701_v63 = vld [vmem:[#allocation13 + $0xd4] sm:$0xf0] }
 0x341   :  { %6452 = vmatpush.bf16.msrb.mxu0 %v9465_v48  ;;  %v9565_v16 = vor.u32 %v10701_v63, %v9564_v19  ;;  %v10710_v48 = vld [vmem:[#allocation13 + $0x124] sm:$0xf]  ;;  %v10748_v19 = vld [vmem:[#allocation13 + $0x24c] sm:$0xf0] }
 0x342   :  { %6413 = vmatpush.bf16.msra.mxu1 %v9589_v29  ;;  %v9548_v29 = vld [vmem:[#allocation13 + $0xa8] sm:$0xf]  ;;  %v9609_v2 = vor.u32 %v10710_v48, %v9606_v28 }
 0x343   :  { %5550 = vmatmul.bf16.vlgmr.msra.gmra.mxu3 %v11337_v42  ;;  %5589 = vmatmul.bf16.vlgmr.msrb.gmra.mxu2 %v11369_v12  ;;  %v5409_v42 = vadd.f32 %v11419_v54, %v3905_v31  ;;  %v9409_v12 = vor.u32 %v10659_v33, %v9406_v36  ;;  %v10651_v54 = vld [vmem:[#allocation11 + $0x74c] sm:$0xf]  ;;  %v10764_v31 = vld [vmem:[#allocation13 + $0x2cc] sm:$0xf0]  ;;  %v9345_v36 = vor.u32 %v10643_v11, %v9342_v4  ;;  %v9708_v48 = vld [vmem:[#allocation13 + $0x1e8] sm:$0xf] }
 0x344   :  { %5594 = vmatpush.bf16.msrb.mxu3 %v9457_v59  ;;  %v9377_v0 = vor.u32 %v10651_v54, %v9374_v26  ;;  %v9813_v33 = vor.u32 %v10764_v31, %v9812_v20  ;;  %v9517_v54 = vor.u32 %v10689_v49, %v9516_v7  ;;  %v10737_v20 = vld [vmem:[#allocation13 + $0x1f4] sm:$0xf0]  ;;  %v9716_v31 = vld [vmem:[#allocation13 + $0x200] sm:$0xf]  ;;  %v9814_v7 = vld [vmem:[#allocation13 + $0x2d0] sm:$0xf0] }
 0x345   :  { %v11436_v50 = vadd.f32 %v5421_v43, %v5409_v42  ;;  %v9590_v42 = vld [vmem:[#allocation13 + $0x110] sm:$0xf0]  ;;  %v9533_v43 = vor.u32 %v10693_v35, %v9532_v15  ;;  %v10766_v15 = vld [vmem:[#allocation13 + $0x2e4] sm:$0xf] }
 0x346   :  { %6458 = vmatpush.bf16.msrb.mxu1 %v9705_v40  ;;  %v5291_v51 = vpop.f32.mrf.mxu3  ;;  %v9829_v40 = vor.u32 %v10768_v23, %v9828_v25  ;;  %v9469_v25 = vor.u32 %v10677_v58, %v9468_v24  ;;  %v10744_v23 = vld [vmem:[#allocation13 + $0x22c] sm:$0xf0]  ;;  %v9830_v35 = vld [vmem:[#allocation13 + $0x2f0] sm:$0xf0]  ;;  %v10683_v24 = vld [vmem:[#allocation13 + $0x4c] sm:$0xf] }
 0x347   :  { %v5292_v5 = vadd.f32 %v5291_v51, %v5279_v8  ;;  %v5462_v59 = vpop.f32.mrf.mxu0  ;;  %v9593_v8 = vor.u32 %v10706_v37, %v9590_v42  ;;  %v9780_v51 = vld [vmem:[#allocation13 + $0x280] sm:$0xf]  ;;  %v10695_v37 = vld [vmem:[#allocation13 + $0xac] sm:$0xf]  ;;  %v9833_v42 = vor.u32 %v10766_v15, %v9830_v35  ;;  %v9502_v58 = vld [vmem:[#allocation13 + $0x58] sm:$0xf0] }
 0x348   :  { %5595 = vmatpush.bf16.msrb.mxu3 %v9441_v21  ;;  %v11440_v14 = vpop.f32.mrf.mxu2  ;;  %v5423_v3 = vpop.f32.mrf.mxu1  ;;  %v10697_v21 = vld [vmem:[#allocation13 + $0xb4] sm:$0xf0]  ;;  %6419 = vmatpush.bf16.msra.mxu2 %v9829_v40  ;;  %v9566_v40 = vld [vmem:[#allocation13 + $0xd8] sm:$0xf0] }
 0x349   :  { %v5607_v56 = vmax.f32 %v5292_v5, 0.0  ;;  %v10756_v5 = vld [vmem:[#allocation13 + $0x28c] sm:$0xf0] }
 0x34a   :  { %6459 = vmatpush.bf16.msrb.mxu1 %v9689_v34  ;;  %v9781_v52 = vor.u32 %v10756_v5, %v9780_v51  ;;  %v10691_v5 = vld [vmem:[#allocation13 + $0x8c] sm:$0xf] }
 0x34b   :  { %v11438_v53 = vpack.c.bf16 %v5607_v56, %v5607_v56  ;;  %v9764_v56 = vld [vmem:[#allocation13 + $0x260] sm:$0xf] }
 0x34c   :  { %5596 = vmatpush.bf16.msrb.mxu3 %v9425_v38  ;;  %v9549_v38 = vor.u32 %v10697_v21, %v9548_v29  ;;  %6420 = vmatpush.bf16.msra.mxu2 %v9813_v33 }
 0x34d   :  { %6401 = vmatmul.bf16.vlgmr.msra.gmra.mxu0 %v11438_v53 }
 0x34e   :  { %6460 = vmatpush.bf16.msrb.mxu1 %v9673_v44  ;;  %6497 = vmatpush.bf16.msra.mxu0 %v9581_v57  ;;  %v5293_v10 = vpop.f32.mrf.mxu3  ;;  %v10752_v57 = vld [vmem:[#allocation13 + $0x26c] sm:$0xf0] }
 0x34f   :  { %v10703_v10 = vld [vmem:[#allocation13 + $0xec] sm:$0xf] }
 0x350   :  { %5597 = vmatpush.bf16.msrb.mxu3 %v9409_v12  ;;  %v5384_v34 = vpop.f32.mrf.mxu2  ;;  %v9796_v12 = vld [vmem:[#allocation13 + $0x2a0] sm:$0xf] }
 0x351   :  { %v9797_v47 = vor.u32 %v10760_v39, %v9796_v12  ;;  %v9709_v12 = vor.u32 %v10737_v20, %v9708_v48  ;;  %v9692_v39 = vld [vmem:[#allocation13 + $0x1c8] sm:$0xf]  ;;  %v10717_v48 = vld [vmem:[#allocation13 + $0x154] sm:$0xf0] }
 0x352   :  { %6461 = vmatpush.bf16.msrb.mxu1 %v9657_v41  ;;  %6498 = vmatpush.bf16.msra.mxu0 %v9565_v16  ;;  %v10685_v41 = vld [vmem:[#allocation13 + $0x54] sm:$0xf0]  ;;  %v9582_v16 = vld [vmem:[#allocation13 + $0xf8] sm:$0xf0] }
 0x353   :  { %6421 = vmatpush.bf16.msra.mxu2 %v9797_v47  ;;  %v9501_v61 = vor.u32 %v10685_v41, %v9500_v55  ;;  %v10762_v47 = vld [vmem:[#allocation13 + $0x2c4] sm:$0xf]  ;;  %v9676_v55 = vld [vmem:[#allocation13 + $0x1a8] sm:$0xf]  ;;  %v10729_v41 = vld [vmem:[#allocation13 + $0x1b4] sm:$0xf0] }
 0x354   :  { %5598 = vmatpush.bf16.msrb.mxu3 %v9393_v1  ;;  %v5331_v1 = vadd.f32 %v11425_v27, %v11414_v6  ;;  %v9765_v6 = vor.u32 %v10752_v57, %v9764_v56  ;;  %v9748_v27 = vld [vmem:[#allocation13 + $0x240] sm:$0xf]  ;;  %v10687_v57 = vld [vmem:[#allocation13 + $0x6c] sm:$0xf] }
 0x355   :  { %v9749_v3 = vor.u32 %v10748_v19, %v9748_v27  ;;  %v10754_v27 = vld [vmem:[#allocation13 + $0x284] sm:$0xf]  ;;  %v9782_v19 = vld [vmem:[#allocation13 + $0x290] sm:$0xf0] }
 0x356   :  { %6462 = vmatpush.bf16.msrb.mxu1 %v9641_v17  ;;  %6499 = vmatpush.bf16.msra.mxu0 %v9549_v38  ;;  %v5343_v44 = vpop.f32.mrf.mxu3  ;;  %v10740_v38 = vld [vmem:[#allocation13 + $0x20c] sm:$0xf0] }
 0x357   :  { %v5344_v26 = vadd.f32 %v5343_v44, %v5331_v1  ;;  %6422 = vmatpush.bf16.msra.mxu2 %v9781_v52  ;;  %v9534_v1 = vld [vmem:[#allocation13 + $0x98] sm:$0xf0] }
 0x358   :  { %5599 = vmatpush.bf16.msrb.mxu3 %v9377_v0  ;;  %v9484_v0 = vld [vmem:[#allocation13 + $0x28] sm:$0xf] }
 0x359   :  { %v9485_v17 = vor.u32 %v10681_v22, %v9484_v0  ;;  %v9518_v0 = vld [vmem:[#allocation13 + $0x78] sm:$0xf0]  ;;  %v9677_v22 = vor.u32 %v10729_v41, %v9676_v55 }
 0x35a   :  { %6463 = vmatpush.bf16.msrb.mxu1 %v9625_v18  ;;  %6500 = vmatpush.bf16.msra.mxu0 %v9533_v43  ;;  %v10699_v18 = vld [vmem:[#allocation13 + $0xcc] sm:$0xf]  ;;  %v10733_v43 = vld [vmem:[#allocation13 + $0x1d4] sm:$0xf0] }
 0x35b   :  { %6423 = vmatpush.bf16.msra.mxu2 %v9765_v6  ;;  %v9569_v34 = vor.u32 %v10699_v18, %v9566_v40  ;;  %v9693_v52 = vor.u32 %v10733_v43, %v9692_v39  ;;  %v9660_v6 = vld [vmem:[#allocation13 + $0x188] sm:$0xf] }
 0x35c   :  { %5600 = vmatpush.bf16.msrb.mxu3 %v9361_v13  ;;  %v9585_v13 = vor.u32 %v10703_v10, %v9582_v16  ;;  %v9644_v10 = vld [vmem:[#allocation13 + $0x168] sm:$0xf]  ;;  %v10721_v16 = vld [vmem:[#allocation13 + $0x174] sm:$0xf0] }
 0x35d   :  { %6453 = vmatmul.bf16.vlgmr.msrb.gmra.mxu0 %v11438_v53  ;;  %v9645_v40 = vor.u32 %v10721_v16, %v9644_v10  ;;  %v10723_v16 = vld [vmem:[#allocation13 + $0x18c] sm:$0xf] }
 0x35e   :  { %6464 = vmatpush.bf16.msrb.mxu1 %v9609_v2  ;;  %6501 = vmatpush.bf16.msra.mxu0 %v9517_v54  ;;  %v5345_v46 = vpop.f32.mrf.mxu3  ;;  %v11450_v59 = vpop.f32.mrf.mxu0 }
 0x35f   :  { %6424 = vmatpush.bf16.msra.mxu2 %v9749_v3  ;;  %v9798_v46 = vld [vmem:[#allocation13 + $0x2b0] sm:$0xf0]  ;;  %v9785_v3 = vor.u32 %v10754_v27, %v9782_v19 }
 0x360   :  { %5601 = vmatpush.bf16.msrb.mxu3 %v9345_v36  ;;  %v9717_v36 = vor.u32 %v10740_v38, %v9716_v31 }
 0x362   :  { %6465 = vmatpush.bf16.msrb.mxu1 %v9593_v8  ;;  %6502 = vmatpush.bf16.msra.mxu0 %v9501_v61  ;;  %v9817_v8 = vor.u32 %v10762_v47, %v9814_v7  ;;  %v9537_v61 = vor.u32 %v10691_v5, %v9534_v1  ;;  %v10735_v5 = vld [vmem:[#allocation13 + $0x1ec] sm:$0xf]  ;;  %v9710_v1 = vld [vmem:[#allocation13 + $0x1f8] sm:$0xf0] }
 0x363   :  { %5602 = vmatmul.bf16.vlgmr.msrb.gmra.mxu3 %v11380_v60  ;;  %v5357_v60 = vadd.f32 %v11405_v32, %v5344_v26  ;;  %v11448_v63 = vpop.f32.mrf.mxu1  ;;  %v9732_v32 = vld [vmem:[#allocation13 + $0x220] sm:$0xf]  ;;  %v10758_v26 = vld [vmem:[#allocation13 + $0x2a4] sm:$0xf] }
 0x364   :  { %v9733_v11 = vor.u32 %v10744_v23, %v9732_v32  ;;  %v9801_v56 = vor.u32 %v10758_v26, %v9798_v46  ;;  %v9505_v32 = vor.u32 %v10683_v24, %v9502_v58  ;;  %v10750_v23 = vld [vmem:[#allocation13 + $0x264] sm:$0xf]  ;;  %v9678_v24 = vld [vmem:[#allocation13 + $0x1b8] sm:$0xf0]  ;;  %v9924_v58 = vld [vmem:[#allocation13 + $0x3a0] sm:$0xf] }
 0x365   :  { %v5370_v9 = vadd.f32 %v11421_v62, %v5357_v60  ;;  %v10725_v60 = vld [vmem:[#allocation13 + $0x194] sm:$0xf0] }
 0x366   :  { %6503 = vmatpush.bf16.msra.mxu0 %v9485_v17  ;;  %v11453_v29 = vpop.f32.mrf.mxu2  ;;  %v5395_v4 = vpop.f32.mrf.mxu3  ;;  %6425 = vmatpush.bf16.msra.mxu2 %v9733_v11  ;;  %v9521_v17 = vor.u32 %v10687_v57, %v9518_v0  ;;  %v10679_v11 = vld [vmem:[#allocation13 + $0x2c] sm:$0xf]  ;;  %v9713_v57 = vor.u32 %v10735_v5, %v9710_v1  ;;  %v10769_v5 = vld [vmem:[#allocation13 + $0x2f4] sm:$0xf0]  ;;  %v9844_v1 = vld [vmem:[#allocation13 + $0x300] sm:$0xf] }
 0x367   :  { %v5383_v21 = vadd.f32 %v11440_v14, %v5370_v9  ;;  %v5514_v33 = vpop.f32.mrf.mxu0  ;;  %v9550_v14 = vld [vmem:[#allocation13 + $0xb8] sm:$0xf0]  ;;  %v9661_v9 = vor.u32 %v10725_v60, %v9660_v6  ;;  %v10731_v0 = vld [vmem:[#allocation13 + $0x1cc] sm:$0xf]  ;;  %v9940_v6 = vld [vmem:[#allocation13 + $0x3c0] sm:$0xf] }
 0x368   :  { %v9553_v49 = vor.u32 %v10695_v37, %v9550_v14  ;;  %v10675_v33 = vld [vmem:[#allocation13 + $0xc] sm:$0xf]  ;;  %v10713_v37 = vld [vmem:[#allocation13 + $0x134] sm:$0xf0]  ;;  %v10796_v60 = vld [vmem:[#allocation13 + $0x3cc] sm:$0xf0] }
 0x369   :  { %v5396_v28 = vadd.f32 %v5395_v4, %v5383_v21  ;;  %v9486_v21 = vld [vmem:[#allocation13 + $0x38] sm:$0xf0]  ;;  %v9628_v4 = vld [vmem:[#allocation13 + $0x148] sm:$0xf] }
 0x36a   :  { %6504 = vmatpush.bf16.msra.mxu0 %v9469_v25  ;;  %6426 = vmatpush.bf16.msra.mxu2 %v9717_v36  ;;  %v3906_v25 = vperm.slane %v11410_v45, 3  ;;  %v9489_v31 = vor.u32 %v10679_v11, %v9486_v21  ;;  %v9629_v35 = vor.u32 %v10717_v48, %v9628_v4  ;;  %v10719_v21 = vld [vmem:[#allocation13 + $0x16c] sm:$0xf]  ;;  %v10784_v4 = vld [vmem:[#allocation13 + $0x36c] sm:$0xf0] }
 0x36b   :  { %v5475_v62 = vpop.f32.mrf.mxu1  ;;  %v5608_v2 = vmax.f32 %v5396_v28, 0.0  ;;  %v10746_v28 = vld [vmem:[#allocation13 + $0x244] sm:$0xf] }
 0x36c   :  { %v9750_v62 = vld [vmem:[#allocation13 + $0x250] sm:$0xf0]  ;;  %v5513_v20 = vadd.f32 %v11450_v59, %v3906_v25  ;;  %v10742_v59 = vld [vmem:[#allocation13 + $0x224] sm:$0xf]  ;;  %v9662_v25 = vld [vmem:[#allocation13 + $0x198] sm:$0xf0] }
 0x36d   :  { %6505 = vmatmul.bf16.vlgmr.msra.gmra.mxu0 %v11438_v53  ;;  %v11457_v44 = vpack.c.bf16 %v5608_v2, %v5608_v2  ;;  %v9753_v38 = vor.u32 %v10746_v28, %v9750_v62  ;;  %v9612_v2 = vld [vmem:[#allocation13 + $0x128] sm:$0xf]  ;;  %v9665_v11 = vor.u32 %v10723_v16, %v9662_v25  ;;  %v10715_v62 = vld [vmem:[#allocation13 + $0x14c] sm:$0xf]  ;;  %v10786_v16 = vld [vmem:[#allocation13 + $0x384] sm:$0xf] }
 0x36e   :  { %6549 = vmatpush.bf16.msrb.mxu0 %v9585_v13  ;;  %6471 = vmatpush.bf16.msrb.mxu2 %v9833_v42  ;;  %v5436_v51 = vpop.f32.mrf.mxu2  ;;  %v5397_v54 = vpop.f32.mrf.mxu3  ;;  %v9766_v13 = vld [vmem:[#allocation13 + $0x270] sm:$0xf0]  ;;  %v9613_v47 = vor.u32 %v10713_v37, %v9612_v2  ;;  %v10711_v2 = vld [vmem:[#allocation13 + $0x12c] sm:$0xf]  ;;  %v9614_v37 = vld [vmem:[#allocation13 + $0x138] sm:$0xf0] }
 0x36f   :  { %6414 = vmatmul.bf16.vlgmr.msra.gmra.mxu1 %v11457_v44  ;;  %v9769_v18 = vor.u32 %v10750_v23, %v9766_v13  ;;  %v9734_v42 = vld [vmem:[#allocation13 + $0x230] sm:$0xf0]  ;;  %v10709_v51 = vld [vmem:[#allocation13 + $0x114] sm:$0xf0]  ;;  %v10738_v54 = vld [vmem:[#allocation13 + $0x204] sm:$0xf] }
 0x370   :  { %6510 = vmatpush.bf16.msra.mxu1 %v9709_v12  ;;  %v5435_v12 = vadd.f32 %v11453_v29, %v11436_v50  ;;  %v9737_v39 = vor.u32 %v10742_v59, %v9734_v42  ;;  %v9956_v50 = vld [vmem:[#allocation13 + $0x3e0] sm:$0xf]  ;;  %v10800_v29 = vld [vmem:[#allocation13 + $0x3ec] sm:$0xf0]  ;;  %v9910_v25 = vld [vmem:[#allocation13 + $0x390] sm:$0xf0] }
 0x371   :  { %v10788_v23 = vld [vmem:[#allocation13 + $0x38c] sm:$0xf0] }
 0x372   :  { %6550 = vmatpush.bf16.msrb.mxu0 %v9569_v34  ;;  %6472 = vmatpush.bf16.msrb.mxu2 %v9817_v8  ;;  %v9470_v34 = vld [vmem:[#allocation13 + $0x18] sm:$0xf0]  ;;  %v9596_v8 = vld [vmem:[#allocation13 + $0x108] sm:$0xf]  ;;  %v10776_v59 = vld [vmem:[#allocation13 + $0x32c] sm:$0xf0] }
 0x373   :  { %v9473_v14 = vor.u32 %v10675_v33, %v9470_v34 }
 0x374   :  { %6511 = vmatpush.bf16.msra.mxu1 %v9693_v52  ;;  %v9718_v52 = vld [vmem:[#allocation13 + $0x210] sm:$0xf0] }
 0x375   :  { %v9721_v26 = vor.u32 %v10738_v54, %v9718_v52  ;;  %v10772_v54 = vld [vmem:[#allocation13 + $0x30c] sm:$0xf0] }
 0x376   :  { %6551 = vmatpush.bf16.msrb.mxu0 %v9553_v49  ;;  %6473 = vmatpush.bf16.msrb.mxu2 %v9801_v56  ;;  %v9957_v56 = vor.u32 %v10800_v29, %v9956_v50  ;;  %v9845_v52 = vor.u32 %v10772_v54, %v9844_v1 }
 0x378   :  { %6512 = vmatpush.bf16.msra.mxu1 %v9677_v22  ;;  %v9694_v22 = vld [vmem:[#allocation13 + $0x1d8] sm:$0xf0]  ;;  %6432 = vmatpush.bf16.msra.mxu3 %v9957_v56  ;;  %v9820_v56 = vld [vmem:[#allocation13 + $0x2c8] sm:$0xf] }
 0x37a   :  { %6552 = vmatpush.bf16.msrb.mxu0 %v9537_v61  ;;  %6474 = vmatpush.bf16.msrb.mxu2 %v9785_v3  ;;  %v9597_v61 = vor.u32 %v10709_v51, %v9596_v8  ;;  %v10727_v3 = vld [vmem:[#allocation13 + $0x1ac] sm:$0xf] }
 0x37b   :  { %v9681_v10 = vor.u32 %v10727_v3, %v9678_v24  ;;  %v10707_v8 = vld [vmem:[#allocation13 + $0x10c] sm:$0xf]  ;;  %v10790_v3 = vld [vmem:[#allocation13 + $0x3a4] sm:$0xf]  ;;  %v9926_v24 = vld [vmem:[#allocation13 + $0x3b0] sm:$0xf0] }
 0x37c   :  { %6513 = vmatpush.bf16.msra.mxu1 %v9661_v9  ;;  %v10792_v9 = vld [vmem:[#allocation13 + $0x3ac] sm:$0xf0] }
 0x37e   :  { %6553 = vmatpush.bf16.msrb.mxu0 %v9521_v17  ;;  %6475 = vmatpush.bf16.msrb.mxu2 %v9769_v18  ;;  %v11465_v15 = vpop.f32.mrf.mxu0  ;;  %v9697_v17 = vor.u32 %v10731_v0, %v9694_v22  ;;  %v9646_v18 = vld [vmem:[#allocation13 + $0x178] sm:$0xf0]  ;;  %v10794_v0 = vld [vmem:[#allocation13 + $0x3c4] sm:$0xf]  ;;  %v9942_v22 = vld [vmem:[#allocation13 + $0x3d0] sm:$0xf0] }
 0x37f   :  { %6466 = vmatmul.bf16.vlgmr.msrb.gmra.mxu1 %v11457_v44  ;;  %v9649_v28 = vor.u32 %v10719_v21, %v9646_v18  ;;  %v10782_v21 = vld [vmem:[#allocation13 + $0x364] sm:$0xf]  ;;  %v9894_v18 = vld [vmem:[#allocation13 + $0x370] sm:$0xf0] }
 0x380   :  { %6514 = vmatpush.bf16.msra.mxu1 %v9645_v40  ;;  %v9892_v40 = vld [vmem:[#allocation13 + $0x360] sm:$0xf] }
 0x381   :  { %v9893_v48 = vor.u32 %v10784_v4, %v9892_v40  ;;  %v9897_v40 = vor.u32 %v10782_v21, %v9894_v18 }
 0x382   :  { %6554 = vmatpush.bf16.msrb.mxu0 %v9505_v32  ;;  %6476 = vmatpush.bf16.msrb.mxu2 %v9753_v38  ;;  %v9908_v32 = vld [vmem:[#allocation13 + $0x380] sm:$0xf]  ;;  %v10780_v38 = vld [vmem:[#allocation13 + $0x34c] sm:$0xf0] }
 0x383   :  { %v5525_v45 = vpop.f32.mrf.mxu1  ;;  %v9909_v13 = vor.u32 %v10788_v23, %v9908_v32  ;;  %v9913_v32 = vor.u32 %v10786_v16, %v9910_v25  ;;  %v10739_v16 = vld [vmem:[#allocation13 + $0x20c] sm:$0xf]  ;;  %v9726_v25 = vld [vmem:[#allocation13 + $0x218] sm:$0xf0] }
 0x384   :  { %v11463_v36 = vadd.f32 %v5525_v45, %v5513_v20  ;;  %6515 = vmatpush.bf16.msra.mxu1 %v9629_v35  ;;  %v9630_v20 = vld [vmem:[#allocation13 + $0x158] sm:$0xf0]  ;;  %v9729_v21 = vor.u32 %v10739_v16, %v9726_v25 }
 0x385   :  { %v9633_v35 = vor.u32 %v10715_v62, %v9630_v20  ;;  %v9878_v62 = vld [vmem:[#allocation13 + $0x350] sm:$0xf0] }
 0x386   :  { %6555 = vmatpush.bf16.msrb.mxu0 %v9489_v31  ;;  %v5447_v43 = vpop.f32.mrf.mxu3  ;;  %v11469_v49 = vpop.f32.mrf.mxu2  ;;  %6477 = vmatpush.bf16.msrb.mxu2 %v9737_v39  ;;  %v9876_v31 = vld [vmem:[#allocation13 + $0x340] sm:$0xf]  ;;  %v9617_v39 = vor.u32 %v10711_v2, %v9614_v37 }
 0x387   :  { %v5448_v7 = vadd.f32 %v5447_v43, %v5435_v12  ;;  %v5566_v46 = vpop.f32.mrf.mxu0  ;;  %v9877_v45 = vor.u32 %v10780_v38, %v9876_v31  ;;  %v9740_v38 = vld [vmem:[#allocation13 + $0x228] sm:$0xf] }
 0x388   :  { %6516 = vmatpush.bf16.msra.mxu1 %v9613_v47 }
 0x389   :  { %v5461_v55 = vadd.f32 %v11433_v30, %v5448_v7  ;;  %v9941_v30 = vor.u32 %v10796_v60, %v9940_v6  ;;  %v9836_v7 = vld [vmem:[#allocation13 + $0x2e8] sm:$0xf]  ;;  %v9945_v6 = vor.u32 %v10794_v0, %v9942_v22  ;;  %v10751_v0 = vld [vmem:[#allocation13 + $0x26c] sm:$0xf]  ;;  %v9774_v22 = vld [vmem:[#allocation13 + $0x278] sm:$0xf0] }
 0x38a   :  { %6556 = vmatpush.bf16.msrb.mxu0 %v9473_v14  ;;  %6478 = vmatpush.bf16.msrb.mxu2 %v9721_v26  ;;  %v9860_v14 = vld [vmem:[#allocation13 + $0x320] sm:$0xf]  ;;  %v9837_v46 = vor.u32 %v10769_v5, %v9836_v7 }
 0x38b   :  { %v5527_v41 = vpop.f32.mrf.mxu1  ;;  %6433 = vmatpush.bf16.msra.mxu3 %v9941_v30  ;;  %v5474_v33 = vadd.f32 %v11448_v63, %v5461_v55  ;;  %v9861_v42 = vor.u32 %v10776_v59, %v9860_v14  ;;  %v9598_v63 = vld [vmem:[#allocation13 + $0x118] sm:$0xf0]  ;;  %v10798_v55 = vld [vmem:[#allocation13 + $0x3e4] sm:$0xf] }
 0x38c   :  { %6517 = vmatpush.bf16.msra.mxu1 %v9597_v61  ;;  %v9958_v41 = vld [vmem:[#allocation13 + $0x3f0] sm:$0xf0] }
 0x38d   :  { %6557 = vmatmul.bf16.vlgmr.msrb.gmra.mxu0 %v11438_v53  ;;  %v9925_v53 = vor.u32 %v10792_v9, %v9924_v58  ;;  %v5487_v12 = vadd.f32 %v11469_v49, %v5474_v33  ;;  %v9601_v49 = vor.u32 %v10707_v8, %v9598_v63  ;;  %v9961_v29 = vor.u32 %v10798_v55, %v9958_v41  ;;  %v10774_v33 = vld [vmem:[#allocation13 + $0x324] sm:$0xf]  ;;  %v9838_v8 = vld [vmem:[#allocation13 + $0x2f8] sm:$0xf0] }
 0x38e   :  { %v5449_v27 = vpop.f32.mrf.mxu3  ;;  %v5488_v19 = vpop.f32.mrf.mxu2  ;;  %v9929_v58 = vor.u32 %v10790_v3, %v9926_v24  ;;  %v10770_v63 = vld [vmem:[#allocation13 + $0x304] sm:$0xf]  ;;  %v10743_v3 = vld [vmem:[#allocation13 + $0x22c] sm:$0xf]  ;;  %v9742_v24 = vld [vmem:[#allocation13 + $0x238] sm:$0xf0] }
 0x38f   :  { %6518 = vmatmul.bf16.vlgmr.msra.gmra.mxu1 %v11457_v44  ;;  %6434 = vmatpush.bf16.msra.mxu3 %v9925_v53  ;;  %v9804_v19 = vld [vmem:[#allocation13 + $0x2a8] sm:$0xf] }
 0x390   :  { %6562 = vmatpush.bf16.msrb.mxu1 %v9713_v57  ;;  %v10765_v57 = vld [vmem:[#allocation13 + $0x2d4] sm:$0xf0]  ;;  %v9788_v53 = vld [vmem:[#allocation13 + $0x288] sm:$0xf] }
 0x391   :  { %v9821_v30 = vor.u32 %v10765_v57, %v9820_v56  ;;  %v10755_v56 = vld [vmem:[#allocation13 + $0x28c] sm:$0xf] }
 0x393   :  { %6435 = vmatpush.bf16.msra.mxu3 %v9909_v13  ;;  %v9772_v13 = vld [vmem:[#allocation13 + $0x268] sm:$0xf] }
 0x394   :  { %6563 = vmatpush.bf16.msrb.mxu1 %v9697_v17  ;;  %v10761_v17 = vld [vmem:[#allocation13 + $0x2b4] sm:$0xf0] }
 0x395   :  { %v9805_v9 = vor.u32 %v10761_v17, %v9804_v19 }
 0x397   :  { %6436 = vmatpush.bf16.msra.mxu3 %v9893_v48  ;;  %v10749_v48 = vld [vmem:[#allocation13 + $0x254] sm:$0xf0] }
 0x398   :  { %6564 = vmatpush.bf16.msrb.mxu1 %v9681_v10  ;;  %v10757_v10 = vld [vmem:[#allocation13 + $0x294] sm:$0xf0] }
 0x399   :  { %v9789_v23 = vor.u32 %v10757_v10, %v9788_v53  ;;  %v9745_v53 = vor.u32 %v10743_v3, %v9742_v24  ;;  %v10783_v24 = vld [vmem:[#allocation13 + $0x36c] sm:$0xf] }
 0x39b   :  { %6437 = vmatpush.bf16.msra.mxu3 %v9877_v45  ;;  %v10745_v45 = vld [vmem:[#allocation13 + $0x234] sm:$0xf0] }
 0x39c   :  { %6565 = vmatpush.bf16.msrb.mxu1 %v9665_v11  ;;  %v10753_v11 = vld [vmem:[#allocation13 + $0x274] sm:$0xf0]  ;;  %v9741_v14 = vor.u32 %v10745_v45, %v9740_v38 }
 0x39d   :  { %v9773_v4 = vor.u32 %v10753_v11, %v9772_v13  ;;  %v10801_v13 = vld [vmem:[#allocation13 + $0x3f4] sm:$0xf0] }
 0x39f   :  { %6438 = vmatpush.bf16.msra.mxu3 %v9861_v42  ;;  %v9724_v42 = vld [vmem:[#allocation13 + $0x208] sm:$0xf] }
 0x3a0   :  { %6566 = vmatpush.bf16.msrb.mxu1 %v9649_v28  ;;  %v10778_v28 = vld [vmem:[#allocation13 + $0x344] sm:$0xf] }
 0x3a1   :  { %v9881_v20 = vor.u32 %v10778_v28, %v9878_v62 }
 0x3a2   :  { %v11475_v34 = vpop.f32.mrf.mxu1 }
 0x3a3   :  { %6439 = vmatpush.bf16.msra.mxu3 %v9845_v52 }
 0x3a4   :  { %6567 = vmatpush.bf16.msrb.mxu1 %v9633_v35  ;;  %v9862_v35 = vld [vmem:[#allocation13 + $0x330] sm:$0xf0] }
 0x3a5   :  { %v9865_v2 = vor.u32 %v10774_v33, %v9862_v35  ;;  %v9916_v35 = vld [vmem:[#allocation13 + $0x388] sm:$0xf] }
 0x3a6   :  { %v5499_v43 = vpop.f32.mrf.mxu3  ;;  %v11478_v47 = vpop.f32.mrf.mxu2 }
 0x3a7   :  { %v5500_v51 = vadd.f32 %v5499_v43, %v5487_v12  ;;  %6484 = vmatpush.bf16.msrb.mxu3 %v9961_v29  ;;  %v5539_v37 = vadd.f32 %v11478_v47, %v11463_v36  ;;  %v10741_v12 = vld [vmem:[#allocation13 + $0x214] sm:$0xf0]  ;;  %v10763_v36 = vld [vmem:[#allocation13 + $0x2cc] sm:$0xf]  ;;  %v9822_v47 = vld [vmem:[#allocation13 + $0x2d8] sm:$0xf0] }
 0x3a8   :  { %6568 = vmatpush.bf16.msrb.mxu1 %v9617_v39  ;;  %v10767_v39 = vld [vmem:[#allocation13 + $0x2ec] sm:$0xf]  ;;  %v9725_v54 = vor.u32 %v10741_v12, %v9724_v42  ;;  %v9825_v41 = vor.u32 %v10763_v36, %v9822_v47  ;;  %v9900_v12 = vld [vmem:[#allocation13 + $0x368] sm:$0xf]  ;;  %v10773_v47 = vld [vmem:[#allocation13 + $0x314] sm:$0xf0] }
 0x3a9   :  { %v5609_v26 = vmax.f32 %v5500_v51, 0.0  ;;  %v9846_v51 = vld [vmem:[#allocation13 + $0x310] sm:$0xf0]  ;;  %v9841_v52 = vor.u32 %v10767_v39, %v9838_v8  ;;  %v10785_v39 = vld [vmem:[#allocation13 + $0x374] sm:$0xf0] }
 0x3aa   :  { %v5579_v50 = vpop.f32.mrf.mxu1  ;;  %v9849_v5 = vor.u32 %v10770_v63, %v9846_v51  ;;  %v9884_v8 = vld [vmem:[#allocation13 + $0x348] sm:$0xf] }
 0x3ab   :  { %v11480_v61 = vpack.c.bf16 %v5609_v26, %v5609_v26  ;;  %6485 = vmatpush.bf16.msrb.mxu3 %v9945_v6  ;;  %v10759_v50 = vld [vmem:[#allocation13 + $0x2ac] sm:$0xf]  ;;  %v9852_v36 = vld [vmem:[#allocation13 + $0x308] sm:$0xf] }
 0x3ac   :  { %6569 = vmatpush.bf16.msrb.mxu1 %v9601_v49  ;;  %v9806_v49 = vld [vmem:[#allocation13 + $0x2b8] sm:$0xf0] }
 0x3ad   :  { %6427 = vmatmul.bf16.vlgmr.msra.gmra.mxu2 %v11480_v61 }
 0x3ae   :  { %6523 = vmatpush.bf16.msra.mxu2 %v9837_v46  ;;  %v5501_v60 = vpop.f32.mrf.mxu3  ;;  %v5540_v27 = vpop.f32.mrf.mxu2  ;;  %v9809_v46 = vor.u32 %v10759_v50, %v9806_v49  ;;  %v9853_v49 = vor.u32 %v10773_v47, %v9852_v36 }
 0x3af   :  { %6570 = vmatmul.bf16.vlgmr.msrb.gmra.mxu1 %v11457_v44  ;;  %6486 = vmatpush.bf16.msrb.mxu3 %v9929_v58  ;;  %v9756_v44 = vld [vmem:[#allocation13 + $0x248] sm:$0xf]  ;;  %v9777_v60 = vor.u32 %v10751_v0, %v9774_v22  ;;  %v10747_v27 = vld [vmem:[#allocation13 + $0x24c] sm:$0xf]  ;;  %v9934_v22 = vld [vmem:[#allocation13 + $0x3b8] sm:$0xf0] }
 0x3b0   :  { %v9757_v31 = vor.u32 %v10749_v48, %v9756_v44  ;;  %v10797_v44 = vld [vmem:[#allocation13 + $0x3d4] sm:$0xf0]  ;;  %v11493_v48 = vld [vmem:[#allocation14] sm:$0xf]  ;;  %v10791_v0 = vld [vmem:[#allocation13 + $0x3ac] sm:$0xf] }
 0x3b1   :  { %v5745_v38 = vperm.slane %v11493_v48, 0 }
 0x3b2   :  { %6524 = vmatpush.bf16.msra.mxu2 %v9821_v30  ;;  %v9758_v30 = vld [vmem:[#allocation13 + $0x258] sm:$0xf0] }
 0x3b3   :  { %6487 = vmatpush.bf16.msrb.mxu3 %v9913_v32  ;;  %v9761_v17 = vor.u32 %v10747_v27, %v9758_v30  ;;  %v10787_v30 = vld [vmem:[#allocation13 + $0x38c] sm:$0xf] }
 0x3b6   :  { %6525 = vmatpush.bf16.msra.mxu2 %v9805_v9 }
 0x3b7   :  { %6488 = vmatpush.bf16.msrb.mxu3 %v9897_v40 }
 0x3ba   :  { %6526 = vmatpush.bf16.msra.mxu2 %v9789_v23  ;;  %v9964_v23 = vld [vmem:[#allocation13 + $0x3e8] sm:$0xf] }
 0x3bb   :  { %6489 = vmatpush.bf16.msrb.mxu3 %v9881_v20  ;;  %v9965_v18 = vor.u32 %v10801_v13, %v9964_v23  ;;  %v9932_v20 = vld [vmem:[#allocation13 + $0x3a8] sm:$0xf]  ;;  %v9886_v23 = vld [vmem:[#allocation13 + $0x358] sm:$0xf0] }
 0x3bd   :  { %6479 = vmatmul.bf16.vlgmr.msrb.gmra.mxu2 %v11480_v61 }
 0x3be   :  { %6527 = vmatpush.bf16.msra.mxu2 %v9773_v4  ;;  %v9948_v4 = vld [vmem:[#allocation13 + $0x3c8] sm:$0xf] }
 0x3bf   :  { %6490 = vmatpush.bf16.msrb.mxu3 %v9865_v2  ;;  %v9949_v62 = vor.u32 %v10797_v44, %v9948_v4  ;;  %v10789_v2 = vld [vmem:[#allocation13 + $0x394] sm:$0xf0]  ;;  %v10771_v4 = vld [vmem:[#allocation13 + $0x30c] sm:$0xf]  ;;  %v9854_v44 = vld [vmem:[#allocation13 + $0x318] sm:$0xf0] }
 0x3c2   :  { %6528 = vmatpush.bf16.msra.mxu2 %v9757_v31  ;;  %v10793_v31 = vld [vmem:[#allocation13 + $0x3b4] sm:$0xf0] }
 0x3c3   :  { %6491 = vmatpush.bf16.msrb.mxu3 %v9849_v5  ;;  %v9933_v45 = vor.u32 %v10793_v31, %v9932_v20  ;;  %v9868_v5 = vld [vmem:[#allocation13 + $0x328] sm:$0xf] }
 0x3c6   :  { %v5551_v59 = vpop.f32.mrf.mxu3  ;;  %v5590_v7 = vpop.f32.mrf.mxu2  ;;  %6529 = vmatpush.bf16.msra.mxu2 %v9741_v14 }
 0x3c7   :  { %v5552_v43 = vadd.f32 %v5551_v59, %v5539_v37  ;;  %v9917_v59 = vor.u32 %v10789_v2, %v9916_v35 }
 0x3c9   :  { %v5565_v1 = vadd.f32 %v11465_v15, %v5552_v43  ;;  %v9790_v15 = vld [vmem:[#allocation13 + $0x298] sm:$0xf0]  ;;  %v9901_v43 = vor.u32 %v10785_v39, %v9900_v12 }
 0x3ca   :  { %6530 = vmatpush.bf16.msra.mxu2 %v9725_v54  ;;  %v6402_v29 = vpop.f32.mrf.mxu0  ;;  %v9793_v57 = vor.u32 %v10755_v56, %v9790_v15  ;;  %v5746_v54 = vperm.slane %v11493_v48, 1  ;;  %v10795_v56 = vld [vmem:[#allocation13 + $0x3cc] sm:$0xf]  ;;  %v9950_v15 = vld [vmem:[#allocation13 + $0x3d8] sm:$0xf0] }
 0x3cb   :  { %v5578_v19 = vadd.f32 %v11475_v34, %v5565_v1  ;;  %v6403_v37 = vadd.f32 %v6402_v29, %v5745_v38  ;;  %v10777_v1 = vld [vmem:[#allocation13 + $0x334] sm:$0xf0] }
 0x3cd   :  { %6531 = vmatmul.bf16.vlgmr.msra.gmra.mxu2 %v11480_v61  ;;  %v5591_v9 = vadd.f32 %v5590_v7, %v5578_v19  ;;  %v9918_v19 = vld [vmem:[#allocation13 + $0x398] sm:$0xf0] }
 0x3ce   :  { %6575 = vmatpush.bf16.msrb.mxu2 %v9841_v52  ;;  %v5553_v55 = vpop.f32.mrf.mxu3  ;;  %v5592_v26 = vpop.f32.mrf.mxu2  ;;  %v9869_v52 = vor.u32 %v10777_v1, %v9868_v5  ;;  %v9921_v3 = vor.u32 %v10787_v30, %v9918_v19 }
 0x3cf   :  { %v10799_v55 = vld [vmem:[#allocation13 + $0x3ec] sm:$0xf] }
 0x3d2   :  { %6576 = vmatpush.bf16.msrb.mxu2 %v9825_v41  ;;  %v6404_v6 = vpop.f32.mrf.mxu0  ;;  %v9966_v41 = vld [vmem:[#allocation13 + $0x3f8] sm:$0xf0] }
 0x3d6   :  { %6577 = vmatpush.bf16.msrb.mxu2 %v9809_v46  ;;  %v9969_v46 = vor.u32 %v10799_v55, %v9966_v41 }
 0x3da   :  { %6578 = vmatpush.bf16.msrb.mxu2 %v9793_v57  ;;  %v6454_v58 = vpop.f32.mrf.mxu0  ;;  %v9953_v57 = vor.u32 %v10795_v56, %v9950_v15 }
 0x3db   :  { %v6455_v26 = vadd.f32 %v6454_v58, %v5746_v54  ;;  %v9902_v58 = vld [vmem:[#allocation13 + $0x378] sm:$0xf0] }
 0x3dc   :  { %v9905_v16 = vor.u32 %v10783_v24, %v9902_v58 }
 0x3de   :  { %6579 = vmatpush.bf16.msrb.mxu2 %v9777_v60  ;;  %v9937_v60 = vor.u32 %v10791_v0, %v9934_v22 }
 0x3e2   :  { %6580 = vmatpush.bf16.msrb.mxu2 %v9761_v17  ;;  %v6456_v34 = vpop.f32.mrf.mxu0  ;;  %v5747_v17 = vperm.slane %v11493_v48, 2 }
 0x3e6   :  { %v5603_v10 = vpop.f32.mrf.mxu3  ;;  %6581 = vmatpush.bf16.msrb.mxu2 %v9745_v53 }
 0x3e7   :  { %v5604_v32 = vadd.f32 %v5603_v10, %v5591_v9 }
 0x3e9   :  { %v5610_v11 = vmax.f32 %v5604_v32, 0.0  ;;  %v10779_v32 = vld [vmem:[#allocation13 + $0x34c] sm:$0xf] }
 0x3ea   :  { %6582 = vmatpush.bf16.msrb.mxu2 %v9729_v21  ;;  %v6506_v33 = vpop.f32.mrf.mxu0  ;;  %v9889_v13 = vor.u32 %v10779_v32, %v9886_v23  ;;  %v9870_v21 = vld [vmem:[#allocation13 + $0x338] sm:$0xf0] }
 0x3eb   :  { %v11490_v40 = vpack.c.bf16 %v5610_v11, %v5610_v11  ;;  %v6507_v9 = vadd.f32 %v6506_v33, %v5747_v17  ;;  %v10775_v11 = vld [vmem:[#allocation13 + $0x32c] sm:$0xf] }
 0x3ec   :  { %v6415_v14 = vpop.f32.mrf.mxu1  ;;  %v9873_v34 = vor.u32 %v10775_v11, %v9870_v21 }
 0x3ed   :  { %6440 = vmatmul.bf16.vlgmr.msra.gmra.mxu3 %v11490_v40  ;;  %6583 = vmatmul.bf16.vlgmr.msrb.gmra.mxu2 %v11480_v61  ;;  %v11497_v42 = vadd.f32 %v6415_v14, %v6403_v37  ;;  %v10781_v61 = vld [vmem:[#allocation13 + $0x354] sm:$0xf0] }
 0x3ee   :  { %6536 = vmatpush.bf16.msra.mxu3 %v9965_v18  ;;  %v5605_v28 = vpop.f32.mrf.mxu3  ;;  %v9885_v51 = vor.u32 %v10781_v61, %v9884_v8 }
 0x3ef   :  { %v9857_v28 = vor.u32 %v10771_v4, %v9854_v44 }
 0x3f2   :  { %6537 = vmatpush.bf16.msra.mxu3 %v9949_v62  ;;  %v6508_v7 = vpop.f32.mrf.mxu0  ;;  %v5748_v62 = vperm.slane %v11493_v48, 3 }
 0x3f4   :  { %v6417_v63 = vpop.f32.mrf.mxu1 }
 0x3f6   :  { %6538 = vmatpush.bf16.msra.mxu3 %v9933_v45 }
 0x3fa   :  { %6539 = vmatpush.bf16.msra.mxu3 %v9917_v59 }
 0x3fc   :  { %v6467_v50 = vpop.f32.mrf.mxu1 }
 0x3fd   :  { %6492 = vmatmul.bf16.vlgmr.msrb.gmra.mxu3 %v11490_v40  ;;  %v11501_v29 = vadd.f32 %v6467_v50, %v6455_v26 }
 0x3fe   :  { %6540 = vmatpush.bf16.msra.mxu3 %v9901_v43 }
 0x402   :  { %6541 = vmatpush.bf16.msra.mxu3 %v9885_v51 }
 0x404   :  { %v6469_v6 = vpop.f32.mrf.mxu1 }
 0x406   :  { %6542 = vmatpush.bf16.msra.mxu3 %v9869_v52 }
 0x40a   :  { %6543 = vmatpush.bf16.msra.mxu3 %v9853_v49  ;;  %v6558_v27 = vpop.f32.mrf.mxu0 }
 0x40b   :  { %v6559_v20 = vadd.f32 %v6558_v27, %v5748_v62 }
 0x40c   :  { %v6519_v53 = vpop.f32.mrf.mxu1 }
 0x40d   :  { %6544 = vmatmul.bf16.vlgmr.msra.gmra.mxu3 %v11490_v40  ;;  %v6520_v10 = vadd.f32 %v6519_v53, %v6507_v9 }
 0x40e   :  { %6588 = vmatpush.bf16.msrb.mxu3 %v9969_v46 }
 0x412   :  { %6589 = vmatpush.bf16.msrb.mxu3 %v9953_v57  ;;  %v6560_v25 = vpop.f32.mrf.mxu0 }
 0x414   :  { %v6521_v18 = vpop.f32.mrf.mxu1 }
 0x416   :  { %6590 = vmatpush.bf16.msrb.mxu3 %v9937_v60 }
 0x41a   :  { %6591 = vmatpush.bf16.msrb.mxu3 %v9921_v3 }
 0x41e   :  { %6592 = vmatpush.bf16.msrb.mxu3 %v9905_v16 }
 0x422   :  { %6593 = vmatpush.bf16.msrb.mxu3 %v9889_v13 }
 0x426   :  { %6594 = vmatpush.bf16.msrb.mxu3 %v9873_v34 }
 0x42a   :  { %6595 = vmatpush.bf16.msrb.mxu3 %v9857_v28 }
 0x42c   :  { %v6571_v31 = vpop.f32.mrf.mxu1 }
 0x42d   :  { %6596 = vmatmul.bf16.vlgmr.msrb.gmra.mxu3 %v11490_v40  ;;  %v6572_v38 = vadd.f32 %v6571_v31, %v6559_v20 }
 0x430   :  { %v6428_v45 = vpop.f32.mrf.mxu2 }
 0x431   :  { %v6429_v48 = vadd.f32 %v6428_v45, %v11497_v42 }
 0x434   :  { %v6573_v33 = vpop.f32.mrf.mxu1 }
 0x438   :  { %v6430_v35 = vpop.f32.mrf.mxu2 }
 0x440   :  { %v6480_v2 = vpop.f32.mrf.mxu2 }
 0x441   :  { %v6481_v8 = vadd.f32 %v6480_v2, %v11501_v29 }
 0x448   :  { %v6482_v37 = vpop.f32.mrf.mxu2 }
 0x450   :  { %v6532_v40 = vpop.f32.mrf.mxu2 }
 0x451   :  { %v6533_v5 = vadd.f32 %v6532_v40, %v6520_v10 }
 0x458   :  { %v6534_v14 = vpop.f32.mrf.mxu2 }
 0x470   :  { %v6441_v59 = vpop.f32.mrf.mxu3  ;;  %v6584_v39 = vpop.f32.mrf.mxu2 }
 0x471   :  { %v6442_v12 = vadd.f32 %v6441_v59, %v6429_v48  ;;  %v6585_v42 = vadd.f32 %v6584_v39, %v6572_v38 }
 0x473   :  { %6601 = vst [vmem:[#allocation17] sm:$0xff] %v6442_v12 }
 0x478   :  { %v6443_v43 = vpop.f32.mrf.mxu3  ;;  %v6586_v7 = vpop.f32.mrf.mxu2 }
 0x480   :  { %v6493_v61 = vpop.f32.mrf.mxu3 }
 0x481   :  { %v6494_v63 = vadd.f32 %v6493_v61, %v6481_v8 }
 0x483   :  { %6602 = vst [vmem:[#allocation17 + $0x8] sm:$0xff] %v6494_v63 }
 0x488   :  { %v6495_v51 = vpop.f32.mrf.mxu3 }
 0x490   :  { %v6545_v1 = vpop.f32.mrf.mxu3 }
 0x491   :  { %v6546_v54 = vadd.f32 %v6545_v1, %v6533_v5 }
 0x493   :  { %6603 = vst [vmem:[#allocation17 + $0x10] sm:$0xff] %v6546_v54 }
 0x498   :  { %v6547_v52 = vpop.f32.mrf.mxu3 }
 0x4b0   :  { %v6597_v36 = vpop.f32.mrf.mxu3 }
 0x4b1   :  { %v6598_v47 = vadd.f32 %v6597_v36, %v6585_v42 }
 0x4b3   :  { %6604 = vst [vmem:[#allocation17 + $0x18] sm:$0xff] %v6598_v47 }
 0x4b4   :  { %6626 = dma.vmem_to_hbm [thread:$0]  %s6622_s15, 512, %s6624_s5, [#allocation18]  }
 0x4b8   :  { %v6599_v55 = vpop.f32.mrf.mxu3 }
 0x4b9   :  { %11069 = dma.done.wait [#allocation4], 512  }
 0x4ba   :  { %11070 = vsyncadd [#allocation4], 4294966784 }
 0x4bb   :  { %11071 = dma.done.wait [#allocation18], 512  }
 0x4bc   :  { %11072 = vsyncadd [#allocation18], 4294966784 }
 0x4bd   :  { %6635 = vsyncpa [#allocation3], 1 }
 0x4be   :  { %6636 = vsyncpa [#allocation6], 1 }
 0x4bf   :  { %6637 = vsyncpa [#allocation9], 1 }
 0x4c0   :  { %6638 = vsyncpa [#allocation12], 1 }
 0x4c1   :  { %6639 = vsyncpa [#allocation15], 1 }
 0x4c2   :  { %6640 = vsyncpa [#allocation4], 1 }
 0x4c3   :  { %6641 = vsyncpa [#allocation18], 1 }

</bundles_post_ra>
